<compile_context>
chip_gen: v5e
topology: v5e:2x2
jax: 0.10.0
libtpu: 0.0.40
codegen_flags: <defaults>
</compile_context>

<pallas_src>
import functools

import numpy as np
import jax
import jax.numpy as jnp
from jax.experimental import pallas as pl
from jax.experimental.pallas import tpu as pltpu


TILE_B = 8        # images per grid step (keeps every in-kernel M a multiple of 8)
LANE_PAD = 128    # pad the logits head to a full lane width


# ----------------------------- geometry helpers -----------------------------

def conv2d_size_out(size, kernel_size, stride):
    return (size - (kernel_size - 1) - 1) // stride + 1


def cnn_output_sizes(h_in, w_in):
    h1, w1 = conv2d_size_out(h_in, 8, 4), conv2d_size_out(w_in, 8, 4)
    h2, w2 = conv2d_size_out(h1, 4, 2), conv2d_size_out(w1, 4, 2)
    h3, w3 = conv2d_size_out(h2, 3, 1), conv2d_size_out(w2, 3, 1)
    return (h1, w1), (h2, w2), (h3, w3)


# ----------------------------- the fused kernel ------------------------------

def _actor_disc_fused_kernel(cols1_ref, w1_ref, b1_ref, w2_ref, b2_ref,
                             w3_ref, b3_ref, wfc_ref, bfc_ref,
                             wfin_ref, bfin_ref, out_ref,
                             *, tile_b, n_tap2, n_pos2, n_pos3, compute_dtype):
    """Whole ActorDisc forward for one batch tile, entirely in VMEM."""
    f32 = jnp.float32
    cdt = compute_dtype

    # ---- conv1 + ReLU: one GEMM over all (conv2-tap, conv2-pos, batch) rows
    cols1 = cols1_ref[0]                                   # (n_tap2*n_pos2*tile_b, K1)
    a1 = jnp.dot(cols1, w1_ref[...], preferred_element_type=f32) + b1_ref[...]
    a1 = jnp.maximum(a1, 0.0)                              # f32, (R1, 32)

    # ---- conv2 + ReLU: accumulate over the 4x4 kernel taps -----------------
    rows2 = n_pos2 * tile_b                                # contiguous, 8-aligned slices
    z2 = jnp.zeros((rows2, w2_ref.shape[-1]), f32)
    for t in range(n_tap2):                                # 16 taps, static unroll
        a1_t = a1[t * rows2:(t + 1) * rows2, :].astype(cdt)
        z2 = z2 + jnp.dot(a1_t, w2_ref[t], preferred_element_type=f32)
    a2 = jnp.maximum(z2 + b2_ref[...], 0.0)                # f32, (n_pos2*tile_b, 64)

    # ---- conv3 + ReLU (1x1 spatial output): accumulate over 3x3 positions ---
    z3 = jnp.zeros((tile_b, w3_ref.shape[-1]), f32)
    for p in range(n_pos3):                                # 9 positions, static unroll
        a2_p = a2[p * tile_b:(p + 1) * tile_b, :].astype(cdt)
        z3 = z3 + jnp.dot(a2_p, w3_ref[p], preferred_element_type=f32)
    a3 = jnp.maximum(z3 + b3_ref[...], 0.0)                # f32, (tile_b, 64)

    # ---- fc + ReLU -----------------------------------------------------------
    emb = jnp.dot(a3.astype(cdt), wfc_ref[...], preferred_element_type=f32) + bfc_ref[...]
    emb = jnp.maximum(emb, 0.0)                            # f32, (tile_b, 512)

    # ---- final head (lane-padded to 128 so the store is unmasked) -----------
    logits = jnp.dot(emb.astype(cdt), wfin_ref[...],
                     preferred_element_type=f32) + bfin_ref[...]
    out_ref[...] = logits.astype(out_ref.dtype)            # (tile_b, 128)


# ------------------------- parameter initialization --------------------------

def orthogonal_init(key, shape, gain=1.0):
    """Mirrors torch.nn.init.orthogonal_ (flatten trailing dims, QR, sign fix)."""
    rows = shape[0]
    cols = int(np.prod(shape[1:])) if len(shape) > 1 else 1
    flat = jax.random.normal(key, (rows, cols), jnp.float32)
    transposed = rows < cols
    if transposed:
        flat = flat.T
    q, r = jnp.linalg.qr(flat)
    d = jnp.diagonal(r)
    q = q * jnp.sign(d)[None, :]
    if transposed:
        q = q.T
    return (gain * q).reshape(shape).astype(jnp.float32)


def make_params(key, s_dim, a_num, emb_dim=512, compute_dtype=jnp.bfloat16):
    """Init in torch layout (to match torch init semantics), then pre-transform
    every weight into its matmul-ready kernel layout so the forward pass pays
    zero per-call transposes."""
    c, h_in, w_in = s_dim
    (_, _), (_, _), (h3, w3) = cnn_output_sizes(h_in, w_in)
    flat = h3 * w3 * 64
    keys = jax.random.split(key, 5)
    g = float(np.sqrt(2.0))

    conv1_w = orthogonal_init(keys[0], (32, c, 8, 8), gain=g)     # OIHW
    conv2_w = orthogonal_init(keys[1], (64, 32, 4, 4), gain=g)
    conv3_w = orthogonal_init(keys[2], (64, 64, 3, 3), gain=g)
    fc_w = orthogonal_init(keys[3], (emb_dim, flat), gain=g)      # torch Linear: (out, in)
    final_w = orthogonal_init(keys[4], (a_num, emb_dim), gain=0.01)

    # conv1: (cout, cin, kh, kw) -> (kh*kw*cin, cout); feature order (di, dj, c)
    w1_t = jnp.transpose(conv1_w, (2, 3, 1, 0)).reshape(8 * 8 * c, 32)
    # conv2 / conv3: per-tap (kh*kw, cin, cout); tap index = di*kw + dj
    w2_t = jnp.transpose(conv2_w, (2, 3, 1, 0)).reshape(4 * 4, 32, 64)
    w3_t = jnp.transpose(conv3_w, (2, 3, 1, 0)).reshape(3 * 3, 64, 64)
    # fc: (emb, flat_nchw) -> (flat_nhwc, emb); NCHW->NHWC flatten permutation
    # folded in (identity when the conv3 output is 1x1 spatial).
    wfc_t = (fc_w.T.reshape(64, h3, w3, emb_dim)
             .transpose(1, 2, 0, 3)
             .reshape(flat, emb_dim))
    # final: (a_num, emb) -> (emb, LANE_PAD) zero-padded for lane-dense stores
    wfin_t = jnp.zeros((emb_dim, LANE_PAD), jnp.float32).at[:, :a_num].set(final_w.T)

    return {
        "w1": w1_t.astype(compute_dtype), "b1": jnp.zeros((1, 32), jnp.float32),
        "w2": w2_t.astype(compute_dtype), "b2": jnp.zeros((1, 64), jnp.float32),
        "w3": w3_t.astype(compute_dtype), "b3": jnp.zeros((1, 64), jnp.float32),
        "wfc": wfc_t.astype(compute_dtype), "bfc": jnp.zeros((1, emb_dim), jnp.float32),
        "wfin": wfin_t.astype(compute_dtype), "bfin": jnp.zeros((1, LANE_PAD), jnp.float32),
    }


# ----------------------------- wrapper-side im2col ---------------------------

def _im2col_nhwc(x, kh, kw, stride):
    """(B, H, W, C) -> (B, Ho, Wo, kh*kw*C), feature order (di, dj, c)."""
    bsz, h, w, c = x.shape
    ho = (h - kh) // stride + 1
    wo = (w - kw) // stride + 1
    taps = []
    for di in range(kh):
        for dj in range(kw):
            taps.append(x[:, di:di + stride * ho:stride, dj:dj + stride * wo:stride, :])
    p = jnp.stack(taps, axis=3)                 # (B, Ho, Wo, kh*kw, C)
    return p.reshape(bsz, ho, wo, kh * kw * c)


# ------------------------------ forward pass ---------------------------------

def actor_disc_forward(params, s_nchw, a_num, *, tile_b=TILE_B):
    """ActorDisc.forward: logits of shape (N, a_num).  Input s is NCHW."""
    n, c, h_in, w_in = s_nchw.shape
    (_, _), (h2, w2), (h3, w3) = cnn_output_sizes(h_in, w_in)
    # The fused kernel is specialised to the geometry where conv3's output is
    # 1x1 spatial (true for the 36x36 test shape: 36 -> 8 -> 3 -> 1).
    assert h3 == 1 and w3 == 1, "fused kernel expects a 1x1 conv3 output"

    cdt = params["w1"].dtype
    n_tap2 = 4 * 4                 # conv2 kernel taps
    n_pos2 = h2 * w2               # conv2 output positions (= 9)
    n_pos3 = 3 * 3                 # conv3 taps == conv2 output positions
    assert n_pos3 == n_pos2
    k1 = 8 * 8 * c
    rows_per_tile = n_tap2 * n_pos2 * tile_b

    # NCHW -> NHWC; pad batch to a multiple of tile_b (pad rows are discarded).
    x = jnp.transpose(s_nchw, (0, 2, 3, 1)).astype(jnp.float32)
    n_pad = ((n + tile_b - 1) // tile_b) * tile_b
    if n_pad != n:
        x = jnp.pad(x, ((0, n_pad - n), (0, 0), (0, 0), (0, 0)))
    num_tiles = n_pad // tile_b

    # conv1 im2col over the raw input (the only HBM-sized tensor).
    cols_std = _im2col_nhwc(x, 8, 8, 4)          # (n_pad, H1, W1, k1)

    # Gather into "super" layout: for conv2 tap (di2, dj2) and conv2 output
    # position (oh2, ow2), pick the conv1 patch at (oh2*2 + di2, ow2*2 + dj2).
    di2 = np.arange(4).reshape(4, 1, 1, 1)
    dj2 = np.arange(4).reshape(1, 4, 1, 1)
    oh2 = np.arange(h2).reshape(1, 1, h2, 1)
    ow2 = np.arange(w2).reshape(1, 1, 1, w2)
    i1 = np.broadcast_to(oh2 * 2 + di2, (4, 4, h2, w2)).reshape(-1)
    j1 = np.broadcast_to(ow2 * 2 + dj2, (4, 4, h2, w2)).reshape(-1)
    sup = cols_std[:, i1, j1, :]                 # (n_pad, n_tap2*n_pos2, k1)

    # Row order inside each batch tile: row = (tap*n_pos2 + pos)*tile_b + b_local
    cols1 = (sup.reshape(num_tiles, tile_b, n_tap2 * n_pos2, k1)
             .transpose(0, 2, 1, 3)
             .reshape(num_tiles, rows_per_tile, k1)
             .astype(cdt))

    kernel = functools.partial(
        _actor_disc_fused_kernel, tile_b=tile_b, n_tap2=n_tap2,
        n_pos2=n_pos2, n_pos3=n_pos3, compute_dtype=cdt)

    out = pl.pallas_call(
        kernel,
        out_shape=jax.ShapeDtypeStruct((n_pad, LANE_PAD), jnp.float32),
        grid_spec=pltpu.PrefetchScalarGridSpec(
            num_scalar_prefetch=0,
            grid=(num_tiles,),
            in_specs=[
                pl.BlockSpec((1, rows_per_tile, k1), lambda g: (g, 0, 0)),
                # Weights/biases: constant block index -> fetched once, VMEM-resident.
                pl.BlockSpec(params["w1"].shape, lambda g: (0, 0)),
                pl.BlockSpec(params["b1"].shape, lambda g: (0, 0)),
                pl.BlockSpec(params["w2"].shape, lambda g: (0, 0, 0)),
                pl.BlockSpec(params["b2"].shape, lambda g: (0, 0)),
                pl.BlockSpec(params["w3"].shape, lambda g: (0, 0, 0)),
                pl.BlockSpec(params["b3"].shape, lambda g: (0, 0)),
                pl.BlockSpec(params["wfc"].shape, lambda g: (0, 0)),
                pl.BlockSpec(params["bfc"].shape, lambda g: (0, 0)),
                pl.BlockSpec(params["wfin"].shape, lambda g: (0, 0)),
                pl.BlockSpec(params["bfin"].shape, lambda g: (0, 0)),
            ],
            out_specs=pl.BlockSpec((tile_b, LANE_PAD), lambda g: (g, 0)),
        ),
        compiler_params=pltpu.CompilerParams(
            dimension_semantics=("parallel",),        # v7x: shard batch over 2 TCs
            vmem_limit_bytes=32 * 1024 * 1024,
        ),
    )(cols1, params["w1"], params["b1"], params["w2"], params["b2"],
      params["w3"], params["b3"], params["wfc"], params["bfc"],
      params["wfin"], params["bfin"])

    return out[:n, :a_num]
    # TODO(synk): select_action / log_pi (Categorical sampling / log_prob) are
    # host-side distribution ops and are not part of the Pallas forward kernel.


# ---------------------------------- main --------------------------------------

if __name__ == "__main__":
    key = jax.random.PRNGKey(0)
    # Small shapes consistent with the module: s_dim = (C, H, W) = (4, 36, 36)
    #   conv stack: 36 -> 8 -> 3 -> 1  => flat = 64 * 1 * 1 = 64
    s_dim = (4, 36, 36)
    a_num = 6
    batch = 2

    pkey, xkey = jax.random.split(key)
    params = make_params(pkey, s_dim, a_num, emb_dim=512)
    s = jax.random.normal(xkey, (batch,) + s_dim, jnp.float32)   # NCHW

    fwd = jax.jit(lambda p, x: actor_disc_forward(p, x, a_num))
    logits = fwd(params, s)
    logits = jax.block_until_ready(logits)
    assert logits.shape == (batch, a_num), logits.shape
    assert logits.dtype == jnp.float32
    print("KERNEL_OK")
</pallas_src>

<mosaic_0001>
module attributes {stable_mosaic.version = 11 : i64} {
  func.func @_actor_disc_fused_kernel(%arg0: i32, %arg1: memref<1x1152x256xbf16, #tpu.memory_space<vmem>>, %arg2: memref<256x32xbf16, #tpu.memory_space<vmem>>, %arg3: memref<1x32xf32, #tpu.memory_space<vmem>>, %arg4: memref<16x32x64xbf16, #tpu.memory_space<vmem>>, %arg5: memref<1x64xf32, #tpu.memory_space<vmem>>, %arg6: memref<9x64x64xbf16, #tpu.memory_space<vmem>>, %arg7: memref<1x64xf32, #tpu.memory_space<vmem>>, %arg8: memref<64x512xbf16, #tpu.memory_space<vmem>>, %arg9: memref<1x512xf32, #tpu.memory_space<vmem>>, %arg10: memref<512x128xbf16, #tpu.memory_space<vmem>>, %arg11: memref<1x128xf32, #tpu.memory_space<vmem>>, %arg12: memref<8x128xf32, #tpu.memory_space<vmem>>) attributes {dimension_semantics = [#tpu.dimension_semantics<parallel>], iteration_bounds = array<i64: 1>, scalar_prefetch = 0 : i64, scratch_operands = 0 : i64, tpu.core_type = #tpu.core_type<tc>, window_params = [{transform_indices = @transform_0, window_bounds = array<i64: 1, 1152, 256>}, {pipeline_mode = #tpu.pipeline_mode<synchronous>, transform_indices = @transform_1, window_bounds = array<i64: 256, 32>}, {pipeline_mode = #tpu.pipeline_mode<synchronous>, transform_indices = @transform_2, window_bounds = array<i64: 1, 32>}, {pipeline_mode = #tpu.pipeline_mode<synchronous>, transform_indices = @transform_3, window_bounds = array<i64: 16, 32, 64>}, {pipeline_mode = #tpu.pipeline_mode<synchronous>, transform_indices = @transform_4, window_bounds = array<i64: 1, 64>}, {pipeline_mode = #tpu.pipeline_mode<synchronous>, transform_indices = @transform_5, window_bounds = array<i64: 9, 64, 64>}, {pipeline_mode = #tpu.pipeline_mode<synchronous>, transform_indices = @transform_6, window_bounds = array<i64: 1, 64>}, {pipeline_mode = #tpu.pipeline_mode<synchronous>, transform_indices = @transform_7, window_bounds = array<i64: 64, 512>}, {pipeline_mode = #tpu.pipeline_mode<synchronous>, transform_indices = @transform_8, window_bounds = array<i64: 1, 512>}, {pipeline_mode = #tpu.pipeline_mode<synchronous>, transform_indices = @transform_9, window_bounds = array<i64: 512, 128>}, {pipeline_mode = #tpu.pipeline_mode<synchronous>, transform_indices = @transform_10, window_bounds = array<i64: 1, 128>}, {transform_indices = @transform_11, window_bounds = array<i64: 8, 128>}]} {
    %c0 = arith.constant 0 : index
    %c0_0 = arith.constant 0 : index
    %c0_1 = arith.constant 0 : index
    %0 = vector.load %arg1[%c0, %c0_0, %c0_1] : memref<1x1152x256xbf16, #tpu.memory_space<vmem>>, vector<1x1152x256xbf16>
    %1 = vector.shape_cast %0 : vector<1x1152x256xbf16> to vector<1152x256xbf16>
    %c0_2 = arith.constant 0 : index
    %c0_3 = arith.constant 0 : index
    %2 = vector.load %arg2[%c0_2, %c0_3] : memref<256x32xbf16, #tpu.memory_space<vmem>>, vector<256x32xbf16>
    %cst = arith.constant dense<0.000000e+00> : vector<1152x32xf32>
    %3 = tpu.matmul %1, %2, %cst {dimension_numbers = #tpu.dot_dimension_numbers<[1], [0], [0], [1], [0, 0, 1, 1], [], []>} : vector<1152x256xbf16>, vector<256x32xbf16>, vector<1152x32xf32> -> vector<1152x32xf32>
    %c0_4 = arith.constant 0 : index
    %c0_5 = arith.constant 0 : index
    %4 = vector.load %arg3[%c0_4, %c0_5] : memref<1x32xf32, #tpu.memory_space<vmem>>, vector<1x32xf32>
    %5 = vector.broadcast %4 : vector<1x32xf32> to vector<1152x32xf32>
    %6 = arith.addf %3, %5 : vector<1152x32xf32>
    %cst_6 = arith.constant 0.000000e+00 : f32
    %7 = vector.broadcast %cst_6 : f32 to vector<1152x32xf32>
    %8 = arith.maximumf %6, %7 : vector<1152x32xf32>
    %cst_7 = arith.constant 0.000000e+00 : f32
    %9 = vector.broadcast %cst_7 : f32 to vector<72x64xf32>
    %10 = vector.extract_strided_slice %8 {offsets = [0, 0], sizes = [72, 32], strides = [1, 1]} : vector<1152x32xf32> to vector<72x32xf32>
    %11 = arith.truncf %10 : vector<72x32xf32> to vector<72x32xbf16>
    %c0_8 = arith.constant 0 : index
    %c0_9 = arith.constant 0 : index
    %c0_10 = arith.constant 0 : index
    %12 = vector.load %arg4[%c0_8, %c0_9, %c0_10] : memref<16x32x64xbf16, #tpu.memory_space<vmem>>, vector<1x32x64xbf16>
    %13 = vector.shape_cast %12 : vector<1x32x64xbf16> to vector<32x64xbf16>
    %cst_11 = arith.constant dense<0.000000e+00> : vector<72x64xf32>
    %14 = tpu.matmul %11, %13, %cst_11 {dimension_numbers = #tpu.dot_dimension_numbers<[1], [0], [0], [1], [0, 0, 1, 1], [], []>} : vector<72x32xbf16>, vector<32x64xbf16>, vector<72x64xf32> -> vector<72x64xf32>
    %15 = arith.addf %9, %14 : vector<72x64xf32>
    %16 = vector.extract_strided_slice %8 {offsets = [72, 0], sizes = [72, 32], strides = [1, 1]} : vector<1152x32xf32> to vector<72x32xf32>
    %17 = arith.truncf %16 : vector<72x32xf32> to vector<72x32xbf16>
    %c1 = arith.constant 1 : index
    %c0_12 = arith.constant 0 : index
    %c0_13 = arith.constant 0 : index
    %18 = vector.load %arg4[%c1, %c0_12, %c0_13] : memref<16x32x64xbf16, #tpu.memory_space<vmem>>, vector<1x32x64xbf16>
    %19 = vector.shape_cast %18 : vector<1x32x64xbf16> to vector<32x64xbf16>
    %cst_14 = arith.constant dense<0.000000e+00> : vector<72x64xf32>
    %20 = tpu.matmul %17, %19, %cst_14 {dimension_numbers = #tpu.dot_dimension_numbers<[1], [0], [0], [1], [0, 0, 1, 1], [], []>} : vector<72x32xbf16>, vector<32x64xbf16>, vector<72x64xf32> -> vector<72x64xf32>
    %21 = arith.addf %15, %20 : vector<72x64xf32>
    %22 = vector.extract_strided_slice %8 {offsets = [144, 0], sizes = [72, 32], strides = [1, 1]} : vector<1152x32xf32> to vector<72x32xf32>
    %23 = arith.truncf %22 : vector<72x32xf32> to vector<72x32xbf16>
    %c2 = arith.constant 2 : index
    %c0_15 = arith.constant 0 : index
    %c0_16 = arith.constant 0 : index
    %24 = vector.load %arg4[%c2, %c0_15, %c0_16] : memref<16x32x64xbf16, #tpu.memory_space<vmem>>, vector<1x32x64xbf16>
    %25 = vector.shape_cast %24 : vector<1x32x64xbf16> to vector<32x64xbf16>
    %cst_17 = arith.constant dense<0.000000e+00> : vector<72x64xf32>
    %26 = tpu.matmul %23, %25, %cst_17 {dimension_numbers = #tpu.dot_dimension_numbers<[1], [0], [0], [1], [0, 0, 1, 1], [], []>} : vector<72x32xbf16>, vector<32x64xbf16>, vector<72x64xf32> -> vector<72x64xf32>
    %27 = arith.addf %21, %26 : vector<72x64xf32>
    %28 = vector.extract_strided_slice %8 {offsets = [216, 0], sizes = [72, 32], strides = [1, 1]} : vector<1152x32xf32> to vector<72x32xf32>
    %29 = arith.truncf %28 : vector<72x32xf32> to vector<72x32xbf16>
    %c3 = arith.constant 3 : index
    %c0_18 = arith.constant 0 : index
    %c0_19 = arith.constant 0 : index
    %30 = vector.load %arg4[%c3, %c0_18, %c0_19] : memref<16x32x64xbf16, #tpu.memory_space<vmem>>, vector<1x32x64xbf16>
    %31 = vector.shape_cast %30 : vector<1x32x64xbf16> to vector<32x64xbf16>
    %cst_20 = arith.constant dense<0.000000e+00> : vector<72x64xf32>
    %32 = tpu.matmul %29, %31, %cst_20 {dimension_numbers = #tpu.dot_dimension_numbers<[1], [0], [0], [1], [0, 0, 1, 1], [], []>} : vector<72x32xbf16>, vector<32x64xbf16>, vector<72x64xf32> -> vector<72x64xf32>
    %33 = arith.addf %27, %32 : vector<72x64xf32>
    %34 = vector.extract_strided_slice %8 {offsets = [288, 0], sizes = [72, 32], strides = [1, 1]} : vector<1152x32xf32> to vector<72x32xf32>
    %35 = arith.truncf %34 : vector<72x32xf32> to vector<72x32xbf16>
    %c4 = arith.constant 4 : index
    %c0_21 = arith.constant 0 : index
    %c0_22 = arith.constant 0 : index
    %36 = vector.load %arg4[%c4, %c0_21, %c0_22] : memref<16x32x64xbf16, #tpu.memory_space<vmem>>, vector<1x32x64xbf16>
    %37 = vector.shape_cast %36 : vector<1x32x64xbf16> to vector<32x64xbf16>
    %cst_23 = arith.constant dense<0.000000e+00> : vector<72x64xf32>
    %38 = tpu.matmul %35, %37, %cst_23 {dimension_numbers = #tpu.dot_dimension_numbers<[1], [0], [0], [1], [0, 0, 1, 1], [], []>} : vector<72x32xbf16>, vector<32x64xbf16>, vector<72x64xf32> -> vector<72x64xf32>
    %39 = arith.addf %33, %38 : vector<72x64xf32>
    %40 = vector.extract_strided_slice %8 {offsets = [360, 0], sizes = [72, 32], strides = [1, 1]} : vector<1152x32xf32> to vector<72x32xf32>
    %41 = arith.truncf %40 : vector<72x32xf32> to vector<72x32xbf16>
    %c5 = arith.constant 5 : index
    %c0_24 = arith.constant 0 : index
    %c0_25 = arith.constant 0 : index
    %42 = vector.load %arg4[%c5, %c0_24, %c0_25] : memref<16x32x64xbf16, #tpu.memory_space<vmem>>, vector<1x32x64xbf16>
    %43 = vector.shape_cast %42 : vector<1x32x64xbf16> to vector<32x64xbf16>
    %cst_26 = arith.constant dense<0.000000e+00> : vector<72x64xf32>
    %44 = tpu.matmul %41, %43, %cst_26 {dimension_numbers = #tpu.dot_dimension_numbers<[1], [0], [0], [1], [0, 0, 1, 1], [], []>} : vector<72x32xbf16>, vector<32x64xbf16>, vector<72x64xf32> -> vector<72x64xf32>
    %45 = arith.addf %39, %44 : vector<72x64xf32>
    %46 = vector.extract_strided_slice %8 {offsets = [432, 0], sizes = [72, 32], strides = [1, 1]} : vector<1152x32xf32> to vector<72x32xf32>
    %47 = arith.truncf %46 : vector<72x32xf32> to vector<72x32xbf16>
    %c6 = arith.constant 6 : index
    %c0_27 = arith.constant 0 : index
    %c0_28 = arith.constant 0 : index
    %48 = vector.load %arg4[%c6, %c0_27, %c0_28] : memref<16x32x64xbf16, #tpu.memory_space<vmem>>, vector<1x32x64xbf16>
    %49 = vector.shape_cast %48 : vector<1x32x64xbf16> to vector<32x64xbf16>
    %cst_29 = arith.constant dense<0.000000e+00> : vector<72x64xf32>
    %50 = tpu.matmul %47, %49, %cst_29 {dimension_numbers = #tpu.dot_dimension_numbers<[1], [0], [0], [1], [0, 0, 1, 1], [], []>} : vector<72x32xbf16>, vector<32x64xbf16>, vector<72x64xf32> -> vector<72x64xf32>
    %51 = arith.addf %45, %50 : vector<72x64xf32>
    %52 = vector.extract_strided_slice %8 {offsets = [504, 0], sizes = [72, 32], strides = [1, 1]} : vector<1152x32xf32> to vector<72x32xf32>
    %53 = arith.truncf %52 : vector<72x32xf32> to vector<72x32xbf16>
    %c7 = arith.constant 7 : index
    %c0_30 = arith.constant 0 : index
    %c0_31 = arith.constant 0 : index
    %54 = vector.load %arg4[%c7, %c0_30, %c0_31] : memref<16x32x64xbf16, #tpu.memory_space<vmem>>, vector<1x32x64xbf16>
    %55 = vector.shape_cast %54 : vector<1x32x64xbf16> to vector<32x64xbf16>
    %cst_32 = arith.constant dense<0.000000e+00> : vector<72x64xf32>
    %56 = tpu.matmul %53, %55, %cst_32 {dimension_numbers = #tpu.dot_dimension_numbers<[1], [0], [0], [1], [0, 0, 1, 1], [], []>} : vector<72x32xbf16>, vector<32x64xbf16>, vector<72x64xf32> -> vector<72x64xf32>
    %57 = arith.addf %51, %56 : vector<72x64xf32>
    %58 = vector.extract_strided_slice %8 {offsets = [576, 0], sizes = [72, 32], strides = [1, 1]} : vector<1152x32xf32> to vector<72x32xf32>
    %59 = arith.truncf %58 : vector<72x32xf32> to vector<72x32xbf16>
    %c8 = arith.constant 8 : index
    %c0_33 = arith.constant 0 : index
    %c0_34 = arith.constant 0 : index
    %60 = vector.load %arg4[%c8, %c0_33, %c0_34] : memref<16x32x64xbf16, #tpu.memory_space<vmem>>, vector<1x32x64xbf16>
    %61 = vector.shape_cast %60 : vector<1x32x64xbf16> to vector<32x64xbf16>
    %cst_35 = arith.constant dense<0.000000e+00> : vector<72x64xf32>
    %62 = tpu.matmul %59, %61, %cst_35 {dimension_numbers = #tpu.dot_dimension_numbers<[1], [0], [0], [1], [0, 0, 1, 1], [], []>} : vector<72x32xbf16>, vector<32x64xbf16>, vector<72x64xf32> -> vector<72x64xf32>
    %63 = arith.addf %57, %62 : vector<72x64xf32>
    %64 = vector.extract_strided_slice %8 {offsets = [648, 0], sizes = [72, 32], strides = [1, 1]} : vector<1152x32xf32> to vector<72x32xf32>
    %65 = arith.truncf %64 : vector<72x32xf32> to vector<72x32xbf16>
    %c9 = arith.constant 9 : index
    %c0_36 = arith.constant 0 : index
    %c0_37 = arith.constant 0 : index
    %66 = vector.load %arg4[%c9, %c0_36, %c0_37] : memref<16x32x64xbf16, #tpu.memory_space<vmem>>, vector<1x32x64xbf16>
    %67 = vector.shape_cast %66 : vector<1x32x64xbf16> to vector<32x64xbf16>
    %cst_38 = arith.constant dense<0.000000e+00> : vector<72x64xf32>
    %68 = tpu.matmul %65, %67, %cst_38 {dimension_numbers = #tpu.dot_dimension_numbers<[1], [0], [0], [1], [0, 0, 1, 1], [], []>} : vector<72x32xbf16>, vector<32x64xbf16>, vector<72x64xf32> -> vector<72x64xf32>
    %69 = arith.addf %63, %68 : vector<72x64xf32>
    %70 = vector.extract_strided_slice %8 {offsets = [720, 0], sizes = [72, 32], strides = [1, 1]} : vector<1152x32xf32> to vector<72x32xf32>
    %71 = arith.truncf %70 : vector<72x32xf32> to vector<72x32xbf16>
    %c10 = arith.constant 10 : index
    %c0_39 = arith.constant 0 : index
    %c0_40 = arith.constant 0 : index
    %72 = vector.load %arg4[%c10, %c0_39, %c0_40] : memref<16x32x64xbf16, #tpu.memory_space<vmem>>, vector<1x32x64xbf16>
    %73 = vector.shape_cast %72 : vector<1x32x64xbf16> to vector<32x64xbf16>
    %cst_41 = arith.constant dense<0.000000e+00> : vector<72x64xf32>
    %74 = tpu.matmul %71, %73, %cst_41 {dimension_numbers = #tpu.dot_dimension_numbers<[1], [0], [0], [1], [0, 0, 1, 1], [], []>} : vector<72x32xbf16>, vector<32x64xbf16>, vector<72x64xf32> -> vector<72x64xf32>
    %75 = arith.addf %69, %74 : vector<72x64xf32>
    %76 = vector.extract_strided_slice %8 {offsets = [792, 0], sizes = [72, 32], strides = [1, 1]} : vector<1152x32xf32> to vector<72x32xf32>
    %77 = arith.truncf %76 : vector<72x32xf32> to vector<72x32xbf16>
    %c11 = arith.constant 11 : index
    %c0_42 = arith.constant 0 : index
    %c0_43 = arith.constant 0 : index
    %78 = vector.load %arg4[%c11, %c0_42, %c0_43] : memref<16x32x64xbf16, #tpu.memory_space<vmem>>, vector<1x32x64xbf16>
    %79 = vector.shape_cast %78 : vector<1x32x64xbf16> to vector<32x64xbf16>
    %cst_44 = arith.constant dense<0.000000e+00> : vector<72x64xf32>
    %80 = tpu.matmul %77, %79, %cst_44 {dimension_numbers = #tpu.dot_dimension_numbers<[1], [0], [0], [1], [0, 0, 1, 1], [], []>} : vector<72x32xbf16>, vector<32x64xbf16>, vector<72x64xf32> -> vector<72x64xf32>
    %81 = arith.addf %75, %80 : vector<72x64xf32>
    %82 = vector.extract_strided_slice %8 {offsets = [864, 0], sizes = [72, 32], strides = [1, 1]} : vector<1152x32xf32> to vector<72x32xf32>
    %83 = arith.truncf %82 : vector<72x32xf32> to vector<72x32xbf16>
    %c12 = arith.constant 12 : index
    %c0_45 = arith.constant 0 : index
    %c0_46 = arith.constant 0 : index
    %84 = vector.load %arg4[%c12, %c0_45, %c0_46] : memref<16x32x64xbf16, #tpu.memory_space<vmem>>, vector<1x32x64xbf16>
    %85 = vector.shape_cast %84 : vector<1x32x64xbf16> to vector<32x64xbf16>
    %cst_47 = arith.constant dense<0.000000e+00> : vector<72x64xf32>
    %86 = tpu.matmul %83, %85, %cst_47 {dimension_numbers = #tpu.dot_dimension_numbers<[1], [0], [0], [1], [0, 0, 1, 1], [], []>} : vector<72x32xbf16>, vector<32x64xbf16>, vector<72x64xf32> -> vector<72x64xf32>
    %87 = arith.addf %81, %86 : vector<72x64xf32>
    %88 = vector.extract_strided_slice %8 {offsets = [936, 0], sizes = [72, 32], strides = [1, 1]} : vector<1152x32xf32> to vector<72x32xf32>
    %89 = arith.truncf %88 : vector<72x32xf32> to vector<72x32xbf16>
    %c13 = arith.constant 13 : index
    %c0_48 = arith.constant 0 : index
    %c0_49 = arith.constant 0 : index
    %90 = vector.load %arg4[%c13, %c0_48, %c0_49] : memref<16x32x64xbf16, #tpu.memory_space<vmem>>, vector<1x32x64xbf16>
    %91 = vector.shape_cast %90 : vector<1x32x64xbf16> to vector<32x64xbf16>
    %cst_50 = arith.constant dense<0.000000e+00> : vector<72x64xf32>
    %92 = tpu.matmul %89, %91, %cst_50 {dimension_numbers = #tpu.dot_dimension_numbers<[1], [0], [0], [1], [0, 0, 1, 1], [], []>} : vector<72x32xbf16>, vector<32x64xbf16>, vector<72x64xf32> -> vector<72x64xf32>
    %93 = arith.addf %87, %92 : vector<72x64xf32>
    %94 = vector.extract_strided_slice %8 {offsets = [1008, 0], sizes = [72, 32], strides = [1, 1]} : vector<1152x32xf32> to vector<72x32xf32>
    %95 = arith.truncf %94 : vector<72x32xf32> to vector<72x32xbf16>
    %c14 = arith.constant 14 : index
    %c0_51 = arith.constant 0 : index
    %c0_52 = arith.constant 0 : index
    %96 = vector.load %arg4[%c14, %c0_51, %c0_52] : memref<16x32x64xbf16, #tpu.memory_space<vmem>>, vector<1x32x64xbf16>
    %97 = vector.shape_cast %96 : vector<1x32x64xbf16> to vector<32x64xbf16>
    %cst_53 = arith.constant dense<0.000000e+00> : vector<72x64xf32>
    %98 = tpu.matmul %95, %97, %cst_53 {dimension_numbers = #tpu.dot_dimension_numbers<[1], [0], [0], [1], [0, 0, 1, 1], [], []>} : vector<72x32xbf16>, vector<32x64xbf16>, vector<72x64xf32> -> vector<72x64xf32>
    %99 = arith.addf %93, %98 : vector<72x64xf32>
    %100 = vector.extract_strided_slice %8 {offsets = [1080, 0], sizes = [72, 32], strides = [1, 1]} : vector<1152x32xf32> to vector<72x32xf32>
    %101 = arith.truncf %100 : vector<72x32xf32> to vector<72x32xbf16>
    %c15 = arith.constant 15 : index
    %c0_54 = arith.constant 0 : index
    %c0_55 = arith.constant 0 : index
    %102 = vector.load %arg4[%c15, %c0_54, %c0_55] : memref<16x32x64xbf16, #tpu.memory_space<vmem>>, vector<1x32x64xbf16>
    %103 = vector.shape_cast %102 : vector<1x32x64xbf16> to vector<32x64xbf16>
    %cst_56 = arith.constant dense<0.000000e+00> : vector<72x64xf32>
    %104 = tpu.matmul %101, %103, %cst_56 {dimension_numbers = #tpu.dot_dimension_numbers<[1], [0], [0], [1], [0, 0, 1, 1], [], []>} : vector<72x32xbf16>, vector<32x64xbf16>, vector<72x64xf32> -> vector<72x64xf32>
    %105 = arith.addf %99, %104 : vector<72x64xf32>
    %c0_57 = arith.constant 0 : index
    %c0_58 = arith.constant 0 : index
    %106 = vector.load %arg5[%c0_57, %c0_58] : memref<1x64xf32, #tpu.memory_space<vmem>>, vector<1x64xf32>
    %107 = vector.broadcast %106 : vector<1x64xf32> to vector<72x64xf32>
    %108 = arith.addf %105, %107 : vector<72x64xf32>
    %cst_59 = arith.constant 0.000000e+00 : f32
    %109 = vector.broadcast %cst_59 : f32 to vector<72x64xf32>
    %110 = arith.maximumf %108, %109 : vector<72x64xf32>
    %cst_60 = arith.constant 0.000000e+00 : f32
    %111 = vector.broadcast %cst_60 : f32 to vector<8x64xf32>
    %112 = vector.extract_strided_slice %110 {offsets = [0, 0], sizes = [8, 64], strides = [1, 1]} : vector<72x64xf32> to vector<8x64xf32>
    %113 = arith.truncf %112 : vector<8x64xf32> to vector<8x64xbf16>
    %c0_61 = arith.constant 0 : index
    %c0_62 = arith.constant 0 : index
    %c0_63 = arith.constant 0 : index
    %114 = vector.load %arg6[%c0_61, %c0_62, %c0_63] : memref<9x64x64xbf16, #tpu.memory_space<vmem>>, vector<1x64x64xbf16>
    %115 = vector.shape_cast %114 : vector<1x64x64xbf16> to vector<64x64xbf16>
    %cst_64 = arith.constant dense<0.000000e+00> : vector<8x64xf32>
    %116 = tpu.matmul %113, %115, %cst_64 {dimension_numbers = #tpu.dot_dimension_numbers<[1], [0], [0], [1], [0, 0, 1, 1], [], []>} : vector<8x64xbf16>, vector<64x64xbf16>, vector<8x64xf32> -> vector<8x64xf32>
    %117 = arith.addf %111, %116 : vector<8x64xf32>
    %118 = vector.extract_strided_slice %110 {offsets = [8, 0], sizes = [8, 64], strides = [1, 1]} : vector<72x64xf32> to vector<8x64xf32>
    %119 = arith.truncf %118 : vector<8x64xf32> to vector<8x64xbf16>
    %c1_65 = arith.constant 1 : index
    %c0_66 = arith.constant 0 : index
    %c0_67 = arith.constant 0 : index
    %120 = vector.load %arg6[%c1_65, %c0_66, %c0_67] : memref<9x64x64xbf16, #tpu.memory_space<vmem>>, vector<1x64x64xbf16>
    %121 = vector.shape_cast %120 : vector<1x64x64xbf16> to vector<64x64xbf16>
    %cst_68 = arith.constant dense<0.000000e+00> : vector<8x64xf32>
    %122 = tpu.matmul %119, %121, %cst_68 {dimension_numbers = #tpu.dot_dimension_numbers<[1], [0], [0], [1], [0, 0, 1, 1], [], []>} : vector<8x64xbf16>, vector<64x64xbf16>, vector<8x64xf32> -> vector<8x64xf32>
    %123 = arith.addf %117, %122 : vector<8x64xf32>
    %124 = vector.extract_strided_slice %110 {offsets = [16, 0], sizes = [8, 64], strides = [1, 1]} : vector<72x64xf32> to vector<8x64xf32>
    %125 = arith.truncf %124 : vector<8x64xf32> to vector<8x64xbf16>
    %c2_69 = arith.constant 2 : index
    %c0_70 = arith.constant 0 : index
    %c0_71 = arith.constant 0 : index
    %126 = vector.load %arg6[%c2_69, %c0_70, %c0_71] : memref<9x64x64xbf16, #tpu.memory_space<vmem>>, vector<1x64x64xbf16>
    %127 = vector.shape_cast %126 : vector<1x64x64xbf16> to vector<64x64xbf16>
    %cst_72 = arith.constant dense<0.000000e+00> : vector<8x64xf32>
    %128 = tpu.matmul %125, %127, %cst_72 {dimension_numbers = #tpu.dot_dimension_numbers<[1], [0], [0], [1], [0, 0, 1, 1], [], []>} : vector<8x64xbf16>, vector<64x64xbf16>, vector<8x64xf32> -> vector<8x64xf32>
    %129 = arith.addf %123, %128 : vector<8x64xf32>
    %130 = vector.extract_strided_slice %110 {offsets = [24, 0], sizes = [8, 64], strides = [1, 1]} : vector<72x64xf32> to vector<8x64xf32>
    %131 = arith.truncf %130 : vector<8x64xf32> to vector<8x64xbf16>
    %c3_73 = arith.constant 3 : index
    %c0_74 = arith.constant 0 : index
    %c0_75 = arith.constant 0 : index
    %132 = vector.load %arg6[%c3_73, %c0_74, %c0_75] : memref<9x64x64xbf16, #tpu.memory_space<vmem>>, vector<1x64x64xbf16>
    %133 = vector.shape_cast %132 : vector<1x64x64xbf16> to vector<64x64xbf16>
    %cst_76 = arith.constant dense<0.000000e+00> : vector<8x64xf32>
    %134 = tpu.matmul %131, %133, %cst_76 {dimension_numbers = #tpu.dot_dimension_numbers<[1], [0], [0], [1], [0, 0, 1, 1], [], []>} : vector<8x64xbf16>, vector<64x64xbf16>, vector<8x64xf32> -> vector<8x64xf32>
    %135 = arith.addf %129, %134 : vector<8x64xf32>
    %136 = vector.extract_strided_slice %110 {offsets = [32, 0], sizes = [8, 64], strides = [1, 1]} : vector<72x64xf32> to vector<8x64xf32>
    %137 = arith.truncf %136 : vector<8x64xf32> to vector<8x64xbf16>
    %c4_77 = arith.constant 4 : index
    %c0_78 = arith.constant 0 : index
    %c0_79 = arith.constant 0 : index
    %138 = vector.load %arg6[%c4_77, %c0_78, %c0_79] : memref<9x64x64xbf16, #tpu.memory_space<vmem>>, vector<1x64x64xbf16>
    %139 = vector.shape_cast %138 : vector<1x64x64xbf16> to vector<64x64xbf16>
    %cst_80 = arith.constant dense<0.000000e+00> : vector<8x64xf32>
    %140 = tpu.matmul %137, %139, %cst_80 {dimension_numbers = #tpu.dot_dimension_numbers<[1], [0], [0], [1], [0, 0, 1, 1], [], []>} : vector<8x64xbf16>, vector<64x64xbf16>, vector<8x64xf32> -> vector<8x64xf32>
    %141 = arith.addf %135, %140 : vector<8x64xf32>
    %142 = vector.extract_strided_slice %110 {offsets = [40, 0], sizes = [8, 64], strides = [1, 1]} : vector<72x64xf32> to vector<8x64xf32>
    %143 = arith.truncf %142 : vector<8x64xf32> to vector<8x64xbf16>
    %c5_81 = arith.constant 5 : index
    %c0_82 = arith.constant 0 : index
    %c0_83 = arith.constant 0 : index
    %144 = vector.load %arg6[%c5_81, %c0_82, %c0_83] : memref<9x64x64xbf16, #tpu.memory_space<vmem>>, vector<1x64x64xbf16>
    %145 = vector.shape_cast %144 : vector<1x64x64xbf16> to vector<64x64xbf16>
    %cst_84 = arith.constant dense<0.000000e+00> : vector<8x64xf32>
    %146 = tpu.matmul %143, %145, %cst_84 {dimension_numbers = #tpu.dot_dimension_numbers<[1], [0], [0], [1], [0, 0, 1, 1], [], []>} : vector<8x64xbf16>, vector<64x64xbf16>, vector<8x64xf32> -> vector<8x64xf32>
    %147 = arith.addf %141, %146 : vector<8x64xf32>
    %148 = vector.extract_strided_slice %110 {offsets = [48, 0], sizes = [8, 64], strides = [1, 1]} : vector<72x64xf32> to vector<8x64xf32>
    %149 = arith.truncf %148 : vector<8x64xf32> to vector<8x64xbf16>
    %c6_85 = arith.constant 6 : index
    %c0_86 = arith.constant 0 : index
    %c0_87 = arith.constant 0 : index
    %150 = vector.load %arg6[%c6_85, %c0_86, %c0_87] : memref<9x64x64xbf16, #tpu.memory_space<vmem>>, vector<1x64x64xbf16>
    %151 = vector.shape_cast %150 : vector<1x64x64xbf16> to vector<64x64xbf16>
    %cst_88 = arith.constant dense<0.000000e+00> : vector<8x64xf32>
    %152 = tpu.matmul %149, %151, %cst_88 {dimension_numbers = #tpu.dot_dimension_numbers<[1], [0], [0], [1], [0, 0, 1, 1], [], []>} : vector<8x64xbf16>, vector<64x64xbf16>, vector<8x64xf32> -> vector<8x64xf32>
    %153 = arith.addf %147, %152 : vector<8x64xf32>
    %154 = vector.extract_strided_slice %110 {offsets = [56, 0], sizes = [8, 64], strides = [1, 1]} : vector<72x64xf32> to vector<8x64xf32>
    %155 = arith.truncf %154 : vector<8x64xf32> to vector<8x64xbf16>
    %c7_89 = arith.constant 7 : index
    %c0_90 = arith.constant 0 : index
    %c0_91 = arith.constant 0 : index
    %156 = vector.load %arg6[%c7_89, %c0_90, %c0_91] : memref<9x64x64xbf16, #tpu.memory_space<vmem>>, vector<1x64x64xbf16>
    %157 = vector.shape_cast %156 : vector<1x64x64xbf16> to vector<64x64xbf16>
    %cst_92 = arith.constant dense<0.000000e+00> : vector<8x64xf32>
    %158 = tpu.matmul %155, %157, %cst_92 {dimension_numbers = #tpu.dot_dimension_numbers<[1], [0], [0], [1], [0, 0, 1, 1], [], []>} : vector<8x64xbf16>, vector<64x64xbf16>, vector<8x64xf32> -> vector<8x64xf32>
    %159 = arith.addf %153, %158 : vector<8x64xf32>
    %160 = vector.extract_strided_slice %110 {offsets = [64, 0], sizes = [8, 64], strides = [1, 1]} : vector<72x64xf32> to vector<8x64xf32>
    %161 = arith.truncf %160 : vector<8x64xf32> to vector<8x64xbf16>
    %c8_93 = arith.constant 8 : index
    %c0_94 = arith.constant 0 : index
    %c0_95 = arith.constant 0 : index
    %162 = vector.load %arg6[%c8_93, %c0_94, %c0_95] : memref<9x64x64xbf16, #tpu.memory_space<vmem>>, vector<1x64x64xbf16>
    %163 = vector.shape_cast %162 : vector<1x64x64xbf16> to vector<64x64xbf16>
    %cst_96 = arith.constant dense<0.000000e+00> : vector<8x64xf32>
    %164 = tpu.matmul %161, %163, %cst_96 {dimension_numbers = #tpu.dot_dimension_numbers<[1], [0], [0], [1], [0, 0, 1, 1], [], []>} : vector<8x64xbf16>, vector<64x64xbf16>, vector<8x64xf32> -> vector<8x64xf32>
    %165 = arith.addf %159, %164 : vector<8x64xf32>
    %c0_97 = arith.constant 0 : index
    %c0_98 = arith.constant 0 : index
    %166 = vector.load %arg7[%c0_97, %c0_98] : memref<1x64xf32, #tpu.memory_space<vmem>>, vector<1x64xf32>
    %167 = vector.broadcast %166 : vector<1x64xf32> to vector<8x64xf32>
    %168 = arith.addf %165, %167 : vector<8x64xf32>
    %cst_99 = arith.constant 0.000000e+00 : f32
    %169 = vector.broadcast %cst_99 : f32 to vector<8x64xf32>
    %170 = arith.maximumf %168, %169 : vector<8x64xf32>
    %171 = arith.truncf %170 : vector<8x64xf32> to vector<8x64xbf16>
    %c0_100 = arith.constant 0 : index
    %c0_101 = arith.constant 0 : index
    %172 = vector.load %arg8[%c0_100, %c0_101] : memref<64x512xbf16, #tpu.memory_space<vmem>>, vector<64x512xbf16>
    %cst_102 = arith.constant dense<0.000000e+00> : vector<8x512xf32>
    %173 = tpu.matmul %171, %172, %cst_102 {dimension_numbers = #tpu.dot_dimension_numbers<[1], [0], [0], [1], [0, 0, 1, 1], [], []>} : vector<8x64xbf16>, vector<64x512xbf16>, vector<8x512xf32> -> vector<8x512xf32>
    %c0_103 = arith.constant 0 : index
    %c0_104 = arith.constant 0 : index
    %174 = vector.load %arg9[%c0_103, %c0_104] : memref<1x512xf32, #tpu.memory_space<vmem>>, vector<1x512xf32>
    %175 = vector.broadcast %174 : vector<1x512xf32> to vector<8x512xf32>
    %176 = arith.addf %173, %175 : vector<8x512xf32>
    %cst_105 = arith.constant 0.000000e+00 : f32
    %177 = vector.broadcast %cst_105 : f32 to vector<8x512xf32>
    %178 = arith.maximumf %176, %177 : vector<8x512xf32>
    %179 = arith.truncf %178 : vector<8x512xf32> to vector<8x512xbf16>
    %c0_106 = arith.constant 0 : index
    %c0_107 = arith.constant 0 : index
    %180 = vector.load %arg10[%c0_106, %c0_107] : memref<512x128xbf16, #tpu.memory_space<vmem>>, vector<512x128xbf16>
    %cst_108 = arith.constant dense<0.000000e+00> : vector<8x128xf32>
    %181 = tpu.matmul %179, %180, %cst_108 {dimension_numbers = #tpu.dot_dimension_numbers<[1], [0], [0], [1], [0, 0, 1, 1], [], []>} : vector<8x512xbf16>, vector<512x128xbf16>, vector<8x128xf32> -> vector<8x128xf32>
    %c0_109 = arith.constant 0 : index
    %c0_110 = arith.constant 0 : index
    %182 = vector.load %arg11[%c0_109, %c0_110] : memref<1x128xf32, #tpu.memory_space<vmem>>, vector<1x128xf32>
    %183 = vector.broadcast %182 : vector<1x128xf32> to vector<8x128xf32>
    %184 = arith.addf %181, %183 : vector<8x128xf32>
    %c0_111 = arith.constant 0 : index
    %c0_112 = arith.constant 0 : index
    %185 = vector.load %arg12[%c0_111, %c0_112] : memref<8x128xf32, #tpu.memory_space<vmem>>, vector<8x128xf32>
    tpu.vector_store %arg12[%c0_111, %c0_112], %184 {strides = array<i32>} : memref<8x128xf32, #tpu.memory_space<vmem>>, vector<8x128xf32>,
    return
  }
  func.func @transform_0(%arg0: i32) -> (i32, i32, i32) {
    %c0_i32 = arith.constant 0 : i32
    %c0_i32_0 = arith.constant 0 : i32
    %c0_i32_1 = arith.constant 0 : i32
    return %arg0, %c0_i32, %c0_i32_0 : i32, i32, i32
  }
  func.func @transform_1(%arg0: i32) -> (i32, i32) {
    %c0_i32 = arith.constant 0 : i32
    %c0_i32_0 = arith.constant 0 : i32
    %c0_i32_1 = arith.constant 0 : i32
    return %c0_i32, %c0_i32_0 : i32, i32
  }
  func.func @transform_2(%arg0: i32) -> (i32, i32) {
    %c0_i32 = arith.constant 0 : i32
    %c0_i32_0 = arith.constant 0 : i32
    %c0_i32_1 = arith.constant 0 : i32
    return %c0_i32, %c0_i32_0 : i32, i32
  }
  func.func @transform_3(%arg0: i32) -> (i32, i32, i32) {
    %c0_i32 = arith.constant 0 : i32
    %c0_i32_0 = arith.constant 0 : i32
    %c0_i32_1 = arith.constant 0 : i32
    %c0_i32_2 = arith.constant 0 : i32
    return %c0_i32, %c0_i32_0, %c0_i32_1 : i32, i32, i32
  }
  func.func @transform_4(%arg0: i32) -> (i32, i32) {
    %c0_i32 = arith.constant 0 : i32
    %c0_i32_0 = arith.constant 0 : i32
    %c0_i32_1 = arith.constant 0 : i32
    return %c0_i32, %c0_i32_0 : i32, i32
  }
  func.func @transform_5(%arg0: i32) -> (i32, i32, i32) {
    %c0_i32 = arith.constant 0 : i32
    %c0_i32_0 = arith.constant 0 : i32
    %c0_i32_1 = arith.constant 0 : i32
    %c0_i32_2 = arith.constant 0 : i32
    return %c0_i32, %c0_i32_0, %c0_i32_1 : i32, i32, i32
  }
  func.func @transform_6(%arg0: i32) -> (i32, i32) {
    %c0_i32 = arith.constant 0 : i32
    %c0_i32_0 = arith.constant 0 : i32
    %c0_i32_1 = arith.constant 0 : i32
    return %c0_i32, %c0_i32_0 : i32, i32
  }
  func.func @transform_7(%arg0: i32) -> (i32, i32) {
    %c0_i32 = arith.constant 0 : i32
    %c0_i32_0 = arith.constant 0 : i32
    %c0_i32_1 = arith.constant 0 : i32
    return %c0_i32, %c0_i32_0 : i32, i32
  }
  func.func @transform_8(%arg0: i32) -> (i32, i32) {
    %c0_i32 = arith.constant 0 : i32
    %c0_i32_0 = arith.constant 0 : i32
    %c0_i32_1 = arith.constant 0 : i32
    return %c0_i32, %c0_i32_0 : i32, i32
  }
  func.func @transform_9(%arg0: i32) -> (i32, i32) {
    %c0_i32 = arith.constant 0 : i32
    %c0_i32_0 = arith.constant 0 : i32
    %c0_i32_1 = arith.constant 0 : i32
    return %c0_i32, %c0_i32_0 : i32, i32
  }
  func.func @transform_10(%arg0: i32) -> (i32, i32) {
    %c0_i32 = arith.constant 0 : i32
    %c0_i32_0 = arith.constant 0 : i32
    %c0_i32_1 = arith.constant 0 : i32
    return %c0_i32, %c0_i32_0 : i32, i32
  }
  func.func @transform_11(%arg0: i32) -> (i32, i32) {
    %c0_i32 = arith.constant 0 : i32
    %c0_i32_0 = arith.constant 0 : i32
    return %arg0, %c0_i32 : i32, i32
  }
}

</mosaic_0001>

<bundles_post_ra>
// kernel: _lambda_.1
= control target key start
LH: loop header
LB: loop body
LE: loop exit
PB: predicated region body
PF: predicated region fallthrough
CT: control target
= control target key end

     0   :  { %vm1948_vm0 = vcmask 261120   ;;  %vm3228_vm1 = vcmask 523264   ;;  %s7880_s1 = inlined_call_operand.vmem [shape: bf16[256,32], index: 1, kind: input, shape index: {}]   ;;  %s7881_s2 = inlined_call_operand.vmem [shape: f32[1,32], index: 2, kind: input, shape index: {}]   ;;  %s7882_s0 = inlined_call_operand.vmem [shape: bf16[1,1152,256], index: 0, kind: input, shape index: {}]   ;;  %s7883_s3 = inlined_call_operand.vmem [shape: bf16[16,32,64], index: 3, kind: input, shape index: {}]   ;;  %s7884_s4 = inlined_call_operand.vmem [shape: f32[1,64], index: 4, kind: input, shape index: {}]   ;;  %s7885_s5 = inlined_call_operand.vmem [shape: bf16[9,64,64], index: 5, kind: input, shape index: {}]   ;;  %s7886_s6 = inlined_call_operand.vmem [shape: f32[1,64], index: 6, kind: input, shape index: {}]   ;;  %s7887_s7 = inlined_call_operand.vmem [shape: bf16[64,512], index: 7, kind: input, shape index: {}]   ;;  %s7888_s9 = inlined_call_operand.vmem [shape: bf16[512,128], index: 9, kind: input, shape index: {}]   ;;  %s7889_s10 = inlined_call_operand.vmem [shape: f32[1,128], index: 10, kind: input, shape index: {}]   ;;  %s7890_s8 = inlined_call_operand.vmem [shape: f32[1,512], index: 8, kind: input, shape index: {}]   ;;  %s7891_s11 = inlined_call_operand.vmem [shape: f32[8,128], index: 11, kind: output, shape index: {}]  }
   0x1   :  { %v5607_v0 = vld [vmem:[%s7880_s1 + $0x38] sm:$0xff]  ;;  %v5606_v2 = vld [vmem:[%s7880_s1 + $0x30] sm:$0xff]  ;;  %v5605_v4 = vld [vmem:[%s7880_s1 + $0x28] sm:$0xff] }
   0x2   :  { %v5615_v1 = vld [vmem:[%s7880_s1 + $0x78] sm:$0xff]  ;;  %1035 = vmatpush.bf16.msra.mxu0 %v5607_v0  ;;  %5732 = vmatpush.bf16.msra.mxu3 %v5607_v0  ;;  %v5614_v3 = vld [vmem:[%s7880_s1 + $0x70] sm:$0xff]  ;;  %v5613_v5 = vld [vmem:[%s7880_s1 + $0x68] sm:$0xff] }
   0x3   :  { %1404 = vmatpush.bf16.msra.mxu1 %v5615_v1  ;;  %5740 = vmatpush.bf16.msra.mxu2 %v5615_v1  ;;  %v5604_v6 = vld [vmem:[%s7880_s1 + $0x20] sm:$0xff]  ;;  %v5603_v8 = vld [vmem:[%s7880_s1 + $0x18] sm:$0xff]  ;;  %v5602_v10 = vld [vmem:[%s7880_s1 + $0x10] sm:$0xff] }
   0x4   :  { %v5612_v7 = vld [vmem:[%s7880_s1 + $0x60] sm:$0xff]  ;;  %v5611_v9 = vld [vmem:[%s7880_s1 + $0x58] sm:$0xff]  ;;  %v5610_v11 = vld [vmem:[%s7880_s1 + $0x50] sm:$0xff] }
   0x5   :  { %v5601_v12 = vld [vmem:[%s7880_s1 + $0x8] sm:$0xff]  ;;  %v5600_v14 = vld [vmem:[%s7880_s1] sm:$0xff]  ;;  %v4625_v17 = vld [vmem:[%s7882_s0 + $0x3d0] sm:$0xf] }
   0x6   :  { %1036 = vmatpush.bf16.msra.mxu0 %v5606_v2  ;;  %5733 = vmatpush.bf16.msra.mxu3 %v5606_v2  ;;  %v5609_v13 = vld [vmem:[%s7880_s1 + $0x48] sm:$0xff]  ;;  %v4137_v15 = vld [vmem:[%s7882_s0] sm:$0xf]  ;;  %v5579_v18 = vld [vmem:[%s7882_s0 + $0x3d4] sm:$0xf0] }
   0x7   :  { %1405 = vmatpush.bf16.msra.mxu1 %v5614_v3  ;;  %5741 = vmatpush.bf16.msra.mxu2 %v5614_v3  ;;  %v5457_v16 = vld [vmem:[%s7882_s0 + $0x4] sm:$0xf0]  ;;  %v5608_v19 = vld [vmem:[%s7880_s1 + $0x40] sm:$0xff]  ;;  %v4139_v21 = vld [vmem:[%s7882_s0 + $0x8] sm:$0xf0]  ;;  %v4626_v23 = vor.u32 %v5579_v18, %v4625_v17 }
   0x8   :  { %v5456_v20 = vld [vmem:[%s7882_s0 + $0x4] sm:$0xf]  ;;  %v4138_v22 = vor.u32 %v5457_v16, %v4137_v15  ;;  %v4145_v25 = vld [vmem:[%s7882_s0 + $0x10] sm:$0xf]  ;;  %v5459_v26 = vld [vmem:[%s7882_s0 + $0x14] sm:$0xf0] }
   0x9   :  { %v4142_v24 = vor.u32 %v5456_v20, %v4139_v21  ;;  %v4633_v27 = vld [vmem:[%s7882_s0 + $0x3e0] sm:$0xf]  ;;  %v5581_v28 = vld [vmem:[%s7882_s0 + $0x3e4] sm:$0xf0]  ;;  %v5458_v29 = vld [vmem:[%s7882_s0 + $0x14] sm:$0xf]  ;;  %v4146_v31 = vor.u32 %v5459_v26, %v4145_v25 }
   0xa   :  { %1037 = vmatpush.bf16.msra.mxu0 %v5605_v4  ;;  %5734 = vmatpush.bf16.msra.mxu3 %v5605_v4  ;;  %v4147_v30 = vld [vmem:[%s7882_s0 + $0x18] sm:$0xf0]  ;;  %v4634_v32 = vor.u32 %v5581_v28, %v4633_v27  ;;  %v5580_v34 = vld [vmem:[%s7882_s0 + $0x3e4] sm:$0xf]  ;;  %v4635_v35 = vld [vmem:[%s7882_s0 + $0x3e8] sm:$0xf0] }
   0xb   :  { %1406 = vmatpush.bf16.msra.mxu1 %v5613_v5  ;;  %5742 = vmatpush.bf16.msra.mxu2 %v5613_v5  ;;  %v4150_v33 = vor.u32 %v5458_v29, %v4147_v30  ;;  %v4638_v36 = vor.u32 %v5580_v34, %v4635_v35  ;;  %v4153_v37 = vld [vmem:[%s7882_s0 + $0x20] sm:$0xf]  ;;  %v5461_v38 = vld [vmem:[%s7882_s0 + $0x24] sm:$0xf0]  ;;  %v4641_v39 = vld [vmem:[%s7882_s0 + $0x3f0] sm:$0xf] }
   0xc   :  { %v5583_v40 = vld [vmem:[%s7882_s0 + $0x3f4] sm:$0xf0]  ;;  %v5460_v41 = vld [vmem:[%s7882_s0 + $0x24] sm:$0xf]  ;;  %v4155_v42 = vld [vmem:[%s7882_s0 + $0x28] sm:$0xf0]  ;;  %v4154_v43 = vor.u32 %v5461_v38, %v4153_v37 }
   0xd   :  { %v4642_v44 = vor.u32 %v5583_v40, %v4641_v39  ;;  %v4158_v45 = vor.u32 %v5460_v41, %v4155_v42  ;;  %v5582_v46 = vld [vmem:[%s7882_s0 + $0x3f4] sm:$0xf]  ;;  %v4643_v47 = vld [vmem:[%s7882_s0 + $0x3f8] sm:$0xf0]  ;;  %v4161_v49 = vld [vmem:[%s7882_s0 + $0x30] sm:$0xf] }
   0xe   :  { %1038 = vmatpush.bf16.msra.mxu0 %v5604_v6  ;;  %5735 = vmatpush.bf16.msra.mxu3 %v5604_v6  ;;  %v4646_v48 = vor.u32 %v5582_v46, %v4643_v47  ;;  %v5463_v50 = vld [vmem:[%s7882_s0 + $0x34] sm:$0xf0]  ;;  %v4649_v51 = vld [vmem:[%s7882_s0 + $0x400] sm:$0xf]  ;;  %v5585_v52 = vld [vmem:[%s7882_s0 + $0x404] sm:$0xf0] }
   0xf   :  { %1407 = vmatpush.bf16.msra.mxu1 %v5612_v7  ;;  %5743 = vmatpush.bf16.msra.mxu2 %v5612_v7  ;;  %v5462_v53 = vld [vmem:[%s7882_s0 + $0x34] sm:$0xf]  ;;  %v4163_v54 = vld [vmem:[%s7882_s0 + $0x38] sm:$0xf0]  ;;  %v4162_v55 = vor.u32 %v5463_v50, %v4161_v49  ;;  %v4650_v56 = vor.u32 %v5585_v52, %v4649_v51  ;;  %v5584_v58 = vld [vmem:[%s7882_s0 + $0x404] sm:$0xf] }
  0x10   :  { %v4166_v57 = vor.u32 %v5462_v53, %v4163_v54  ;;  %v4651_v59 = vld [vmem:[%s7882_s0 + $0x408] sm:$0xf0]  ;;  %v4169_v61 = vld [vmem:[%s7882_s0 + $0x40] sm:$0xf]  ;;  %v5465_v62 = vld [vmem:[%s7882_s0 + $0x44] sm:$0xf0] }
  0x11   :  { %v4654_v60 = vor.u32 %v5584_v58, %v4651_v59  ;;  %v4657_v63 = vld [vmem:[%s7882_s0 + $0x410] sm:$0xf]  ;;  %v5587_v0 = vld [vmem:[%s7882_s0 + $0x414] sm:$0xf0]  ;;  %v5464_v1 = vld [vmem:[%s7882_s0 + $0x44] sm:$0xf]  ;;  %v4170_v3 = vor.u32 %v5465_v62, %v4169_v61 }
  0x12   :  { %1039 = vmatpush.bf16.msra.mxu0 %v5603_v8  ;;  %5736 = vmatpush.bf16.msra.mxu3 %v5603_v8  ;;  %v4171_v2 = vld [vmem:[%s7882_s0 + $0x48] sm:$0xf0]  ;;  %v4658_v4 = vor.u32 %v5587_v0, %v4657_v63  ;;  %v5586_v6 = vld [vmem:[%s7882_s0 + $0x414] sm:$0xf]  ;;  %v4659_v7 = vld [vmem:[%s7882_s0 + $0x418] sm:$0xf0] }
  0x13   :  { %1408 = vmatpush.bf16.msra.mxu1 %v5611_v9  ;;  %5744 = vmatpush.bf16.msra.mxu2 %v5611_v9  ;;  %v4174_v5 = vor.u32 %v5464_v1, %v4171_v2  ;;  %v4662_v8 = vor.u32 %v5586_v6, %v4659_v7  ;;  %v4177_v9 = vld [vmem:[%s7882_s0 + $0x50] sm:$0xf]  ;;  %v5588_v18 = vld [vmem:[%s7882_s0 + $0x424] sm:$0xf]  ;;  %v4185_v21 = vld [vmem:[%s7882_s0 + $0x60] sm:$0xf] }
  0x14   :  { %v5468_v25 = vld [vmem:[%s7882_s0 + $0x64] sm:$0xf]  ;;  %v4187_v26 = vld [vmem:[%s7882_s0 + $0x68] sm:$0xf0]  ;;  %v5590_v30 = vld [vmem:[%s7882_s0 + $0x434] sm:$0xf] }
  0x15   :  { %v4190_v29 = vor.u32 %v5468_v25, %v4187_v26  ;;  %v5471_v34 = vld [vmem:[%s7882_s0 + $0x74] sm:$0xf0]  ;;  %v4681_v35 = vld [vmem:[%s7882_s0 + $0x440] sm:$0xf]  ;;  %v5470_v37 = vld [vmem:[%s7882_s0 + $0x74] sm:$0xf] }
  0x16   :  { %1040 = vmatpush.bf16.msra.mxu0 %v5602_v10  ;;  %5737 = vmatpush.bf16.msra.mxu3 %v5602_v10  ;;  %v5467_v10 = vld [vmem:[%s7882_s0 + $0x54] sm:$0xf0]  ;;  %v4195_v38 = vld [vmem:[%s7882_s0 + $0x78] sm:$0xf0]  ;;  %v5592_v42 = vld [vmem:[%s7882_s0 + $0x444] sm:$0xf] }
  0x17   :  { %1409 = vmatpush.bf16.msra.mxu1 %v5610_v11  ;;  %5745 = vmatpush.bf16.msra.mxu2 %v5610_v11  ;;  %v4665_v11 = vld [vmem:[%s7882_s0 + $0x420] sm:$0xf]  ;;  %v4178_v15 = vor.u32 %v5467_v10, %v4177_v9  ;;  %v4198_v41 = vor.u32 %v5470_v37, %v4195_v38  ;;  %v5473_v46 = vld [vmem:[%s7882_s0 + $0x84] sm:$0xf0]  ;;  %v4689_v47 = vld [vmem:[%s7882_s0 + $0x450] sm:$0xf] }
  0x18   :  { %v5472_v49 = vld [vmem:[%s7882_s0 + $0x84] sm:$0xf]  ;;  %v4203_v50 = vld [vmem:[%s7882_s0 + $0x88] sm:$0xf0]  ;;  %v4691_v58 = vld [vmem:[%s7882_s0 + $0x458] sm:$0xf0] }
  0x19   :  { %v4206_v54 = vor.u32 %v5472_v49, %v4203_v50  ;;  %v4209_v62 = vld [vmem:[%s7882_s0 + $0x90] sm:$0xf]  ;;  %v5617_v63 = vld [vmem:[%s7883_s3 + $0x8] sm:$0xff]  ;;  %v5475_v0 = vld [vmem:[%s7882_s0 + $0x94] sm:$0xf0] }
  0x1a   :  { %1041 = vmatpush.bf16.msra.mxu0 %v5601_v12  ;;  %5738 = vmatpush.bf16.msra.mxu3 %v5601_v12  ;;  %v5589_v12 = vld [vmem:[%s7882_s0 + $0x424] sm:$0xf0]  ;;  %v4697_v1 = vld [vmem:[%s7882_s0 + $0x460] sm:$0xf]  ;;  %v4210_v6 = vor.u32 %v5475_v0, %v4209_v62  ;;  %v4219_v25 = vld [vmem:[%s7882_s0 + $0xa8] sm:$0xf0] }
  0x1b   :  { %1410 = vmatpush.bf16.msra.mxu1 %v5609_v13  ;;  %5746 = vmatpush.bf16.msra.mxu2 %v5609_v13  ;;  %v5466_v13 = vld [vmem:[%s7882_s0 + $0x54] sm:$0xf]  ;;  %v4666_v16 = vor.u32 %v5589_v12, %v4665_v11  ;;  %v5597_v2 = vld [vmem:[%s7882_s0 + $0x464] sm:$0xf0]  ;;  %v4227_v50 = vld [vmem:[%s7882_s0 + $0xb8] sm:$0xf0] }
  0x1c   :  { %v4698_v7 = vor.u32 %v5597_v2, %v4697_v1  ;;  %v5598_v38 = vld [vmem:[%s7882_s0 + $0x474] sm:$0xf] }
  0x1d   :  { %v5478_v49 = vld [vmem:[%s7882_s0 + $0xb4] sm:$0xf] }
  0x1e   :  { %1042 = vmatpush.bf16.msra.mxu0 %v5600_v14  ;;  %5739 = vmatpush.bf16.msra.mxu3 %v5600_v14  ;;  %v4179_v14 = vld [vmem:[%s7882_s0 + $0x58] sm:$0xf0]  ;;  %v5618_v1 = vld [vmem:[%s7883_s3 + $0x10] sm:$0xff] }
  0x1f   :  { %1411 = vmatpush.bf16.msra.mxu1 %v5608_v19  ;;  %5747 = vmatpush.bf16.msra.mxu2 %v5608_v19  ;;  %v4182_v17 = vor.u32 %v5466_v13, %v4179_v14  ;;  %v4667_v19 = vld [vmem:[%s7882_s0 + $0x428] sm:$0xf0]  ;;  %v5596_v13 = vld [vmem:[%s7882_s0 + $0x464] sm:$0xf] }
  0x20   :  { %v4670_v20 = vor.u32 %v5588_v18, %v4667_v19  ;;  %v4699_v14 = vld [vmem:[%s7882_s0 + $0x468] sm:$0xf0] }
  0x21   :  { %1043 = vmatmul.bf16.vlgmr.msra.gmra.mxu0 %v4138_v22  ;;  %1348 = vmatmul.bf16.vlgmr.msra.gmra.mxu3 %v4626_v23  ;;  %v5469_v22 = vld [vmem:[%s7882_s0 + $0x64] sm:$0xf0]  ;;  %v4673_v23 = vld [vmem:[%s7882_s0 + $0x430] sm:$0xf] }
  0x22   :  { %1412 = vmatmul.bf16.vlgmr.msra.gmra.mxu1 %v4142_v24  ;;  %1722 = vmatmul.bf16.vlgmr.msra.gmra.mxu2 %v4638_v36  ;;  %v5591_v24 = vld [vmem:[%s7882_s0 + $0x434] sm:$0xf0]  ;;  %v4186_v27 = vor.u32 %v5469_v22, %v4185_v21  ;;  %v5593_v36 = vld [vmem:[%s7882_s0 + $0x444] sm:$0xf0]  ;;  %v4705_v22 = vld [vmem:[%s7882_s0 + $0x470] sm:$0xf] }
  0x23   :  { %v4674_v28 = vor.u32 %v5591_v24, %v4673_v23  ;;  %v4682_v40 = vor.u32 %v5593_v36, %v4681_v35  ;;  %2030 = vmatpush.bf16.msrb.mxu3 %v5617_v63  ;;  %v5477_v21 = vld [vmem:[%s7882_s0 + $0xa4] sm:$0xf0]  ;;  %v5599_v23 = vld [vmem:[%s7882_s0 + $0x474] sm:$0xf0]  ;;  %v5476_v24 = vld [vmem:[%s7882_s0 + $0xa4] sm:$0xf] }
  0x31   :  { %1048 = vmatmul.bf16.gmra.mxu0 %v4146_v31  ;;  %1353 = vmatmul.bf16.gmra.mxu3 %v4634_v32  ;;  %v4675_v31 = vld [vmem:[%s7882_s0 + $0x438] sm:$0xf0] }
  0x32   :  { %1417 = vmatmul.bf16.gmra.mxu1 %v4150_v33  ;;  %1727 = vmatmul.bf16.gmra.mxu2 %v4646_v48  ;;  %v4678_v32 = vor.u32 %v5590_v30, %v4675_v31  ;;  %v4193_v33 = vld [vmem:[%s7882_s0 + $0x70] sm:$0xf]  ;;  %v5595_v48 = vld [vmem:[%s7882_s0 + $0x454] sm:$0xf0] }
  0x33   :  { %v4194_v39 = vor.u32 %v5471_v34, %v4193_v33  ;;  %v4690_v52 = vor.u32 %v5595_v48, %v4689_v47  ;;  %v5479_v47 = vld [vmem:[%s7882_s0 + $0xb4] sm:$0xf0] }
  0x41   :  { %1053 = vmatmul.bf16.gmra.mxu0 %v4154_v43  ;;  %1358 = vmatmul.bf16.gmra.mxu3 %v4642_v44  ;;  %v4683_v43 = vld [vmem:[%s7882_s0 + $0x448] sm:$0xf0] }
  0x42   :  { %1422 = vmatmul.bf16.gmra.mxu1 %v4158_v45  ;;  %1732 = vmatmul.bf16.gmra.mxu2 %v4654_v60  ;;  %v4686_v44 = vor.u32 %v5592_v42, %v4683_v43  ;;  %v4201_v45 = vld [vmem:[%s7882_s0 + $0x80] sm:$0xf] }
  0x43   :  { %v4202_v51 = vor.u32 %v5473_v46, %v4201_v45  ;;  %v4225_v46 = vld [vmem:[%s7882_s0 + $0xb0] sm:$0xf] }
  0x51   :  { %1058 = vmatmul.bf16.gmra.mxu0 %v4162_v55  ;;  %1363 = vmatmul.bf16.gmra.mxu3 %v4650_v56 }
  0x52   :  { %1427 = vmatmul.bf16.gmra.mxu1 %v4166_v57  ;;  %1737 = vmatmul.bf16.gmra.mxu2 %v4662_v8  ;;  %v5594_v57 = vld [vmem:[%s7882_s0 + $0x454] sm:$0xf]  ;;  %v5616_v8 = vld [vmem:[%s7883_s3] sm:$0xff] }
  0x53   :  { %v4694_v60 = vor.u32 %v5594_v57, %v4691_v58  ;;  %2031 = vmatpush.bf16.msrb.mxu3 %v5616_v8  ;;  %v4230_v58 = vor.u32 %v5478_v49, %v4227_v50 }
  0x61   :  { %1063 = vmatmul.bf16.gmra.mxu0 %v4170_v3  ;;  %1368 = vmatmul.bf16.gmra.mxu3 %v4658_v4  ;;  %v5474_v3 = vld [vmem:[%s7882_s0 + $0x94] sm:$0xf]  ;;  %v4211_v4 = vld [vmem:[%s7882_s0 + $0x98] sm:$0xf0] }
  0x62   :  { %1432 = vmatmul.bf16.gmra.mxu1 %v4174_v5  ;;  %1742 = vmatmul.bf16.gmra.mxu2 %v4670_v20  ;;  %v4214_v10 = vor.u32 %v5474_v3, %v4211_v4  ;;  %v4217_v20 = vld [vmem:[%s7882_s0 + $0xa0] sm:$0xf] }
  0x71   :  { %1068 = vmatmul.bf16.gmra.mxu0 %v4178_v15  ;;  %1373 = vmatmul.bf16.gmra.mxu3 %v4666_v16  ;;  %v4702_v16 = vor.u32 %v5596_v13, %v4699_v14 }
  0x72   :  { %1437 = vmatmul.bf16.gmra.mxu1 %v4182_v17  ;;  %1747 = vmatmul.bf16.gmra.mxu2 %v4678_v32  ;;  %v6115_v17 = vld [vmem:[%s7881_s2] ss:$0 sm:$0xff]  ;;  %v4222_v32 = vor.u32 %v5476_v24, %v4219_v25 }
  0x81   :  { %1073 = vmatmul.bf16.gmra.mxu0 %v4186_v27  ;;  %1378 = vmatmul.bf16.gmra.mxu3 %v4674_v28  ;;  %v4218_v28 = vor.u32 %v5477_v21, %v4217_v20  ;;  %v4235_v20 = vld [vmem:[%s7882_s0 + $0xc8] sm:$0xf0] }
  0x82   :  { %1442 = vmatmul.bf16.gmra.mxu1 %v4190_v29  ;;  %1752 = vmatmul.bf16.gmra.mxu2 %v4686_v44  ;;  %v4706_v29 = vor.u32 %v5599_v23, %v4705_v22 }
  0x91   :  { %1078 = vmatmul.bf16.gmra.mxu0 %v4194_v39  ;;  %1383 = vmatmul.bf16.gmra.mxu3 %v4682_v40  ;;  %v4707_v39 = vld [vmem:[%s7882_s0 + $0x478] sm:$0xf0] }
  0x92   :  { %1447 = vmatmul.bf16.gmra.mxu1 %v4198_v41  ;;  %1757 = vmatmul.bf16.gmra.mxu2 %v4694_v60  ;;  %v4710_v41 = vor.u32 %v5598_v38, %v4707_v39 }
  0x9e   :  { %v1044_v53 = vpop.f32.mrf.mxu0 }
  0x9f   :  { %v6066_v55 = vpop.f32.mrf.mxu1  ;;  %v1045_v37 = vadd.f32 %v6115_v17, %v1044_v53 }
  0xa1   :  { %1083 = vmatmul.bf16.gmra.mxu0 %v4202_v51  ;;  %1388 = vmatmul.bf16.gmra.mxu3 %v4690_v52  ;;  %v1414_v45 = vadd.f32 %v6066_v55, %v1045_v37  ;;  %v4226_v55 = vor.u32 %v5479_v47, %v4225_v46 }
  0xa2   :  { %1452 = vmatmul.bf16.gmra.mxu1 %v4206_v54  ;;  %1762 = vmatmul.bf16.gmra.mxu2 %v4702_v16  ;;  %v4233_v16 = vld [vmem:[%s7882_s0 + $0xc0] sm:$0xf] }
  0xa3   :  { %v1773_v54 = vmax.f32 %v1414_v45, 0.0 }
  0xa4   :  { %v6068_v56 = vpop.f32.mrf.mxu3 }
  0xa5   :  { %v1723_v26 = vpop.f32.mrf.mxu2 }
  0xa6   :  { %v1046_v59 = vpop.f32.mrf.mxu0 }
  0xa7   :  { %v1415_v61 = vpop.f32.mrf.mxu1  ;;  %v1047_v34 = vadd.f32 %v6115_v17, %v1046_v59 }
  0xa9   :  { %v1416_v42 = vadd.f32 %v1415_v61, %v1047_v34  ;;  %v5619_v61 = vld [vmem:[%s7883_s3 + $0x18] sm:$0xff] }
  0xaa   :  { %1970 = vmatpush.bf16.msrb.mxu2 %v5619_v61 }
  0xab   :  { %v1774_v48 = vmax.f32 %v1416_v42, 0.0 }
  0xac   :  { %v6097_v5 = vpop.f32.mrf.mxu3 }
  0xad   :  { %v6147_v35 = vpop.f32.mrf.mxu2  ;;  %v1917_v59 = vpack.c.bf16 %v1774_v48, %v1773_v54 }
  0xae   :  { %v6102_v9 = vpop.f32.mrf.mxu0  ;;  %1971 = vmatpush.bf16.msrb.mxu2 %v5618_v1 }
  0xaf   :  { %v6104_v11 = vpop.f32.mrf.mxu1  ;;  %v1050_v3 = vadd.f32 %v6115_v17, %v6102_v9  ;;  %v5481_v9 = vld [vmem:[%s7882_s0 + $0xc4] sm:$0xf0] }
  0xb0   :  { %v4234_v24 = vor.u32 %v5481_v9, %v4233_v16 }
  0xb1   :  { %1088 = vmatmul.bf16.gmra.mxu0 %v4210_v6  ;;  %1393 = vmatmul.bf16.gmra.mxu3 %v4698_v7  ;;  %v1419_v14 = vadd.f32 %v6104_v11, %v1050_v3 }
  0xb2   :  { %1457 = vmatmul.bf16.gmra.mxu1 %v4214_v10  ;;  %1767 = vmatmul.bf16.gmra.mxu2 %v4710_v41 }
  0xb3   :  { %v1775_v23 = vmax.f32 %v1419_v14, 0.0 }
  0xb4   :  { %v1354_v12 = vpop.f32.mrf.mxu3 }
  0xb5   :  { %v1355_v19 = vadd.f32 %v6115_v17, %v1354_v12  ;;  %v1728_v51 = vpop.f32.mrf.mxu2 }
  0xb6   :  { %v1051_v15 = vpop.f32.mrf.mxu0 }
  0xb7   :  { %v6117_v18 = vpop.f32.mrf.mxu1  ;;  %v6140_v30 = vadd.f32 %v1723_v26, %v1355_v19  ;;  %v1052_v63 = vadd.f32 %v6115_v17, %v1051_v15 }
  0xb9   :  { %v1421_v8 = vadd.f32 %v6117_v18, %v1052_v63  ;;  %v5480_v18 = vld [vmem:[%s7882_s0 + $0xc4] sm:$0xf] }
  0xba   :  { %v4238_v26 = vor.u32 %v5480_v18, %v4235_v20 }
  0xbb   :  { %v1776_v19 = vmax.f32 %v1421_v8, 0.0 }
  0xbc   :  { %v6138_v27 = vpop.f32.mrf.mxu3 }
  0xbd   :  { %v1730_v0 = vpop.f32.mrf.mxu2 }
  0xbe   :  { %v6142_v31 = vpop.f32.mrf.mxu0 }
  0xbf   :  { %v6144_v33 = vpop.f32.mrf.mxu1  ;;  %v1055_v38 = vadd.f32 %v6115_v17, %v6142_v31  ;;  %v5483_v31 = vld [vmem:[%s7882_s0 + $0xd4] sm:$0xf0] }
  0xc1   :  { %1093 = vmatmul.bf16.gmra.mxu0 %v4218_v28  ;;  %1398 = vmatmul.bf16.gmra.mxu3 %v4706_v29  ;;  %v1918_v28 = vpack.c.bf16 %v1776_v19, %v1775_v23  ;;  %v1424_v48 = vadd.f32 %v6144_v33, %v1055_v38  ;;  %v4243_v33 = vld [vmem:[%s7882_s0 + $0xd8] sm:$0xf0] }
  0xc2   :  { %1462 = vmatmul.bf16.gmra.mxu1 %v4222_v32 }
  0xc4   :  { %v1359_v36 = vpop.f32.mrf.mxu3 }
  0xc5   :  { %v1360_v44 = vadd.f32 %v6115_v17, %v1359_v36  ;;  %v1733_v11 = vpop.f32.mrf.mxu2 }
  0xc6   :  { %v1056_v40 = vpop.f32.mrf.mxu0 }
  0xc7   :  { %v6156_v43 = vpop.f32.mrf.mxu1  ;;  %v1729_v53 = vadd.f32 %v1728_v51, %v1360_v44  ;;  %v1057_v34 = vadd.f32 %v6115_v17, %v1056_v40  ;;  %v4241_v40 = vld [vmem:[%s7882_s0 + $0xd0] sm:$0xf] }
  0xc9   :  { %v1899_v4 = vmax.f32 %v1729_v53, 0.0  ;;  %v1426_v44 = vadd.f32 %v6156_v43, %v1057_v34  ;;  %v5482_v43 = vld [vmem:[%s7882_s0 + $0xd4] sm:$0xf] }
  0xca   :  { %v4246_v61 = vor.u32 %v5482_v43, %v4243_v33  ;;  %v4257_v43 = vld [vmem:[%s7882_s0 + $0xf0] sm:$0xf] }
  0xcb   :  { %v1778_v50 = vmax.f32 %v1426_v44, 0.0 }
  0xcc   :  { %v1361_v52 = vpop.f32.mrf.mxu3 }
  0xcd   :  { %v1362_v62 = vadd.f32 %v6115_v17, %v1361_v52  ;;  %v1735_v36 = vpop.f32.mrf.mxu2 }
  0xce   :  { %v6172_v57 = vpop.f32.mrf.mxu0 }
  0xcf   :  { %v6174_v60 = vpop.f32.mrf.mxu1  ;;  %v1731_v6 = vadd.f32 %v1730_v0, %v1362_v62 }
  0xd1   :  { %1098 = vmatmul.bf16.gmra.mxu0 %v4226_v55  ;;  %4800 = vmatmul.msk.bf16.vlgmr.msrb.gmra.mxu3 %vm1948_vm0, %v1917_v59  ;;  %v1900_v12 = vmax.f32 %v1731_v6, 0.0  ;;  %v1777_v55 = vmax.f32 %v1424_v48, 0.0 }
  0xd2   :  { %1467 = vmatmul.bf16.gmra.mxu1 %v4230_v58  ;;  %v4242_v58 = vor.u32 %v5483_v31, %v4241_v40 }
  0xd3   :  { %v6192_v15 = vpack.c.bf16 %v1900_v12, %v1899_v4  ;;  %v1919_v62 = vpack.c.bf16 %v1778_v50, %v1777_v55  ;;  %v4259_v55 = vld [vmem:[%s7882_s0 + $0xf8] sm:$0xf0] }
  0xd4   :  { %v1364_v2 = vpop.f32.mrf.mxu3 }
  0xd5   :  { %v1365_v13 = vadd.f32 %v6115_v17, %v1364_v2  ;;  %v1738_v52 = vpop.f32.mrf.mxu2 }
  0xd6   :  { %v1061_v7 = vpop.f32.mrf.mxu0 }
  0xd7   :  { %v6188_v10 = vpop.f32.mrf.mxu1  ;;  %v1734_v22 = vadd.f32 %v1733_v11, %v1365_v13  ;;  %v1062_v3 = vadd.f32 %v6115_v17, %v1061_v7  ;;  %v1060_v13 = vadd.f32 %v6115_v17, %v6172_v57  ;;  %v4249_v7 = vld [vmem:[%s7882_s0 + $0xe0] sm:$0xf]  ;;  %v5485_v11 = vld [vmem:[%s7882_s0 + $0xe4] sm:$0xf0] }
  0xd9   :  { %v1901_v39 = vmax.f32 %v1734_v22, 0.0  ;;  %v1431_v9 = vadd.f32 %v6188_v10, %v1062_v3  ;;  %v1429_v20 = vadd.f32 %v6174_v60, %v1060_v13  ;;  %v5484_v10 = vld [vmem:[%s7882_s0 + $0xe4] sm:$0xf]  ;;  %v4251_v22 = vld [vmem:[%s7882_s0 + $0xe8] sm:$0xf0] }
  0xda   :  { %v4254_v34 = vor.u32 %v5484_v10, %v4251_v22  ;;  %v4267_v10 = vld [vmem:[%s7882_s0 + $0x108] sm:$0xf0] }
  0xdb   :  { %v1780_v57 = vmax.f32 %v1431_v9, 0.0 }
  0xdc   :  { %v1366_v21 = vpop.f32.mrf.mxu3 }
  0xdd   :  { %v1367_v32 = vadd.f32 %v6115_v17, %v1366_v21  ;;  %v6240_v8 = vpop.f32.mrf.mxu2 }
  0xde   :  { %v6206_v25 = vpop.f32.mrf.mxu0 }
  0xdf   :  { %v6208_v29 = vpop.f32.mrf.mxu1  ;;  %v1736_v41 = vadd.f32 %v1735_v36, %v1367_v32 }
  0xe1   :  { %1103 = vmatmul.bf16.gmra.mxu0 %v4234_v24  ;;  %4801 = vmatmul.msk.bf16.gmra.mxu3 %vm1948_vm0, %v1918_v28  ;;  %v1902_v46 = vmax.f32 %v1736_v41, 0.0  ;;  %v4250_v28 = vor.u32 %v5485_v11, %v4249_v7  ;;  %v4265_v7 = vld [vmem:[%s7882_s0 + $0x100] sm:$0xf]  ;;  %v5489_v11 = vld [vmem:[%s7882_s0 + $0x104] sm:$0xf0] }
  0xe2   :  { %1472 = vmatmul.bf16.gmra.mxu1 %v4238_v26  ;;  %v1779_v26 = vmax.f32 %v1429_v20, 0.0 }
  0xe3   :  { %v6218_v49 = vpack.c.bf16 %v1902_v46, %v1901_v39 }
  0xe4   :  { %v1369_v37 = vpop.f32.mrf.mxu3  ;;  %v1920_v36 = vpack.c.bf16 %v1780_v57, %v1779_v26  ;;  %v4266_v26 = vor.u32 %v5489_v11, %v4265_v7  ;;  %v5493_v7 = vld [vmem:[%s7882_s0 + $0x124] sm:$0xf0] }
  0xe5   :  { %v1370_v47 = vadd.f32 %v6115_v17, %v1369_v37  ;;  %v1743_v60 = vpop.f32.mrf.mxu2 }
  0xe6   :  { %v1066_v42 = vpop.f32.mrf.mxu0 }
  0xe7   :  { %v1435_v45 = vpop.f32.mrf.mxu1  ;;  %v1067_v51 = vadd.f32 %v6115_v17, %v1066_v42  ;;  %v6235_v54 = vadd.f32 %v1738_v52, %v1370_v47  ;;  %v1065_v42 = vadd.f32 %v6115_v17, %v6206_v25  ;;  %v5487_v25 = vld [vmem:[%s7882_s0 + $0xf4] sm:$0xf0] }
  0xe9   :  { %v1436_v63 = vadd.f32 %v1435_v45, %v1067_v51  ;;  %v1434_v31 = vadd.f32 %v6208_v29, %v1065_v42  ;;  %v5486_v29 = vld [vmem:[%s7882_s0 + $0xf4] sm:$0xf] }
  0xeb   :  { %v1782_v4 = vmax.f32 %v1436_v63, 0.0  ;;  %v1781_v33 = vmax.f32 %v1434_v31, 0.0 }
  0xec   :  { %v6233_v53 = vpop.f32.mrf.mxu3 }
  0xed   :  { %v6269_v46 = vpop.f32.mrf.mxu2 }
  0xee   :  { %v1069_v59 = vpop.f32.mrf.mxu0 }
  0xef   :  { %v1070_v0 = vadd.f32 %v6115_v17, %v1069_v59  ;;  %v1438_v1 = vpop.f32.mrf.mxu1 }
  0xf1   :  { %v1439_v2 = vadd.f32 %v1438_v1, %v1070_v0  ;;  %1108 = vmatmul.bf16.gmra.mxu0 %v4242_v58  ;;  %4802 = vmatmul.msk.bf16.gmra.mxu3 %vm1948_vm0, %v1919_v62  ;;  %v4262_v0 = vor.u32 %v5486_v29, %v4259_v55  ;;  %v1921_v1 = vpack.c.bf16 %v1781_v33, %v1781_v33  ;;  %v5491_v33 = vld [vmem:[%s7882_s0 + $0x114] sm:$0xf0]  ;;  %v4275_v29 = vld [vmem:[%s7882_s0 + $0x118] sm:$0xf0] }
  0xf2   :  { %1477 = vmatmul.bf16.gmra.mxu1 %v4246_v61  ;;  %v4258_v61 = vor.u32 %v5487_v25, %v4257_v43  ;;  %v4273_v25 = vld [vmem:[%s7882_s0 + $0x110] sm:$0xf] }
  0xf3   :  { %v1783_v6 = vmax.f32 %v1439_v2, 0.0 }
  0xf4   :  { %v1374_v12 = vpop.f32.mrf.mxu3 }
  0xf5   :  { %v1926_v14 = vpack.c.bf16 %v1783_v6, %v1782_v4  ;;  %v1375_v18 = vadd.f32 %v6115_v17, %v1374_v12  ;;  %v1748_v58 = vpop.f32.mrf.mxu2 }
  0xf6   :  { %v1071_v16 = vpop.f32.mrf.mxu0 }
  0xf7   :  { %v1440_v19 = vpop.f32.mrf.mxu1  ;;  %4787 = vmatmul.msk.bf16.vlgmr.msrb.gmra.mxu2 %vm1948_vm0, %v1926_v14  ;;  %v1072_v21 = vadd.f32 %v6115_v17, %v1071_v16  ;;  %v6263_v24 = vadd.f32 %v1743_v60, %v1375_v18 }
  0xf9   :  { %v1441_v37 = vadd.f32 %v1440_v19, %v1072_v21  ;;  %v5488_v21 = vld [vmem:[%s7882_s0 + $0x104] sm:$0xf] }
  0xfb   :  { %v1784_v44 = vmax.f32 %v1441_v37, 0.0 }
  0xfc   :  { %v6261_v23 = vpop.f32.mrf.mxu3 }
  0xfd   :  { %v6293_v14 = vpop.f32.mrf.mxu2 }
  0xfe   :  { %v1074_v32 = vpop.f32.mrf.mxu0 }
  0xff   :  { %v1075_v38 = vadd.f32 %v6115_v17, %v1074_v32  ;;  %v1443_v39 = vpop.f32.mrf.mxu1 }
 0x101   :  { %v1444_v41 = vadd.f32 %v1443_v39, %v1075_v38  ;;  %1113 = vmatmul.bf16.gmra.mxu0 %v4250_v28  ;;  %4803 = vmatmul.msk.bf16.gmra.mxu3 %vm1948_vm0, %v1920_v36  ;;  %v5621_v39 = vld [vmem:[%s7883_s3 + $0x28] sm:$0xff] }
 0x102   :  { %1482 = vmatmul.bf16.gmra.mxu1 %v4254_v34  ;;  %v4270_v34 = vor.u32 %v5488_v21, %v4267_v10  ;;  %2100 = vmatpush.bf16.msra.mxu2 %v5621_v39  ;;  %v4283_v21 = vld [vmem:[%s7882_s0 + $0x128] sm:$0xf0] }
 0x103   :  { %v1785_v45 = vmax.f32 %v1444_v41, 0.0 }
 0x104   :  { %v1379_v47 = vpop.f32.mrf.mxu3 }
 0x105   :  { %v1927_v48 = vpack.c.bf16 %v1785_v45, %v1784_v44  ;;  %v1380_v51 = vadd.f32 %v6115_v17, %v1379_v47  ;;  %v1753_v22 = vpop.f32.mrf.mxu2  ;;  %v5620_v47 = vld [vmem:[%s7883_s3 + $0x20] sm:$0xff] }
 0x106   :  { %v1076_v40 = vpop.f32.mrf.mxu0  ;;  %2101 = vmatpush.bf16.msra.mxu2 %v5620_v47 }
 0x107   :  { %v1445_v50 = vpop.f32.mrf.mxu1  ;;  %4788 = vmatmul.msk.bf16.gmra.mxu2 %vm1948_vm0, %v1927_v48  ;;  %v1077_v52 = vadd.f32 %v6115_v17, %v1076_v40  ;;  %v6289_v62 = vadd.f32 %v1748_v58, %v1380_v51 }
 0x109   :  { %v1446_v2 = vadd.f32 %v1445_v50, %v1077_v52  ;;  %v5490_v52 = vld [vmem:[%s7882_s0 + $0x114] sm:$0xf] }
 0x10b   :  { %v1786_v12 = vmax.f32 %v1446_v2, 0.0  ;;  %v4278_v2 = vor.u32 %v5490_v52, %v4275_v29  ;;  %v5494_v52 = vld [vmem:[%s7882_s0 + $0x134] sm:$0xf]  ;;  %v4291_v29 = vld [vmem:[%s7882_s0 + $0x138] sm:$0xf0] }
 0x10c   :  { %v6287_v59 = vpop.f32.mrf.mxu3 }
 0x10d   :  { %v6318_v45 = vpop.f32.mrf.mxu2 }
 0x10e   :  { %v1079_v63 = vpop.f32.mrf.mxu0 }
 0x10f   :  { %v1080_v3 = vadd.f32 %v6115_v17, %v1079_v63  ;;  %v1448_v4 = vpop.f32.mrf.mxu1  ;;  %v4274_v63 = vor.u32 %v5491_v33, %v4273_v25  ;;  %v5495_v25 = vld [vmem:[%s7882_s0 + $0x134] sm:$0xf0] }
 0x111   :  { %v1449_v6 = vadd.f32 %v1448_v4, %v1080_v3  ;;  %1118 = vmatmul.bf16.gmra.mxu0 %v4258_v61  ;;  %4804 = vmatmul.msk.bf16.gmra.mxu3 %vm1948_vm0, %v1921_v1 }
 0x112   :  { %1487 = vmatmul.bf16.gmra.mxu1 %v4262_v0 }
 0x113   :  { %v1787_v13 = vmax.f32 %v1449_v6, 0.0 }
 0x114   :  { %v1384_v16 = vpop.f32.mrf.mxu3 }
 0x115   :  { %v1928_v9 = vpack.c.bf16 %v1787_v13, %v1786_v12  ;;  %v1385_v20 = vadd.f32 %v6115_v17, %v1384_v16  ;;  %v1758_v55 = vpop.f32.mrf.mxu2 }
 0x116   :  { %v1081_v19 = vpop.f32.mrf.mxu0 }
 0x117   :  { %v1450_v18 = vpop.f32.mrf.mxu1  ;;  %4789 = vmatmul.msk.bf16.gmra.mxu2 %vm1948_vm0, %v1928_v9  ;;  %v1082_v57 = vadd.f32 %v6115_v17, %v1081_v19  ;;  %v6312_v28 = vadd.f32 %v1753_v22, %v1385_v20  ;;  %v4281_v20 = vld [vmem:[%s7882_s0 + $0x120] sm:$0xf] }
 0x119   :  { %v1451_v36 = vadd.f32 %v1450_v18, %v1082_v57  ;;  %v5492_v57 = vld [vmem:[%s7882_s0 + $0x124] sm:$0xf] }
 0x11b   :  { %v1788_v42 = vmax.f32 %v1451_v36, 0.0 }
 0x11c   :  { %v6310_v60 = vpop.f32.mrf.mxu3 }
 0x11d   :  { %v6342_v6 = vpop.f32.mrf.mxu2 }
 0x11e   :  { %v1084_v32 = vpop.f32.mrf.mxu0 }
 0x11f   :  { %v1085_v37 = vadd.f32 %v6115_v17, %v1084_v32  ;;  %v1453_v38 = vpop.f32.mrf.mxu1  ;;  %v4282_v32 = vor.u32 %v5493_v7, %v4281_v20 }
 0x121   :  { %v1454_v41 = vadd.f32 %v1453_v38, %v1085_v37  ;;  %1123 = vmatmul.bf16.gmra.mxu0 %v4266_v26  ;;  %v4286_v37 = vor.u32 %v5492_v57, %v4283_v21  ;;  %v4297_v57 = vld [vmem:[%s7882_s0 + $0x140] sm:$0xf]  ;;  %v5497_v21 = vld [vmem:[%s7882_s0 + $0x144] sm:$0xf0] }
 0x122   :  { %1492 = vmatmul.bf16.gmra.mxu1 %v4270_v34 }
 0x123   :  { %v1789_v44 = vmax.f32 %v1454_v41, 0.0 }
 0x124   :  { %v1389_v48 = vpop.f32.mrf.mxu3 }
 0x125   :  { %v1929_v40 = vpack.c.bf16 %v1789_v44, %v1788_v42  ;;  %v1390_v51 = vadd.f32 %v6115_v17, %v1389_v48  ;;  %v1763_v10 = vpop.f32.mrf.mxu2 }
 0x126   :  { %v1086_v31 = vpop.f32.mrf.mxu0 }
 0x127   :  { %v1455_v50 = vpop.f32.mrf.mxu1  ;;  %4790 = vmatmul.msk.bf16.gmra.mxu2 %vm1948_vm0, %v1929_v40  ;;  %v1087_v43 = vadd.f32 %v6115_v17, %v1086_v31  ;;  %v6340_v0 = vadd.f32 %v1758_v55, %v1390_v51 }
 0x129   :  { %v1456_v61 = vadd.f32 %v1455_v50, %v1087_v43  ;;  %v4289_v43 = vld [vmem:[%s7882_s0 + $0x130] sm:$0xf] }
 0x12b   :  { %v1790_v4 = vmax.f32 %v1456_v61, 0.0 }
 0x12c   :  { %v6338_v58 = vpop.f32.mrf.mxu3 }
 0x12d   :  { %v1930_v13 = vpack.c.bf16 %v1790_v4, %v1790_v4  ;;  %v6364_v44 = vpop.f32.mrf.mxu2  ;;  %v4294_v4 = vor.u32 %v5494_v52, %v4291_v29  ;;  %v4305_v29 = vld [vmem:[%s7882_s0 + $0x150] sm:$0xf] }
 0x12e   :  { %v1089_v1 = vpop.f32.mrf.mxu0 }
 0x12f   :  { %v1458_v3 = vpop.f32.mrf.mxu1  ;;  %v1090_v11 = vadd.f32 %v6115_v17, %v1089_v1  ;;  %v4290_v1 = vor.u32 %v5495_v25, %v4289_v43 }
 0x131   :  { %1128 = vmatmul.bf16.gmra.mxu0 %v4274_v63  ;;  %v1459_v38 = vadd.f32 %v1458_v3, %v1090_v11 }
 0x132   :  { %1497 = vmatmul.bf16.gmra.mxu1 %v4278_v2 }
 0x133   :  { %v1791_v42 = vmax.f32 %v1459_v38, 0.0  ;;  %v4298_v38 = vor.u32 %v5497_v21, %v4297_v57 }
 0x134   :  { %v1394_v12 = vpop.f32.mrf.mxu3 }
 0x135   :  { %v1395_v19 = vadd.f32 %v6115_v17, %v1394_v12  ;;  %v1768_v61 = vpop.f32.mrf.mxu2 }
 0x136   :  { %v1091_v16 = vpop.f32.mrf.mxu0 }
 0x137   :  { %v1460_v9 = vpop.f32.mrf.mxu1  ;;  %4791 = vmatmul.msk.bf16.gmra.mxu2 %vm1948_vm0, %v1930_v13  ;;  %v1092_v18 = vadd.f32 %v6115_v17, %v1091_v16  ;;  %v6362_v34 = vadd.f32 %v1763_v10, %v1395_v19 }
 0x139   :  { %v1461_v26 = vadd.f32 %v1460_v9, %v1092_v18 }
 0x13b   :  { %v1792_v41 = vmax.f32 %v1461_v26, 0.0  ;;  %v5496_v26 = vld [vmem:[%s7882_s0 + $0x144] sm:$0xf] }
 0x13c   :  { %v6360_v22 = vpop.f32.mrf.mxu3 }
 0x13d   :  { %v2057_v48 = vpack.c.bf16 %v1792_v41, %v1791_v42 }
 0x13e   :  { %v1094_v36 = vpop.f32.mrf.mxu0 }
 0x13f   :  { %v1463_v39 = vpop.f32.mrf.mxu1  ;;  %v1095_v33 = vadd.f32 %v6115_v17, %v1094_v36 }
 0x141   :  { %1133 = vmatmul.bf16.gmra.mxu0 %v4282_v32  ;;  %v1464_v12 = vadd.f32 %v1463_v39, %v1095_v33  ;;  %v4299_v32 = vld [vmem:[%s7882_s0 + $0x148] sm:$0xf0] }
 0x142   :  { %1502 = vmatmul.bf16.gmra.mxu1 %v4286_v37  ;;  %v4302_v41 = vor.u32 %v5496_v26, %v4299_v32 }
 0x143   :  { %v1793_v9 = vmax.f32 %v1464_v12, 0.0 }
 0x144   :  { %v1399_v47 = vpop.f32.mrf.mxu3 }
 0x145   :  { %v1400_v50 = vadd.f32 %v6115_v17, %v1399_v47 }
 0x146   :  { %v1096_v40 = vpop.f32.mrf.mxu0 }
 0x147   :  { %v1465_v31 = vpop.f32.mrf.mxu1  ;;  %4817 = vmatmul.msk.bf16.vlgmr.msra.gmra.mxu2 %vm1948_vm0, %v2057_v48  ;;  %v1097_v51 = vadd.f32 %v6115_v17, %v1096_v40  ;;  %v6384_v2 = vadd.f32 %v1768_v61, %v1400_v50  ;;  %v5623_v48 = vld [vmem:[%s7883_s3 + $0x38] sm:$0xff]  ;;  %v5622_v50 = vld [vmem:[%s7883_s3 + $0x30] sm:$0xff] }
 0x148   :  { %2179 = vmatpush.bf16.msra.mxu3 %v5623_v48  ;;  %v5499_v61 = vld [vmem:[%s7882_s0 + $0x154] sm:$0xf0]  ;;  %v5500_v48 = vld [vmem:[%s7882_s0 + $0x164] sm:$0xf] }
 0x149   :  { %v1466_v63 = vadd.f32 %v1465_v31, %v1097_v51 }
 0x14b   :  { %v1794_v16 = vmax.f32 %v1466_v63, 0.0 }
 0x14c   :  { %v6382_v55 = vpop.f32.mrf.mxu3  ;;  %2180 = vmatpush.bf16.msra.mxu3 %v5622_v50 }
 0x14d   :  { %v2058_v18 = vpack.c.bf16 %v1794_v16, %v1793_v9 }
 0x14e   :  { %v1099_v3 = vpop.f32.mrf.mxu0 }
 0x14f   :  { %v1468_v13 = vpop.f32.mrf.mxu1  ;;  %v1100_v10 = vadd.f32 %v6115_v17, %v1099_v3  ;;  %v4307_v3 = vld [vmem:[%s7882_s0 + $0x158] sm:$0xf0] }
 0x151   :  { %1138 = vmatmul.bf16.gmra.mxu0 %v4290_v1  ;;  %v1469_v42 = vadd.f32 %v1468_v13, %v1100_v10  ;;  %v5498_v1 = vld [vmem:[%s7882_s0 + $0x154] sm:$0xf]  ;;  %v4306_v13 = vor.u32 %v5499_v61, %v4305_v29 }
 0x152   :  { %1507 = vmatmul.bf16.gmra.mxu1 %v4294_v4  ;;  %v4310_v9 = vor.u32 %v5498_v1, %v4307_v3 }
 0x153   :  { %v1795_v31 = vmax.f32 %v1469_v42, 0.0 }
 0x154   :  { %v2033_v19 = vpop.f32.mrf.mxu3 }
 0x156   :  { %v1101_v20 = vpop.f32.mrf.mxu0 }
 0x157   :  { %v1470_v7 = vpop.f32.mrf.mxu1  ;;  %4818 = vmatmul.msk.bf16.gmra.mxu2 %vm1948_vm0, %v2058_v18  ;;  %v1102_v11 = vadd.f32 %v6115_v17, %v1101_v20 }
 0x159   :  { %v1471_v37 = vadd.f32 %v1470_v7, %v1102_v11  ;;  %v6428_v7 = vpop.f32.mrf.mxu2 }
 0x15b   :  { %v1796_v40 = vmax.f32 %v1471_v37, 0.0 }
 0x15c   :  { %v6401_v36 = vpop.f32.mrf.mxu3 }
 0x15d   :  { %v2059_v43 = vpack.c.bf16 %v1796_v40, %v1795_v31  ;;  %v4315_v40 = vld [vmem:[%s7882_s0 + $0x168] sm:$0xf0] }
 0x15e   :  { %v1104_v39 = vpop.f32.mrf.mxu0 }
 0x15f   :  { %v1473_v47 = vpop.f32.mrf.mxu1  ;;  %v1105_v63 = vadd.f32 %v6115_v17, %v1104_v39  ;;  %v4313_v39 = vld [vmem:[%s7882_s0 + $0x160] sm:$0xf] }
 0x161   :  { %1143 = vmatmul.bf16.gmra.mxu0 %v4298_v38  ;;  %v1474_v18 = vadd.f32 %v1473_v47, %v1105_v63 }
 0x162   :  { %1512 = vmatmul.bf16.gmra.mxu1 %v4302_v41  ;;  %v5501_v41 = vld [vmem:[%s7882_s0 + $0x164] sm:$0xf0] }
 0x163   :  { %v1797_v57 = vmax.f32 %v1474_v18, 0.0 }
 0x164   :  { %v6409_v51 = vpop.f32.mrf.mxu3 }
 0x166   :  { %v1106_v25 = vpop.f32.mrf.mxu0 }
 0x167   :  { %v1475_v33 = vpop.f32.mrf.mxu1  ;;  %4819 = vmatmul.msk.bf16.gmra.mxu2 %vm1948_vm0, %v2059_v43  ;;  %v1107_v52 = vadd.f32 %v6115_v17, %v1106_v25  ;;  %v4314_v43 = vor.u32 %v5501_v41, %v4313_v39 }
 0x169   :  { %v1476_v12 = vadd.f32 %v1475_v33, %v1107_v52  ;;  %v4318_v33 = vor.u32 %v5500_v48, %v4315_v40 }
 0x16b   :  { %v1798_v11 = vmax.f32 %v1476_v12, 0.0 }
 0x16c   :  { %v6426_v4 = vpop.f32.mrf.mxu3 }
 0x16d   :  { %7892 = vst [vmem:[#allocation2_spill] sm:$0xff] %v6426_v4  ;;  %v2060_v10 = vpack.c.bf16 %v1798_v11, %v1797_v57  ;;  %v4321_v57 = vld [vmem:[%s7882_s0 + $0x170] sm:$0xf] }
 0x16e   :  { %v1109_v16 = vpop.f32.mrf.mxu0 }
 0x16f   :  { %v1478_v20 = vpop.f32.mrf.mxu1  ;;  %v1110_v37 = vadd.f32 %v6115_v17, %v1109_v16 }
 0x171   :  { %1148 = vmatmul.bf16.gmra.mxu0 %v4306_v13  ;;  %v1479_v50 = vadd.f32 %v1478_v20, %v1110_v37  ;;  %v5502_v37 = vld [vmem:[%s7882_s0 + $0x174] sm:$0xf] }
 0x172   :  { %1517 = vmatmul.bf16.gmra.mxu1 %v4310_v9 }
 0x174   :  { %v6430_v21 = vpop.f32.mrf.mxu3 }
 0x176   :  { %v1111_v26 = vpop.f32.mrf.mxu0 }
 0x177   :  { %v1480_v32 = vpop.f32.mrf.mxu1  ;;  %4820 = vmatmul.msk.bf16.gmra.mxu2 %vm1948_vm0, %v2060_v10  ;;  %v1112_v42 = vadd.f32 %v6115_v17, %v1111_v26  ;;  %v5503_v10 = vld [vmem:[%s7882_s0 + $0x174] sm:$0xf0] }
 0x178   :  { %v4322_v41 = vor.u32 %v5503_v10, %v4321_v57 }
 0x179   :  { %v1481_v52 = vadd.f32 %v1480_v32, %v1112_v42 }
 0x17a   :  { %v1973_v38 = vpop.f32.mrf.mxu2 }
 0x17b   :  { %v6441_v47 = vadd.f32 %v2033_v19, %v1973_v38  ;;  %v1799_v19 = vmax.f32 %v1479_v50, 0.0  ;;  %v1800_v3 = vmax.f32 %v1481_v52, 0.0  ;;  %v4323_v38 = vld [vmem:[%s7882_s0 + $0x178] sm:$0xf0] }
 0x17c   :  { %v6449_v31 = vpop.f32.mrf.mxu3  ;;  %v4326_v48 = vor.u32 %v5502_v37, %v4323_v38 }
 0x17d   :  { %7893 = vst [vmem:[#allocation3_spill] sm:$0xff] %v6449_v31  ;;  %v2061_v16 = vpack.c.bf16 %v1799_v19, %v1799_v19 }
 0x17e   :  { %v1114_v25 = vpop.f32.mrf.mxu0 }
 0x17f   :  { %v1115_v29 = vadd.f32 %v6115_v17, %v1114_v25  ;;  %v1483_v61 = vpop.f32.mrf.mxu1 }
 0x181   :  { %v1484_v63 = vadd.f32 %v1483_v61, %v1115_v29  ;;  %1153 = vmatmul.bf16.gmra.mxu0 %v4314_v43 }
 0x182   :  { %1522 = vmatmul.bf16.gmra.mxu1 %v4318_v33  ;;  %v6452_v1 = vpop.f32.mrf.mxu2 }
 0x183   :  { %v1801_v12 = vmax.f32 %v1484_v63, 0.0 }
 0x184   :  { %v2048_v13 = vpop.f32.mrf.mxu3 }
 0x185   :  { %v2136_v9 = vpack.c.bf16 %v1801_v12, %v1800_v3  ;;  %v4329_v12 = vld [vmem:[%s7882_s0 + $0x180] sm:$0xf] }
 0x186   :  { %v1116_v18 = vpop.f32.mrf.mxu0 }
 0x187   :  { %v1485_v20 = vpop.f32.mrf.mxu1  ;;  %4821 = vmatmul.msk.bf16.gmra.mxu2 %vm1948_vm0, %v2061_v16  ;;  %4834 = vmatmul.msk.bf16.vlgmr.msra.gmra.mxu3 %vm1948_vm0, %v2136_v9  ;;  %v1117_v26 = vadd.f32 %v6115_v17, %v1116_v18  ;;  %v5505_v16 = vld [vmem:[%s7882_s0 + $0x184] sm:$0xf0] }
 0x188   :  { %v4330_v10 = vor.u32 %v5505_v16, %v4329_v12  ;;  %v5506_v16 = vld [vmem:[%s7882_s0 + $0x194] sm:$0xf] }
 0x189   :  { %v1486_v40 = vadd.f32 %v1485_v20, %v1117_v26  ;;  %v5504_v20 = vld [vmem:[%s7882_s0 + $0x184] sm:$0xf] }
 0x18a   :  { %v1978_v11 = vpop.f32.mrf.mxu2 }
 0x18b   :  { %v6464_v32 = vadd.f32 %v6409_v51, %v1978_v11  ;;  %v1802_v33 = vmax.f32 %v1486_v40, 0.0  ;;  %v4331_v11 = vld [vmem:[%s7882_s0 + $0x188] sm:$0xf0] }
 0x18c   :  { %v6472_v39 = vpop.f32.mrf.mxu3  ;;  %v4334_v37 = vor.u32 %v5504_v20, %v4331_v11  ;;  %v5624_v20 = vld [vmem:[%s7883_s3 + $0x40] sm:$0xff] }
 0x18d   :  { %7894 = vst [vmem:[#allocation4_spill] sm:$0xff] %v6472_v39 }
 0x18e   :  { %v1119_v42 = vpop.f32.mrf.mxu0 }
 0x18f   :  { %v1120_v50 = vadd.f32 %v6115_v17, %v1119_v42  ;;  %v1488_v43 = vpop.f32.mrf.mxu1 }
 0x191   :  { %v1489_v25 = vadd.f32 %v1488_v43, %v1120_v50  ;;  %1158 = vmatmul.bf16.gmra.mxu0 %v4322_v41 }
 0x192   :  { %1527 = vmatmul.bf16.gmra.mxu1 %v4326_v48  ;;  %v6475_v51 = vpop.f32.mrf.mxu2 }
 0x193   :  { %7895 = vst [vmem:[#allocation5_spill] sm:$0xff] %v6475_v51  ;;  %v1803_v52 = vmax.f32 %v1489_v25, 0.0 }
 0x194   :  { %v2053_v29 = vpop.f32.mrf.mxu3 }
 0x195   :  { %v2137_v61 = vpack.c.bf16 %v1803_v52, %v1802_v33  ;;  %v5625_v52 = vld [vmem:[%s7883_s3 + $0x48] sm:$0xff] }
 0x196   :  { %v1121_v19 = vpop.f32.mrf.mxu0  ;;  %2258 = vmatpush.bf16.msrb.mxu2 %v5625_v52 }
 0x197   :  { %v1490_v63 = vpop.f32.mrf.mxu1  ;;  %4835 = vmatmul.msk.bf16.gmra.mxu3 %vm1948_vm0, %v2137_v61  ;;  %v1122_v9 = vadd.f32 %v6115_v17, %v1121_v19  ;;  %v4337_v19 = vld [vmem:[%s7882_s0 + $0x190] sm:$0xf] }
 0x199   :  { %v1491_v38 = vadd.f32 %v1490_v63, %v1122_v9  ;;  %v5507_v63 = vld [vmem:[%s7882_s0 + $0x194] sm:$0xf0]  ;;  %v4339_v9 = vld [vmem:[%s7882_s0 + $0x198] sm:$0xf0] }
 0x19a   :  { %v1983_v3 = vpop.f32.mrf.mxu2  ;;  %v4338_v11 = vor.u32 %v5507_v63, %v4337_v19  ;;  %2259 = vmatpush.bf16.msrb.mxu2 %v5624_v20  ;;  %v5508_v63 = vld [vmem:[%s7882_s0 + $0x1a4] sm:$0xf] }
 0x19b   :  { %v6486_v18 = vadd.f32 %v6430_v21, %v1983_v3  ;;  %v1804_v40 = vmax.f32 %v1491_v38, 0.0 }
 0x19c   :  { %v2055_v57 = vpop.f32.mrf.mxu3 }
 0x19e   :  { %v1124_v26 = vpop.f32.mrf.mxu0 }
 0x19f   :  { %v1125_v41 = vadd.f32 %v6115_v17, %v1124_v26  ;;  %v1493_v42 = vpop.f32.mrf.mxu1 }
 0x1a1   :  { %v1494_v48 = vadd.f32 %v1493_v42, %v1125_v41  ;;  %1163 = vmatmul.bf16.gmra.mxu0 %v4330_v10  ;;  %v4342_v10 = vor.u32 %v5506_v16, %v4339_v9 }
 0x1a2   :  { %1532 = vmatmul.bf16.gmra.mxu1 %v4334_v37  ;;  %v6495_v21 = vpop.f32.mrf.mxu2 }
 0x1a3   :  { %7896 = vst [vmem:[#allocation6_spill] sm:$0xff] %v6495_v21  ;;  %v1805_v50 = vmax.f32 %v1494_v48, 0.0 }
 0x1a5   :  { %v2138_v43 = vpack.c.bf16 %v1805_v50, %v1804_v40 }
 0x1a6   :  { %v1126_v25 = vpop.f32.mrf.mxu0 }
 0x1a7   :  { %v1495_v33 = vpop.f32.mrf.mxu1  ;;  %4836 = vmatmul.msk.bf16.gmra.mxu3 %vm1948_vm0, %v2138_v43  ;;  %v1127_v3 = vadd.f32 %v6115_v17, %v1126_v25 }
 0x1a9   :  { %v1496_v26 = vadd.f32 %v1495_v33, %v1127_v3  ;;  %v4345_v33 = vld [vmem:[%s7882_s0 + $0x1a0] sm:$0xf]  ;;  %v4347_v3 = vld [vmem:[%s7882_s0 + $0x1a8] sm:$0xf0] }
 0x1aa   :  { %v1988_v61 = vpop.f32.mrf.mxu2 }
 0x1ab   :  { %v6508_v12 = vadd.f32 %v2048_v13, %v1988_v61  ;;  %v1806_v42 = vmax.f32 %v1496_v26, 0.0  ;;  %v5509_v61 = vld [vmem:[%s7882_s0 + $0x1a4] sm:$0xf0] }
 0x1ac   :  { %v4346_v9 = vor.u32 %v5509_v61, %v4345_v33 }
 0x1ae   :  { %v1129_v57 = vpop.f32.mrf.mxu0 }
 0x1af   :  { %v1130_v13 = vadd.f32 %v6115_v17, %v1129_v57  ;;  %v1498_v37 = vpop.f32.mrf.mxu1 }
 0x1b1   :  { %v1499_v38 = vadd.f32 %v1498_v37, %v1130_v13  ;;  %1168 = vmatmul.bf16.gmra.mxu0 %v4338_v11  ;;  %v4350_v11 = vor.u32 %v5508_v63, %v4347_v3  ;;  %v5510_v63 = vld [vmem:[%s7882_s0 + $0x1b4] sm:$0xf]  ;;  %v4355_v3 = vld [vmem:[%s7882_s0 + $0x1b8] sm:$0xf0] }
 0x1b2   :  { %1537 = vmatmul.bf16.gmra.mxu1 %v4342_v10  ;;  %v6520_v41 = vpop.f32.mrf.mxu2 }
 0x1b3   :  { %7897 = vst [vmem:[#allocation7_spill] sm:$0xff] %v6520_v41  ;;  %v1807_v48 = vmax.f32 %v1499_v38, 0.0 }
 0x1b5   :  { %v2139_v40 = vpack.c.bf16 %v1807_v48, %v1806_v42 }
 0x1b6   :  { %v1131_v50 = vpop.f32.mrf.mxu0 }
 0x1b7   :  { %v1500_v43 = vpop.f32.mrf.mxu1  ;;  %4837 = vmatmul.msk.bf16.gmra.mxu3 %vm1948_vm0, %v2139_v40  ;;  %v1132_v25 = vadd.f32 %v6115_v17, %v1131_v50 }
 0x1b9   :  { %v1501_v16 = vadd.f32 %v1500_v43, %v1132_v25  ;;  %v4353_v43 = vld [vmem:[%s7882_s0 + $0x1b0] sm:$0xf]  ;;  %v5511_v25 = vld [vmem:[%s7882_s0 + $0x1b4] sm:$0xf0] }
 0x1ba   :  { %v1993_v52 = vpop.f32.mrf.mxu2 }
 0x1bb   :  { %v6530_v19 = vadd.f32 %v2053_v29, %v1993_v52  ;;  %v1808_v10 = vmax.f32 %v1501_v16, 0.0 }
 0x1bd   :  { %v2140_v13 = vpack.c.bf16 %v1808_v10, %v1808_v10 }
 0x1be   :  { %v1134_v20 = vpop.f32.mrf.mxu0 }
 0x1bf   :  { %v1503_v57 = vpop.f32.mrf.mxu1  ;;  %v1135_v29 = vadd.f32 %v6115_v17, %v1134_v20 }
 0x1c1   :  { %1173 = vmatmul.bf16.gmra.mxu0 %v4346_v9  ;;  %v1504_v38 = vadd.f32 %v1503_v57, %v1135_v29  ;;  %v4354_v9 = vor.u32 %v5511_v25, %v4353_v43 }
 0x1c2   :  { %1542 = vmatmul.bf16.gmra.mxu1 %v4350_v11  ;;  %v1995_v26 = vpop.f32.mrf.mxu2  ;;  %v4358_v11 = vor.u32 %v5510_v63, %v4355_v3 }
 0x1c3   :  { %v1809_v52 = vmax.f32 %v1504_v38, 0.0 }
 0x1c6   :  { %v1136_v37 = vpop.f32.mrf.mxu0 }
 0x1c7   :  { %v1137_v42 = vadd.f32 %v6115_v17, %v1136_v37  ;;  %v1505_v48 = vpop.f32.mrf.mxu1  ;;  %4838 = vmatmul.msk.bf16.gmra.mxu3 %vm1948_vm0, %v2140_v13 }
 0x1c9   :  { %v1506_v40 = vadd.f32 %v1505_v48, %v1137_v42  ;;  %v4361_v48 = vld [vmem:[%s7882_s0 + $0x1c0] sm:$0xf] }
 0x1ca   :  { %v2103_v50 = vpop.f32.mrf.mxu2 }
 0x1cb   :  { %v1810_v33 = vmax.f32 %v1506_v40, 0.0  ;;  %v6548_v61 = vadd.f32 %v2103_v50, %v6441_v47  ;;  %v5513_v40 = vld [vmem:[%s7882_s0 + $0x1c4] sm:$0xf0] }
 0x1cc   :  { %v4362_v63 = vor.u32 %v5513_v40, %v4361_v48 }
 0x1cd   :  { %v2215_v16 = vpack.c.bf16 %v1810_v33, %v1809_v52  ;;  %v4363_v52 = vld [vmem:[%s7882_s0 + $0x1c8] sm:$0xf0] }
 0x1ce   :  { %v1139_v20 = vpop.f32.mrf.mxu0 }
 0x1cf   :  { %v1508_v57 = vpop.f32.mrf.mxu1  ;;  %4851 = vmatmul.msk.bf16.vlgmr.msrb.gmra.mxu2 %vm1948_vm0, %v2215_v16  ;;  %v1140_v47 = vadd.f32 %v6115_v17, %v1139_v20 }
 0x1d1   :  { %1178 = vmatmul.bf16.gmra.mxu0 %v4354_v9  ;;  %v1509_v29 = vadd.f32 %v1508_v57, %v1140_v47 }
 0x1d2   :  { %1547 = vmatmul.bf16.gmra.mxu1 %v4358_v11  ;;  %v6557_v10 = vpop.f32.mrf.mxu2 }
 0x1d3   :  { %v1811_v50 = vmax.f32 %v1509_v29, 0.0 }
 0x1d6   :  { %v1141_v26 = vpop.f32.mrf.mxu0 }
 0x1d7   :  { %v1142_v13 = vadd.f32 %v6115_v17, %v1141_v26  ;;  %v1510_v37 = vpop.f32.mrf.mxu1  ;;  %v5512_v17 = vld [vmem:[%s7882_s0 + $0x1c4] sm:$0xf] }
 0x1d8   :  { %v4366_v16 = vor.u32 %v5512_v17, %v4363_v52  ;;  %v4371_v17 = vld [vmem:[%s7882_s0 + $0x1d8] sm:$0xf0] }
 0x1d9   :  { %v1511_v38 = vadd.f32 %v1510_v37, %v1142_v13 }
 0x1da   :  { %v2108_v42 = vpop.f32.mrf.mxu2 }
 0x1db   :  { %v1812_v43 = vmax.f32 %v1511_v38, 0.0  ;;  %v6568_v25 = vadd.f32 %v2108_v42, %v6464_v32  ;;  %v6582_v32 = vld [vmem:[%s7881_s2] ss:$0 sm:$0xff]  ;;  %v4369_v38 = vld [vmem:[%s7882_s0 + $0x1d0] sm:$0xf] }
 0x1dc   :  { %v5515_v42 = vld [vmem:[%s7882_s0 + $0x1d4] sm:$0xf0] }
 0x1dd   :  { %v2216_v33 = vpack.c.bf16 %v1812_v43, %v1811_v50  ;;  %v5514_v43 = vld [vmem:[%s7882_s0 + $0x1d4] sm:$0xf] }
 0x1de   :  { %v1144_v3 = vpop.f32.mrf.mxu0 }
 0x1df   :  { %v1513_v9 = vpop.f32.mrf.mxu1  ;;  %4852 = vmatmul.msk.bf16.gmra.mxu2 %vm1948_vm0, %v2216_v33  ;;  %v1145_v11 = vadd.f32 %v6582_v32, %v1144_v3  ;;  %v4370_v33 = vor.u32 %v5515_v42, %v4369_v38  ;;  %v4374_v3 = vor.u32 %v5514_v43, %v4371_v17  ;;  %v4377_v42 = vld [vmem:[%s7882_s0 + $0x1e0] sm:$0xf] }
 0x1e1   :  { %1183 = vmatmul.bf16.gmra.mxu0 %v4362_v63  ;;  %v1514_v47 = vadd.f32 %v1513_v9, %v1145_v11 }
 0x1e2   :  { %1552 = vmatmul.bf16.gmra.mxu1 %v4366_v16  ;;  %v6577_v20 = vpop.f32.mrf.mxu2 }
 0x1e3   :  { %7898 = vst [vmem:[#allocation8_spill] sm:$0xff] %v6577_v20  ;;  %v1813_v48 = vmax.f32 %v1514_v47, 0.0 }
 0x1e6   :  { %v1146_v57 = vpop.f32.mrf.mxu0 }
 0x1e7   :  { %v1147_v26 = vadd.f32 %v6582_v32, %v1146_v57  ;;  %v1515_v29 = vpop.f32.mrf.mxu1  ;;  %v5626_v57 = vld [vmem:[%s7883_s3 + $0x50] sm:$0xff] }
 0x1e9   :  { %v1516_v13 = vadd.f32 %v1515_v29, %v1147_v26 }
 0x1ea   :  { %v2113_v37 = vpop.f32.mrf.mxu2 }
 0x1eb   :  { %v1814_v40 = vmax.f32 %v1516_v13, 0.0  ;;  %v6593_v50 = vadd.f32 %v2113_v37, %v6486_v18  ;;  %v5627_v18 = vld [vmem:[%s7883_s3 + $0x58] sm:$0xff] }
 0x1ec   :  { %2337 = vmatpush.bf16.msrb.mxu3 %v5627_v18 }
 0x1ed   :  { %v2217_v52 = vpack.c.bf16 %v1814_v40, %v1813_v48  ;;  %v5517_v48 = vld [vmem:[%s7882_s0 + $0x1e4] sm:$0xf0] }
 0x1ee   :  { %v1149_v63 = vpop.f32.mrf.mxu0 }
 0x1ef   :  { %v1518_v16 = vpop.f32.mrf.mxu1  ;;  %4853 = vmatmul.msk.bf16.gmra.mxu2 %vm1948_vm0, %v2217_v52  ;;  %v1150_v11 = vadd.f32 %v6582_v32, %v1149_v63  ;;  %v5516_v52 = vld [vmem:[%s7882_s0 + $0x1e4] sm:$0xf] }
 0x1f0   :  { %2338 = vmatpush.bf16.msrb.mxu3 %v5626_v57 }
 0x1f1   :  { %1188 = vmatmul.bf16.gmra.mxu0 %v4370_v33  ;;  %v1519_v26 = vadd.f32 %v1518_v16, %v1150_v11  ;;  %v4379_v33 = vld [vmem:[%s7882_s0 + $0x1e8] sm:$0xf0] }
 0x1f2   :  { %1557 = vmatmul.bf16.gmra.mxu1 %v4374_v3  ;;  %v6605_v9 = vpop.f32.mrf.mxu2  ;;  %v4378_v3 = vor.u32 %v5517_v48, %v4377_v42  ;;  %v4382_v18 = vor.u32 %v5516_v52, %v4379_v33  ;;  %v4385_v42 = vld [vmem:[%s7882_s0 + $0x1f0] sm:$0xf]  ;;  %v5519_v48 = vld [vmem:[%s7882_s0 + $0x1f4] sm:$0xf0]  ;;  %v5518_v33 = vld [vmem:[%s7882_s0 + $0x1f4] sm:$0xf] }
 0x1f3   :  { %7899 = vst [vmem:[#allocation9_spill] sm:$0xff] %v6605_v9  ;;  %v1815_v40 = vmax.f32 %v1519_v26, 0.0 }
 0x1f6   :  { %v1151_v47 = vpop.f32.mrf.mxu0 }
 0x1f7   :  { %v1152_v29 = vadd.f32 %v6582_v32, %v1151_v47  ;;  %v1520_v13 = vpop.f32.mrf.mxu1 }
 0x1f9   :  { %v1521_v37 = vadd.f32 %v1520_v13, %v1152_v29 }
 0x1fa   :  { %v2118_v38 = vpop.f32.mrf.mxu2 }
 0x1fb   :  { %v1816_v43 = vmax.f32 %v1521_v37, 0.0  ;;  %v6619_v17 = vadd.f32 %v2118_v38, %v6508_v12 }
 0x1fd   :  { %v2218_v63 = vpack.c.bf16 %v1816_v43, %v1815_v40 }
 0x1fe   :  { %v1154_v16 = vpop.f32.mrf.mxu0 }
 0x1ff   :  { %v1523_v11 = vpop.f32.mrf.mxu1  ;;  %4854 = vmatmul.msk.bf16.gmra.mxu2 %vm1948_vm0, %v2218_v63  ;;  %v1155_v57 = vadd.f32 %v6582_v32, %v1154_v16  ;;  %v4387_v63 = vld [vmem:[%s7882_s0 + $0x1f8] sm:$0xf0]  ;;  %v4386_v16 = vor.u32 %v5519_v48, %v4385_v42  ;;  %v5521_v48 = vld [vmem:[%s7882_s0 + $0x204] sm:$0xf0] }
 0x201   :  { %1193 = vmatmul.bf16.gmra.mxu0 %v4378_v3  ;;  %v1524_v47 = vadd.f32 %v1523_v11, %v1155_v57  ;;  %v4390_v11 = vor.u32 %v5518_v33, %v4387_v63 }
 0x202   :  { %1562 = vmatmul.bf16.gmra.mxu1 %v4382_v18  ;;  %v6629_v12 = vpop.f32.mrf.mxu2 }
 0x203   :  { %7900 = vst [vmem:[#allocation10_spill] sm:$0xff] %v6629_v12  ;;  %v1817_v13 = vmax.f32 %v1524_v47, 0.0 }
 0x205   :  { %v2219_v3 = vpack.c.bf16 %v1817_v13, %v1817_v13 }
 0x206   :  { %v1156_v26 = vpop.f32.mrf.mxu0 }
 0x207   :  { %v1525_v29 = vpop.f32.mrf.mxu1  ;;  %v1157_v40 = vadd.f32 %v6582_v32, %v1156_v26 }
 0x209   :  { %v1526_v57 = vadd.f32 %v1525_v29, %v1157_v40  ;;  %v4393_v29 = vld [vmem:[%s7882_s0 + $0x200] sm:$0xf] }
 0x20a   :  { %v2123_v37 = vpop.f32.mrf.mxu2  ;;  %v2182_v38 = vpop.f32.mrf.mxu3  ;;  %v4394_v63 = vor.u32 %v5521_v48, %v4393_v29  ;;  %v5523_v29 = vld [vmem:[%s7882_s0 + $0x214] sm:$0xf0] }
 0x20b   :  { %v6639_v43 = vadd.f32 %v2123_v37, %v6530_v19  ;;  %v6642_v52 = vadd.f32 %v2182_v38, %v6548_v61  ;;  %v1818_v38 = vmax.f32 %v1526_v57, 0.0 }
 0x20e   :  { %v1159_v18 = vpop.f32.mrf.mxu0 }
 0x20f   :  { %v1160_v47 = vadd.f32 %v6582_v32, %v1159_v18  ;;  %v1528_v19 = vpop.f32.mrf.mxu1  ;;  %4855 = vmatmul.msk.bf16.gmra.mxu2 %vm1948_vm0, %v2219_v3 }
 0x211   :  { %v1529_v61 = vadd.f32 %v1528_v19, %v1160_v47  ;;  %1198 = vmatmul.bf16.gmra.mxu0 %v4386_v16 }
 0x212   :  { %1567 = vmatmul.bf16.gmra.mxu1 %v4390_v11  ;;  %v2125_v26 = vpop.f32.mrf.mxu2  ;;  %v6652_v37 = vpop.f32.mrf.mxu3 }
 0x213   :  { %v1819_v12 = vmax.f32 %v1529_v61, 0.0 }
 0x215   :  { %v2294_v39 = vpack.c.bf16 %v1819_v12, %v1818_v38  ;;  %v5520_v12 = vld [vmem:[%s7882_s0 + $0x204] sm:$0xf] }
 0x216   :  { %v1161_v41 = vpop.f32.mrf.mxu0 }
 0x217   :  { %v1530_v13 = vpop.f32.mrf.mxu1  ;;  %4868 = vmatmul.msk.bf16.vlgmr.msrb.gmra.mxu3 %vm1948_vm0, %v2294_v39  ;;  %v1162_v40 = vadd.f32 %v6582_v32, %v1161_v41  ;;  %v4395_v39 = vld [vmem:[%s7882_s0 + $0x208] sm:$0xf0] }
 0x218   :  { %v4398_v16 = vor.u32 %v5520_v12, %v4395_v39  ;;  %v5522_v12 = vld [vmem:[%s7882_s0 + $0x214] sm:$0xf]  ;;  %v4403_v39 = vld [vmem:[%s7882_s0 + $0x218] sm:$0xf0] }
 0x219   :  { %v1531_v18 = vadd.f32 %v1530_v13, %v1162_v40  ;;  %v4401_v13 = vld [vmem:[%s7882_s0 + $0x210] sm:$0xf] }
 0x21a   :  { %v2187_v42 = vpop.f32.mrf.mxu3 }
 0x21b   :  { %v6663_v33 = vadd.f32 %v2187_v42, %v6568_v25  ;;  %v1820_v25 = vmax.f32 %v1531_v18, 0.0 }
 0x21e   :  { %v1164_v3 = vpop.f32.mrf.mxu0 }
 0x21f   :  { %v1165_v11 = vadd.f32 %v6582_v32, %v1164_v3  ;;  %v1533_v57 = vpop.f32.mrf.mxu1 }
 0x221   :  { %v1534_v47 = vadd.f32 %v1533_v57, %v1165_v11  ;;  %1203 = vmatmul.bf16.gmra.mxu0 %v4394_v63  ;;  %v4402_v63 = vor.u32 %v5523_v29, %v4401_v13  ;;  %v5629_v13 = vld [vmem:[%s7883_s3 + $0x68] sm:$0xff]  ;;  %v4409_v29 = vld [vmem:[%s7882_s0 + $0x220] sm:$0xf] }
 0x222   :  { %1572 = vmatmul.bf16.gmra.mxu1 %v4398_v16  ;;  %v6672_v41 = vpop.f32.mrf.mxu3  ;;  %v4406_v16 = vor.u32 %v5522_v12, %v4403_v39  ;;  %2416 = vmatpush.bf16.msra.mxu2 %v5629_v13 }
 0x223   :  { %7901 = vst [vmem:[#allocation11_spill] sm:$0xff] %v6672_v41  ;;  %v1821_v19 = vmax.f32 %v1534_v47, 0.0 }
 0x225   :  { %v2295_v61 = vpack.c.bf16 %v1821_v19, %v1820_v25 }
 0x226   :  { %v1166_v26 = vpop.f32.mrf.mxu0 }
 0x227   :  { %v1535_v38 = vpop.f32.mrf.mxu1  ;;  %4869 = vmatmul.msk.bf16.gmra.mxu3 %vm1948_vm0, %v2295_v61  ;;  %v1167_v48 = vadd.f32 %v6582_v32, %v1166_v26 }
 0x229   :  { %v1536_v18 = vadd.f32 %v1535_v38, %v1167_v48  ;;  %v5525_v48 = vld [vmem:[%s7882_s0 + $0x224] sm:$0xf0] }
 0x22a   :  { %v2192_v42 = vpop.f32.mrf.mxu3 }
 0x22b   :  { %v6683_v40 = vadd.f32 %v2192_v42, %v6593_v50  ;;  %v1822_v25 = vmax.f32 %v1536_v18, 0.0  ;;  %v4410_v18 = vor.u32 %v5525_v48, %v4409_v29 }
 0x22e   :  { %v1169_v3 = vpop.f32.mrf.mxu0 }
 0x22f   :  { %v1170_v11 = vadd.f32 %v6582_v32, %v1169_v3  ;;  %v1538_v57 = vpop.f32.mrf.mxu1  ;;  %v4411_v3 = vld [vmem:[%s7882_s0 + $0x228] sm:$0xf0] }
 0x231   :  { %v1539_v47 = vadd.f32 %v1538_v57, %v1170_v11  ;;  %1208 = vmatmul.bf16.gmra.mxu0 %v4402_v63  ;;  %v5524_v63 = vld [vmem:[%s7882_s0 + $0x224] sm:$0xf] }
 0x232   :  { %1577 = vmatmul.bf16.gmra.mxu1 %v4406_v16  ;;  %v6692_v50 = vpop.f32.mrf.mxu3  ;;  %v5628_v16 = vld [vmem:[%s7883_s3 + $0x60] sm:$0xff]  ;;  %v4414_v57 = vor.u32 %v5524_v63, %v4411_v3  ;;  %v5526_v3 = vld [vmem:[%s7882_s0 + $0x234] sm:$0xf] }
 0x233   :  { %7902 = vst [vmem:[#allocation12_spill] sm:$0xff] %v6692_v50  ;;  %v1823_v19 = vmax.f32 %v1539_v47, 0.0  ;;  %2417 = vmatpush.bf16.msra.mxu2 %v5628_v16 }
 0x235   :  { %v2296_v61 = vpack.c.bf16 %v1823_v19, %v1822_v25 }
 0x236   :  { %v1171_v26 = vpop.f32.mrf.mxu0 }
 0x237   :  { %v1540_v42 = vpop.f32.mrf.mxu1  ;;  %4870 = vmatmul.msk.bf16.gmra.mxu3 %vm1948_vm0, %v2296_v61  ;;  %v1172_v12 = vadd.f32 %v6582_v32, %v1171_v26 }
 0x239   :  { %v1541_v47 = vadd.f32 %v1540_v42, %v1172_v12  ;;  %v4417_v42 = vld [vmem:[%s7882_s0 + $0x230] sm:$0xf]  ;;  %v5527_v12 = vld [vmem:[%s7882_s0 + $0x234] sm:$0xf0] }
 0x23a   :  { %v2197_v38 = vpop.f32.mrf.mxu3 }
 0x23b   :  { %v6706_v39 = vadd.f32 %v2197_v38, %v6619_v17  ;;  %v1824_v26 = vmax.f32 %v1541_v47, 0.0 }
 0x23e   :  { %v1174_v11 = vpop.f32.mrf.mxu0 }
 0x23f   :  { %v1175_v17 = vadd.f32 %v6582_v32, %v1174_v11  ;;  %v1543_v25 = vpop.f32.mrf.mxu1 }
 0x241   :  { %v1544_v19 = vadd.f32 %v1543_v25, %v1175_v17  ;;  %1213 = vmatmul.bf16.gmra.mxu0 %v4410_v18  ;;  %v4418_v18 = vor.u32 %v5527_v12, %v4417_v42  ;;  %v4425_v12 = vld [vmem:[%s7882_s0 + $0x240] sm:$0xf] }
 0x242   :  { %1582 = vmatmul.bf16.gmra.mxu1 %v4414_v57  ;;  %v6718_v61 = vpop.f32.mrf.mxu3 }
 0x243   :  { %7903 = vst [vmem:[#allocation13_spill] sm:$0xff] %v6718_v61  ;;  %v1825_v13 = vmax.f32 %v1544_v19, 0.0 }
 0x245   :  { %v2297_v38 = vpack.c.bf16 %v1825_v13, %v1824_v26 }
 0x246   :  { %v1176_v50 = vpop.f32.mrf.mxu0 }
 0x247   :  { %v1545_v9 = vpop.f32.mrf.mxu1  ;;  %4871 = vmatmul.msk.bf16.gmra.mxu3 %vm1948_vm0, %v2297_v38  ;;  %v1177_v29 = vadd.f32 %v6582_v32, %v1176_v50  ;;  %v4419_v50 = vld [vmem:[%s7882_s0 + $0x238] sm:$0xf0] }
 0x248   :  { %v4422_v57 = vor.u32 %v5526_v3, %v4419_v50 }
 0x249   :  { %v1546_v16 = vadd.f32 %v1545_v9, %v1177_v29 }
 0x24a   :  { %v2202_v48 = vpop.f32.mrf.mxu3 }
 0x24b   :  { %v6729_v63 = vadd.f32 %v2202_v48, %v6639_v43  ;;  %v1826_v17 = vmax.f32 %v1546_v16, 0.0  ;;  %v5528_v16 = vld [vmem:[%s7882_s0 + $0x244] sm:$0xf] }
 0x24d   :  { %v2298_v13 = vpack.c.bf16 %v1826_v17, %v1826_v17 }
 0x24e   :  { %v1179_v11 = vpop.f32.mrf.mxu0 }
 0x24f   :  { %v1548_v47 = vpop.f32.mrf.mxu1  ;;  %v1180_v43 = vadd.f32 %v6582_v32, %v1179_v11 }
 0x251   :  { %1218 = vmatmul.bf16.gmra.mxu0 %v4418_v18  ;;  %v1549_v48 = vadd.f32 %v1548_v47, %v1180_v43 }
 0x252   :  { %1587 = vmatmul.bf16.gmra.mxu1 %v4422_v57  ;;  %v2204_v25 = vpop.f32.mrf.mxu3  ;;  %v2261_v19 = vpop.f32.mrf.mxu2 }
 0x253   :  { %v6739_v26 = vadd.f32 %v2261_v19, %v6642_v52  ;;  %v5529_v52 = vld [vmem:[%s7882_s0 + $0x244] sm:$0xf0]  ;;  %v1827_v3 = vmax.f32 %v1549_v48, 0.0 }
 0x254   :  { %v4426_v11 = vor.u32 %v5529_v52, %v4425_v12  ;;  %v4433_v52 = vld [vmem:[%s7882_s0 + $0x250] sm:$0xf] }
 0x256   :  { %v1181_v38 = vpop.f32.mrf.mxu0 }
 0x257   :  { %v1182_v61 = vadd.f32 %v6582_v32, %v1181_v38  ;;  %v1550_v9 = vpop.f32.mrf.mxu1  ;;  %4872 = vmatmul.msk.bf16.gmra.mxu3 %vm1948_vm0, %v2298_v13 }
 0x259   :  { %v1551_v29 = vadd.f32 %v1550_v9, %v1182_v61  ;;  %v4427_v61 = vld [vmem:[%s7882_s0 + $0x248] sm:$0xf0] }
 0x25a   :  { %v6743_v42 = vpop.f32.mrf.mxu2  ;;  %v4430_v47 = vor.u32 %v5528_v16, %v4427_v61  ;;  %v4435_v61 = vld [vmem:[%s7882_s0 + $0x258] sm:$0xf0] }
 0x25b   :  { %v1828_v50 = vmax.f32 %v1551_v29, 0.0 }
 0x25d   :  { %v2373_v18 = vpack.c.bf16 %v1828_v50, %v1827_v3  ;;  %v5531_v3 = vld [vmem:[%s7882_s0 + $0x254] sm:$0xf0] }
 0x25e   :  { %v1184_v57 = vpop.f32.mrf.mxu0 }
 0x25f   :  { %v1553_v17 = vpop.f32.mrf.mxu1  ;;  %4885 = vmatmul.msk.bf16.vlgmr.msra.gmra.mxu2 %vm1948_vm0, %v2373_v18  ;;  %v1185_v19 = vadd.f32 %v6582_v32, %v1184_v57 }
 0x261   :  { %1223 = vmatmul.bf16.gmra.mxu0 %v4426_v11  ;;  %v1554_v38 = vadd.f32 %v1553_v17, %v1185_v19  ;;  %v4434_v11 = vor.u32 %v5531_v3, %v4433_v52  ;;  %v4441_v3 = vld [vmem:[%s7882_s0 + $0x260] sm:$0xf] }
 0x262   :  { %1592 = vmatmul.bf16.gmra.mxu1 %v4430_v47  ;;  %v2266_v25 = vpop.f32.mrf.mxu2 }
 0x263   :  { %v6760_v43 = vadd.f32 %v2266_v25, %v6663_v33  ;;  %v1829_v50 = vmax.f32 %v1554_v38, 0.0  ;;  %v5530_v33 = vld [vmem:[%s7882_s0 + $0x254] sm:$0xf] }
 0x264   :  { %v4438_v47 = vor.u32 %v5530_v33, %v4435_v61 }
 0x266   :  { %v1186_v13 = vpop.f32.mrf.mxu0 }
 0x267   :  { %v1187_v48 = vadd.f32 %v6582_v32, %v1186_v13  ;;  %v1555_v9 = vpop.f32.mrf.mxu1 }
 0x269   :  { %v1556_v29 = vadd.f32 %v1555_v9, %v1187_v48 }
 0x26a   :  { %v6763_v12 = vpop.f32.mrf.mxu2 }
 0x26b   :  { %7904 = vst [vmem:[#allocation14_spill] sm:$0xff] %v6763_v12  ;;  %v1830_v16 = vmax.f32 %v1556_v29, 0.0 }
 0x26d   :  { %v2374_v18 = vpack.c.bf16 %v1830_v16, %v1829_v50  ;;  %v5533_v16 = vld [vmem:[%s7882_s0 + $0x264] sm:$0xf0] }
 0x26e   :  { %v1189_v57 = vpop.f32.mrf.mxu0 }
 0x26f   :  { %v1558_v17 = vpop.f32.mrf.mxu1  ;;  %4886 = vmatmul.msk.bf16.gmra.mxu2 %vm1948_vm0, %v2374_v18  ;;  %v1190_v19 = vadd.f32 %v6582_v32, %v1189_v57  ;;  %v4443_v18 = vld [vmem:[%s7882_s0 + $0x268] sm:$0xf0]  ;;  %v4442_v57 = vor.u32 %v5533_v16, %v4441_v3 }
 0x271   :  { %1228 = vmatmul.bf16.gmra.mxu0 %v4434_v11  ;;  %v1559_v48 = vadd.f32 %v1558_v17, %v1190_v19  ;;  %v5631_v19 = vld [vmem:[%s7883_s3 + $0x78] sm:$0xff] }
 0x272   :  { %1597 = vmatmul.bf16.gmra.mxu1 %v4438_v47  ;;  %v2271_v25 = vpop.f32.mrf.mxu2  ;;  %2495 = vmatpush.bf16.msra.mxu3 %v5631_v19 }
 0x273   :  { %v6780_v13 = vadd.f32 %v2271_v25, %v6683_v40  ;;  %v1831_v33 = vmax.f32 %v1559_v48, 0.0  ;;  %v5532_v40 = vld [vmem:[%s7882_s0 + $0x264] sm:$0xf] }
 0x274   :  { %v4446_v17 = vor.u32 %v5532_v40, %v4443_v18  ;;  %v4449_v18 = vld [vmem:[%s7882_s0 + $0x270] sm:$0xf] }
 0x276   :  { %v1191_v38 = vpop.f32.mrf.mxu0 }
 0x277   :  { %v1192_v9 = vadd.f32 %v6582_v32, %v1191_v38  ;;  %v1560_v29 = vpop.f32.mrf.mxu1 }
 0x279   :  { %v1561_v50 = vadd.f32 %v1560_v29, %v1192_v9  ;;  %v5630_v29 = vld [vmem:[%s7883_s3 + $0x70] sm:$0xff] }
 0x27a   :  { %v6783_v52 = vpop.f32.mrf.mxu2  ;;  %2496 = vmatpush.bf16.msra.mxu3 %v5630_v29 }
 0x27b   :  { %7905 = vst [vmem:[#allocation15_spill] sm:$0xff] %v6783_v52  ;;  %v1832_v61 = vmax.f32 %v1561_v50, 0.0 }
 0x27d   :  { %v2375_v11 = vpack.c.bf16 %v1832_v61, %v1831_v33 }
 0x27e   :  { %v1194_v47 = vpop.f32.mrf.mxu0 }
 0x27f   :  { %v1563_v25 = vpop.f32.mrf.mxu1  ;;  %4887 = vmatmul.msk.bf16.gmra.mxu2 %vm1948_vm0, %v2375_v11  ;;  %v1195_v48 = vadd.f32 %v6582_v32, %v1194_v47  ;;  %v5534_v47 = vld [vmem:[%s7882_s0 + $0x274] sm:$0xf] }
 0x281   :  { %1233 = vmatmul.bf16.gmra.mxu0 %v4442_v57  ;;  %v1564_v3 = vadd.f32 %v1563_v25, %v1195_v48 }
 0x282   :  { %1602 = vmatmul.bf16.gmra.mxu1 %v4446_v17  ;;  %v2276_v38 = vpop.f32.mrf.mxu2  ;;  %v4451_v17 = vld [vmem:[%s7882_s0 + $0x278] sm:$0xf0] }
 0x283   :  { %v6803_v9 = vadd.f32 %v2276_v38, %v6706_v39  ;;  %v5535_v39 = vld [vmem:[%s7882_s0 + $0x274] sm:$0xf0]  ;;  %v1833_v11 = vmax.f32 %v1564_v3, 0.0  ;;  %v4454_v48 = vor.u32 %v5534_v47, %v4451_v17 }
 0x284   :  { %v4450_v19 = vor.u32 %v5535_v39, %v4449_v18  ;;  %v4457_v18 = vld [vmem:[%s7882_s0 + $0x280] sm:$0xf]  ;;  %v5537_v39 = vld [vmem:[%s7882_s0 + $0x284] sm:$0xf0] }
 0x286   :  { %v1196_v50 = vpop.f32.mrf.mxu0 }
 0x287   :  { %v1197_v16 = vadd.f32 %v6582_v32, %v1196_v50  ;;  %v1565_v33 = vpop.f32.mrf.mxu1 }
 0x289   :  { %v1566_v61 = vadd.f32 %v1565_v33, %v1197_v16 }
 0x28a   :  { %v6809_v40 = vpop.f32.mrf.mxu2 }
 0x28b   :  { %7906 = vst [vmem:[#allocation16_spill] sm:$0xff] %v6809_v40  ;;  %v1834_v57 = vmax.f32 %v1566_v61, 0.0 }
 0x28d   :  { %v2376_v25 = vpack.c.bf16 %v1834_v57, %v1833_v11 }
 0x28e   :  { %v1199_v38 = vpop.f32.mrf.mxu0 }
 0x28f   :  { %v1568_v29 = vpop.f32.mrf.mxu1  ;;  %4888 = vmatmul.msk.bf16.gmra.mxu2 %vm1948_vm0, %v2376_v25  ;;  %v1200_v50 = vadd.f32 %v6582_v32, %v1199_v38  ;;  %v4458_v25 = vor.u32 %v5537_v39, %v4457_v18  ;;  %v5539_v18 = vld [vmem:[%s7882_s0 + $0x294] sm:$0xf0] }
 0x291   :  { %1238 = vmatmul.bf16.gmra.mxu0 %v4450_v19  ;;  %v1569_v33 = vadd.f32 %v1568_v29, %v1200_v50 }
 0x292   :  { %1607 = vmatmul.bf16.gmra.mxu1 %v4454_v48  ;;  %v2281_v3 = vpop.f32.mrf.mxu2 }
 0x293   :  { %v6826_v16 = vadd.f32 %v2281_v3, %v6729_v63  ;;  %v1835_v52 = vmax.f32 %v1569_v33, 0.0  ;;  %v5536_v63 = vld [vmem:[%s7882_s0 + $0x284] sm:$0xf] }
 0x295   :  { %v2377_v17 = vpack.c.bf16 %v1835_v52, %v1835_v52 }
 0x296   :  { %v1201_v61 = vpop.f32.mrf.mxu0 }
 0x297   :  { %v1570_v40 = vpop.f32.mrf.mxu1  ;;  %v1202_v57 = vadd.f32 %v6582_v32, %v1201_v61 }
 0x299   :  { %v1571_v48 = vadd.f32 %v1570_v40, %v1202_v57  ;;  %v4465_v40 = vld [vmem:[%s7882_s0 + $0x290] sm:$0xf] }
 0x29a   :  { %v2283_v31 = vpop.f32.mrf.mxu2  ;;  %v2340_v11 = vpop.f32.mrf.mxu3 }
 0x29b   :  { %v6836_v47 = vadd.f32 %v2340_v11, %v6739_v26  ;;  %v4459_v31 = vld [vmem:[%s7882_s0 + $0x288] sm:$0xf0]  ;;  %v1836_v33 = vmax.f32 %v1571_v48, 0.0 }
 0x29c   :  { %v4462_v38 = vor.u32 %v5536_v63, %v4459_v31  ;;  %v5538_v63 = vld [vmem:[%s7882_s0 + $0x294] sm:$0xf]  ;;  %v4467_v31 = vld [vmem:[%s7882_s0 + $0x298] sm:$0xf0] }
 0x29e   :  { %v1204_v19 = vpop.f32.mrf.mxu0 }
 0x29f   :  { %v1205_v29 = vadd.f32 %v6582_v32, %v1204_v19  ;;  %v1573_v50 = vpop.f32.mrf.mxu1  ;;  %4889 = vmatmul.msk.bf16.gmra.mxu2 %vm1948_vm0, %v2377_v17  ;;  %v4466_v17 = vor.u32 %v5539_v18, %v4465_v40  ;;  %v4470_v19 = vor.u32 %v5538_v63, %v4467_v31  ;;  %v5541_v40 = vld [vmem:[%s7882_s0 + $0x2a4] sm:$0xf0]  ;;  %v5540_v63 = vld [vmem:[%s7882_s0 + $0x2a4] sm:$0xf]  ;;  %v4475_v31 = vld [vmem:[%s7882_s0 + $0x2a8] sm:$0xf0] }
 0x2a1   :  { %v1574_v26 = vadd.f32 %v1573_v50, %v1205_v29  ;;  %1243 = vmatmul.bf16.gmra.mxu0 %v4458_v25 }
 0x2a2   :  { %1612 = vmatmul.bf16.gmra.mxu1 %v4462_v38  ;;  %v6846_v3 = vpop.f32.mrf.mxu3 }
 0x2a3   :  { %v1837_v61 = vmax.f32 %v1574_v26, 0.0 }
 0x2a5   :  { %v2452_v11 = vpack.c.bf16 %v1837_v61, %v1836_v33 }
 0x2a6   :  { %v1206_v21 = vpop.f32.mrf.mxu0 }
 0x2a7   :  { %v1575_v12 = vpop.f32.mrf.mxu1  ;;  %4902 = vmatmul.msk.bf16.vlgmr.msra.gmra.mxu3 %vm1948_vm0, %v2452_v11  ;;  %v1207_v39 = vadd.f32 %v6582_v32, %v1206_v21 }
 0x2a9   :  { %v1576_v38 = vadd.f32 %v1575_v12, %v1207_v39  ;;  %v4473_v12 = vld [vmem:[%s7882_s0 + $0x2a0] sm:$0xf] }
 0x2aa   :  { %v2345_v52 = vpop.f32.mrf.mxu3 }
 0x2ab   :  { %v6857_v57 = vadd.f32 %v2345_v52, %v6760_v43  ;;  %v1838_v43 = vmax.f32 %v1576_v38, 0.0 }
 0x2ae   :  { %v1209_v25 = vpop.f32.mrf.mxu0 }
 0x2af   :  { %v1210_v48 = vadd.f32 %v6582_v32, %v1209_v25  ;;  %v1578_v29 = vpop.f32.mrf.mxu1 }
 0x2b1   :  { %v1579_v50 = vadd.f32 %v1578_v29, %v1210_v48  ;;  %1248 = vmatmul.bf16.gmra.mxu0 %v4466_v17  ;;  %v4474_v17 = vor.u32 %v5541_v40, %v4473_v12  ;;  %v5633_v12 = vld [vmem:[%s7883_s3 + $0x88] sm:$0xff]  ;;  %v4481_v40 = vld [vmem:[%s7882_s0 + $0x2b0] sm:$0xf] }
 0x2b2   :  { %1617 = vmatmul.bf16.gmra.mxu1 %v4470_v19  ;;  %v6866_v21 = vpop.f32.mrf.mxu3  ;;  %v4478_v19 = vor.u32 %v5540_v63, %v4475_v31  ;;  %2574 = vmatpush.bf16.msrb.mxu2 %v5633_v12 }
 0x2b3   :  { %7907 = vst [vmem:[#allocation17_spill] sm:$0xff] %v6866_v21  ;;  %v1839_v26 = vmax.f32 %v1579_v50, 0.0 }
 0x2b5   :  { %v2453_v33 = vpack.c.bf16 %v1839_v26, %v1838_v43 }
 0x2b6   :  { %v1211_v61 = vpop.f32.mrf.mxu0 }
 0x2b7   :  { %v1580_v11 = vpop.f32.mrf.mxu1  ;;  %4903 = vmatmul.msk.bf16.gmra.mxu3 %vm1948_vm0, %v2453_v33  ;;  %v1212_v18 = vadd.f32 %v6582_v32, %v1211_v61 }
 0x2b9   :  { %v1581_v38 = vadd.f32 %v1580_v11, %v1212_v18  ;;  %v5543_v18 = vld [vmem:[%s7882_s0 + $0x2b4] sm:$0xf0] }
 0x2ba   :  { %v2350_v52 = vpop.f32.mrf.mxu3 }
 0x2bb   :  { %v6877_v39 = vadd.f32 %v2350_v52, %v6780_v13  ;;  %v1840_v43 = vmax.f32 %v1581_v38, 0.0  ;;  %v4482_v38 = vor.u32 %v5543_v18, %v4481_v40 }
 0x2be   :  { %v1214_v25 = vpop.f32.mrf.mxu0 }
 0x2bf   :  { %v1215_v48 = vadd.f32 %v6582_v32, %v1214_v25  ;;  %v1583_v29 = vpop.f32.mrf.mxu1  ;;  %v4483_v25 = vld [vmem:[%s7882_s0 + $0x2b8] sm:$0xf0] }
 0x2c1   :  { %v1584_v50 = vadd.f32 %v1583_v29, %v1215_v48  ;;  %1253 = vmatmul.bf16.gmra.mxu0 %v4474_v17  ;;  %v5542_v17 = vld [vmem:[%s7882_s0 + $0x2b4] sm:$0xf] }
 0x2c2   :  { %1622 = vmatmul.bf16.gmra.mxu1 %v4478_v19  ;;  %v6886_v13 = vpop.f32.mrf.mxu3  ;;  %v5632_v19 = vld [vmem:[%s7883_s3 + $0x80] sm:$0xff]  ;;  %v4486_v29 = vor.u32 %v5542_v17, %v4483_v25 }
 0x2c3   :  { %7908 = vst [vmem:[#allocation18_spill] sm:$0xff] %v6886_v13  ;;  %v1841_v26 = vmax.f32 %v1584_v50, 0.0  ;;  %2575 = vmatpush.bf16.msrb.mxu2 %v5632_v19  ;;  %v5544_v25 = vld [vmem:[%s7882_s0 + $0x2c4] sm:$0xf] }
 0x2c5   :  { %v2454_v33 = vpack.c.bf16 %v1841_v26, %v1840_v43 }
 0x2c6   :  { %v1216_v61 = vpop.f32.mrf.mxu0 }
 0x2c7   :  { %v1585_v52 = vpop.f32.mrf.mxu1  ;;  %4904 = vmatmul.msk.bf16.gmra.mxu3 %vm1948_vm0, %v2454_v33  ;;  %v1217_v63 = vadd.f32 %v6582_v32, %v1216_v61 }
 0x2c9   :  { %v1586_v50 = vadd.f32 %v1585_v52, %v1217_v63  ;;  %v4489_v52 = vld [vmem:[%s7882_s0 + $0x2c0] sm:$0xf]  ;;  %v5545_v63 = vld [vmem:[%s7882_s0 + $0x2c4] sm:$0xf0] }
 0x2ca   :  { %v2355_v11 = vpop.f32.mrf.mxu3 }
 0x2cb   :  { %v6900_v31 = vadd.f32 %v2355_v11, %v6803_v9  ;;  %v1842_v61 = vmax.f32 %v1586_v50, 0.0 }
 0x2ce   :  { %v1219_v48 = vpop.f32.mrf.mxu0 }
 0x2cf   :  { %v1220_v9 = vadd.f32 %v6582_v32, %v1219_v48  ;;  %v1588_v43 = vpop.f32.mrf.mxu1 }
 0x2d1   :  { %v1589_v26 = vadd.f32 %v1588_v43, %v1220_v9  ;;  %1258 = vmatmul.bf16.gmra.mxu0 %v4482_v38  ;;  %v4490_v38 = vor.u32 %v5545_v63, %v4489_v52  ;;  %v4497_v63 = vld [vmem:[%s7882_s0 + $0x2d0] sm:$0xf] }
 0x2d2   :  { %1627 = vmatmul.bf16.gmra.mxu1 %v4486_v29  ;;  %v6912_v33 = vpop.f32.mrf.mxu3 }
 0x2d3   :  { %7909 = vst [vmem:[#allocation19_spill] sm:$0xff] %v6912_v33  ;;  %v1843_v12 = vmax.f32 %v1589_v26, 0.0 }
 0x2d5   :  { %v2455_v11 = vpack.c.bf16 %v1843_v12, %v1842_v61 }
 0x2d6   :  { %v1221_v13 = vpop.f32.mrf.mxu0 }
 0x2d7   :  { %v1590_v21 = vpop.f32.mrf.mxu1  ;;  %4905 = vmatmul.msk.bf16.gmra.mxu3 %vm1948_vm0, %v2455_v11  ;;  %v1222_v40 = vadd.f32 %v6582_v32, %v1221_v13  ;;  %v4491_v13 = vld [vmem:[%s7882_s0 + $0x2c8] sm:$0xf0] }
 0x2d8   :  { %v4494_v29 = vor.u32 %v5544_v25, %v4491_v13 }
 0x2d9   :  { %v1591_v19 = vadd.f32 %v1590_v21, %v1222_v40 }
 0x2da   :  { %v2360_v18 = vpop.f32.mrf.mxu3 }
 0x2db   :  { %v6923_v17 = vadd.f32 %v2360_v18, %v6826_v16  ;;  %v1844_v9 = vmax.f32 %v1591_v19, 0.0  ;;  %v5546_v19 = vld [vmem:[%s7882_s0 + $0x2d4] sm:$0xf] }
 0x2dd   :  { %v2456_v12 = vpack.c.bf16 %v1844_v9, %v1844_v9 }
 0x2de   :  { %v1224_v48 = vpop.f32.mrf.mxu0 }
 0x2df   :  { %v1593_v50 = vpop.f32.mrf.mxu1  ;;  %v1225_v16 = vadd.f32 %v6582_v32, %v1224_v48 }
 0x2e1   :  { %1263 = vmatmul.bf16.gmra.mxu0 %v4490_v38  ;;  %v1594_v18 = vadd.f32 %v1593_v50, %v1225_v16 }
 0x2e2   :  { %1632 = vmatmul.bf16.gmra.mxu1 %v4494_v29  ;;  %v2362_v43 = vpop.f32.mrf.mxu3  ;;  %v2419_v26 = vpop.f32.mrf.mxu2 }
 0x2e3   :  { %v6933_v61 = vadd.f32 %v2419_v26, %v6836_v47  ;;  %v5547_v47 = vld [vmem:[%s7882_s0 + $0x2d4] sm:$0xf0]  ;;  %v1845_v25 = vmax.f32 %v1594_v18, 0.0 }
 0x2e4   :  { %v4498_v48 = vor.u32 %v5547_v47, %v4497_v63  ;;  %v4505_v47 = vld [vmem:[%s7882_s0 + $0x2e0] sm:$0xf] }
 0x2e6   :  { %v1226_v11 = vpop.f32.mrf.mxu0 }
 0x2e7   :  { %v1227_v33 = vadd.f32 %v6582_v32, %v1226_v11  ;;  %v1595_v21 = vpop.f32.mrf.mxu1  ;;  %4906 = vmatmul.msk.bf16.gmra.mxu3 %vm1948_vm0, %v2456_v12 }
 0x2e9   :  { %v1596_v40 = vadd.f32 %v1595_v21, %v1227_v33  ;;  %v4499_v33 = vld [vmem:[%s7882_s0 + $0x2d8] sm:$0xf0] }
 0x2ea   :  { %v6937_v52 = vpop.f32.mrf.mxu2  ;;  %v4502_v50 = vor.u32 %v5546_v19, %v4499_v33  ;;  %v4507_v33 = vld [vmem:[%s7882_s0 + $0x2e8] sm:$0xf0] }
 0x2eb   :  { %v1846_v13 = vmax.f32 %v1596_v40, 0.0 }
 0x2ed   :  { %v2531_v38 = vpack.c.bf16 %v1846_v13, %v1845_v25  ;;  %v5549_v25 = vld [vmem:[%s7882_s0 + $0x2e4] sm:$0xf0] }
 0x2ee   :  { %v1229_v29 = vpop.f32.mrf.mxu0 }
 0x2ef   :  { %v1598_v9 = vpop.f32.mrf.mxu1  ;;  %4919 = vmatmul.msk.bf16.vlgmr.msrb.gmra.mxu2 %vm1948_vm0, %v2531_v38  ;;  %v1230_v26 = vadd.f32 %v6582_v32, %v1229_v29 }
 0x2f1   :  { %1268 = vmatmul.bf16.gmra.mxu0 %v4498_v48  ;;  %v1599_v11 = vadd.f32 %v1598_v9, %v1230_v26  ;;  %v4506_v48 = vor.u32 %v5549_v25, %v4505_v47  ;;  %v4513_v25 = vld [vmem:[%s7882_s0 + $0x2f0] sm:$0xf] }
 0x2f2   :  { %1637 = vmatmul.bf16.gmra.mxu1 %v4502_v50  ;;  %v2424_v43 = vpop.f32.mrf.mxu2 }
 0x2f3   :  { %v6954_v16 = vadd.f32 %v2424_v43, %v6857_v57  ;;  %v1847_v13 = vmax.f32 %v1599_v11, 0.0  ;;  %v5548_v57 = vld [vmem:[%s7882_s0 + $0x2e4] sm:$0xf] }
 0x2f4   :  { %v4510_v50 = vor.u32 %v5548_v57, %v4507_v33 }
 0x2f6   :  { %v1231_v12 = vpop.f32.mrf.mxu0 }
 0x2f7   :  { %v1232_v18 = vadd.f32 %v6582_v32, %v1231_v12  ;;  %v1600_v21 = vpop.f32.mrf.mxu1 }
 0x2f9   :  { %v1601_v40 = vadd.f32 %v1600_v21, %v1232_v18 }
 0x2fa   :  { %v6957_v63 = vpop.f32.mrf.mxu2 }
 0x2fb   :  { %7910 = vst [vmem:[#allocation20_spill] sm:$0xff] %v6957_v63  ;;  %v1848_v19 = vmax.f32 %v1601_v40, 0.0 }
 0x2fd   :  { %v2532_v38 = vpack.c.bf16 %v1848_v19, %v1847_v13  ;;  %v5551_v19 = vld [vmem:[%s7882_s0 + $0x2f4] sm:$0xf0] }
 0x2fe   :  { %v1234_v29 = vpop.f32.mrf.mxu0 }
 0x2ff   :  { %v1603_v9 = vpop.f32.mrf.mxu1  ;;  %4920 = vmatmul.msk.bf16.gmra.mxu2 %vm1948_vm0, %v2532_v38  ;;  %v1235_v26 = vadd.f32 %v6582_v32, %v1234_v29  ;;  %v4515_v38 = vld [vmem:[%s7882_s0 + $0x2f8] sm:$0xf0]  ;;  %v4514_v29 = vor.u32 %v5551_v19, %v4513_v25 }
 0x301   :  { %1273 = vmatmul.bf16.gmra.mxu0 %v4506_v48  ;;  %v1604_v18 = vadd.f32 %v1603_v9, %v1235_v26  ;;  %v5635_v26 = vld [vmem:[%s7883_s3 + $0x98] sm:$0xff] }
 0x302   :  { %1642 = vmatmul.bf16.gmra.mxu1 %v4510_v50  ;;  %v2429_v43 = vpop.f32.mrf.mxu2  ;;  %2653 = vmatpush.bf16.msrb.mxu3 %v5635_v26 }
 0x303   :  { %v6974_v12 = vadd.f32 %v2429_v43, %v6877_v39  ;;  %v1849_v57 = vmax.f32 %v1604_v18, 0.0  ;;  %v5550_v39 = vld [vmem:[%s7882_s0 + $0x2f4] sm:$0xf] }
 0x304   :  { %v4518_v9 = vor.u32 %v5550_v39, %v4515_v38  ;;  %v4521_v38 = vld [vmem:[%s7882_s0 + $0x300] sm:$0xf] }
 0x306   :  { %v1236_v11 = vpop.f32.mrf.mxu0 }
 0x307   :  { %v1237_v21 = vadd.f32 %v6582_v32, %v1236_v11  ;;  %v1605_v40 = vpop.f32.mrf.mxu1 }
 0x309   :  { %v1606_v13 = vadd.f32 %v1605_v40, %v1237_v21  ;;  %v5634_v40 = vld [vmem:[%s7883_s3 + $0x90] sm:$0xff] }
 0x30a   :  { %v6977_v47 = vpop.f32.mrf.mxu2  ;;  %2654 = vmatpush.bf16.msrb.mxu3 %v5634_v40 }
 0x30b   :  { %7911 = vst [vmem:[#allocation21_spill] sm:$0xff] %v6977_v47  ;;  %v1850_v33 = vmax.f32 %v1606_v13, 0.0 }
 0x30d   :  { %v2533_v48 = vpack.c.bf16 %v1850_v33, %v1849_v57 }
 0x30e   :  { %v1239_v50 = vpop.f32.mrf.mxu0 }
 0x30f   :  { %v1608_v43 = vpop.f32.mrf.mxu1  ;;  %4921 = vmatmul.msk.bf16.gmra.mxu2 %vm1948_vm0, %v2533_v48  ;;  %v1240_v18 = vadd.f32 %v6582_v32, %v1239_v50  ;;  %v5552_v50 = vld [vmem:[%s7882_s0 + $0x304] sm:$0xf] }
 0x311   :  { %1278 = vmatmul.bf16.gmra.mxu0 %v4514_v29  ;;  %v1609_v25 = vadd.f32 %v1608_v43, %v1240_v18 }
 0x312   :  { %1647 = vmatmul.bf16.gmra.mxu1 %v4518_v9  ;;  %v2434_v11 = vpop.f32.mrf.mxu2  ;;  %v4523_v9 = vld [vmem:[%s7882_s0 + $0x308] sm:$0xf0] }
 0x313   :  { %v6997_v21 = vadd.f32 %v2434_v11, %v6900_v31  ;;  %v5553_v31 = vld [vmem:[%s7882_s0 + $0x304] sm:$0xf0]  ;;  %v1851_v48 = vmax.f32 %v1609_v25, 0.0  ;;  %v4526_v18 = vor.u32 %v5552_v50, %v4523_v9 }
 0x314   :  { %v4522_v26 = vor.u32 %v5553_v31, %v4521_v38  ;;  %v4529_v38 = vld [vmem:[%s7882_s0 + $0x310] sm:$0xf]  ;;  %v5555_v31 = vld [vmem:[%s7882_s0 + $0x314] sm:$0xf0] }
 0x316   :  { %v1241_v13 = vpop.f32.mrf.mxu0 }
 0x317   :  { %v1242_v19 = vadd.f32 %v6582_v32, %v1241_v13  ;;  %v1610_v57 = vpop.f32.mrf.mxu1 }
 0x319   :  { %v1611_v33 = vadd.f32 %v1610_v57, %v1242_v19 }
 0x31a   :  { %v7003_v39 = vpop.f32.mrf.mxu2 }
 0x31b   :  { %7912 = vst [vmem:[#allocation22_spill] sm:$0xff] %v7003_v39  ;;  %v1852_v29 = vmax.f32 %v1611_v33, 0.0 }
 0x31d   :  { %v2534_v43 = vpack.c.bf16 %v1852_v29, %v1851_v48 }
 0x31e   :  { %v1244_v11 = vpop.f32.mrf.mxu0 }
 0x31f   :  { %v1613_v40 = vpop.f32.mrf.mxu1  ;;  %4922 = vmatmul.msk.bf16.gmra.mxu2 %vm1948_vm0, %v2534_v43  ;;  %v1245_v13 = vadd.f32 %v6582_v32, %v1244_v11  ;;  %v4530_v43 = vor.u32 %v5555_v31, %v4529_v38  ;;  %v7052_v38 = vld [vmem:[%s7881_s2] ss:$0 sm:$0xff] }
 0x321   :  { %1283 = vmatmul.bf16.gmra.mxu0 %v4522_v26  ;;  %v1614_v57 = vadd.f32 %v1613_v40, %v1245_v13 }
 0x322   :  { %1652 = vmatmul.bf16.gmra.mxu1 %v4526_v18  ;;  %v2439_v25 = vpop.f32.mrf.mxu2 }
 0x323   :  { %v7020_v19 = vadd.f32 %v2439_v25, %v6923_v17  ;;  %v1853_v47 = vmax.f32 %v1614_v57, 0.0  ;;  %v5554_v17 = vld [vmem:[%s7882_s0 + $0x314] sm:$0xf] }
 0x325   :  { %v2535_v9 = vpack.c.bf16 %v1853_v47, %v1853_v47 }
 0x326   :  { %v1246_v33 = vpop.f32.mrf.mxu0 }
 0x327   :  { %v1615_v39 = vpop.f32.mrf.mxu1  ;;  %v1247_v29 = vadd.f32 %v6582_v32, %v1246_v33 }
 0x329   :  { %v1616_v18 = vadd.f32 %v1615_v39, %v1247_v29  ;;  %v5557_v39 = vld [vmem:[%s7882_s0 + $0x324] sm:$0xf0] }
 0x32a   :  { %v2441_v63 = vpop.f32.mrf.mxu2  ;;  %v2498_v48 = vpop.f32.mrf.mxu3 }
 0x32b   :  { %v7030_v50 = vadd.f32 %v2498_v48, %v6933_v61  ;;  %v4531_v63 = vld [vmem:[%s7882_s0 + $0x318] sm:$0xf0]  ;;  %v1854_v57 = vmax.f32 %v1616_v18, 0.0 }
 0x32c   :  { %v4534_v11 = vor.u32 %v5554_v17, %v4531_v63  ;;  %v5556_v17 = vld [vmem:[%s7882_s0 + $0x324] sm:$0xf]  ;;  %v4539_v63 = vld [vmem:[%s7882_s0 + $0x328] sm:$0xf0] }
 0x32e   :  { %v1249_v26 = vpop.f32.mrf.mxu0 }
 0x32f   :  { %v1250_v40 = vadd.f32 %v6582_v32, %v1249_v26  ;;  %v1618_v13 = vpop.f32.mrf.mxu1  ;;  %4923 = vmatmul.msk.bf16.gmra.mxu2 %vm1948_vm0, %v2535_v9  ;;  %v4537_v32 = vld [vmem:[%s7882_s0 + $0x320] sm:$0xf]  ;;  %v4542_v26 = vor.u32 %v5556_v17, %v4539_v63  ;;  %v5558_v17 = vld [vmem:[%s7882_s0 + $0x334] sm:$0xf]  ;;  %v4547_v63 = vld [vmem:[%s7882_s0 + $0x338] sm:$0xf0] }
 0x330   :  { %v4538_v9 = vor.u32 %v5557_v39, %v4537_v32  ;;  %v5559_v32 = vld [vmem:[%s7882_s0 + $0x334] sm:$0xf0] }
 0x331   :  { %v1619_v61 = vadd.f32 %v1618_v13, %v1250_v40  ;;  %1288 = vmatmul.bf16.gmra.mxu0 %v4530_v43 }
 0x332   :  { %1657 = vmatmul.bf16.gmra.mxu1 %v4534_v11  ;;  %v7040_v25 = vpop.f32.mrf.mxu3 }
 0x333   :  { %v1855_v33 = vmax.f32 %v1619_v61, 0.0 }
 0x335   :  { %v2610_v48 = vpack.c.bf16 %v1855_v33, %v1854_v57 }
 0x336   :  { %v1251_v41 = vpop.f32.mrf.mxu0 }
 0x337   :  { %v1620_v20 = vpop.f32.mrf.mxu1  ;;  %4936 = vmatmul.msk.bf16.vlgmr.msrb.gmra.mxu3 %vm1948_vm0, %v2610_v48  ;;  %v1252_v31 = vadd.f32 %v7052_v38, %v1251_v41 }
 0x339   :  { %v1621_v11 = vadd.f32 %v1620_v20, %v1252_v31  ;;  %v4545_v20 = vld [vmem:[%s7882_s0 + $0x330] sm:$0xf] }
 0x33a   :  { %v2503_v47 = vpop.f32.mrf.mxu3 }
 0x33b   :  { %v7056_v29 = vadd.f32 %v2503_v47, %v6954_v16  ;;  %v1856_v16 = vmax.f32 %v1621_v11, 0.0 }
 0x33e   :  { %v1254_v43 = vpop.f32.mrf.mxu0 }
 0x33f   :  { %v1255_v18 = vadd.f32 %v7052_v38, %v1254_v43  ;;  %v1623_v40 = vpop.f32.mrf.mxu1 }
 0x341   :  { %v1624_v13 = vadd.f32 %v1623_v40, %v1255_v18  ;;  %1293 = vmatmul.bf16.gmra.mxu0 %v4538_v9  ;;  %v4546_v9 = vor.u32 %v5559_v32, %v4545_v20  ;;  %v5637_v20 = vld [vmem:[%s7883_s3 + $0xa8] sm:$0xff]  ;;  %v4553_v32 = vld [vmem:[%s7882_s0 + $0x340] sm:$0xf] }
 0x342   :  { %1662 = vmatmul.bf16.gmra.mxu1 %v4542_v26  ;;  %v7065_v41 = vpop.f32.mrf.mxu3  ;;  %v4550_v26 = vor.u32 %v5558_v17, %v4547_v63  ;;  %2732 = vmatpush.bf16.msra.mxu2 %v5637_v20 }
 0x343   :  { %7913 = vst [vmem:[#allocation23_spill] sm:$0xff] %v7065_v41  ;;  %v1857_v61 = vmax.f32 %v1624_v13, 0.0 }
 0x345   :  { %v2611_v57 = vpack.c.bf16 %v1857_v61, %v1856_v16 }
 0x346   :  { %v1256_v33 = vpop.f32.mrf.mxu0 }
 0x347   :  { %v1625_v48 = vpop.f32.mrf.mxu1  ;;  %4937 = vmatmul.msk.bf16.gmra.mxu3 %vm1948_vm0, %v2611_v57  ;;  %v1257_v39 = vadd.f32 %v7052_v38, %v1256_v33 }
 0x349   :  { %v1626_v11 = vadd.f32 %v1625_v48, %v1257_v39  ;;  %v5561_v39 = vld [vmem:[%s7882_s0 + $0x344] sm:$0xf0] }
 0x34a   :  { %v2508_v47 = vpop.f32.mrf.mxu3 }
 0x34b   :  { %v7076_v31 = vadd.f32 %v2508_v47, %v6974_v12  ;;  %v1858_v16 = vmax.f32 %v1626_v11, 0.0  ;;  %v4554_v11 = vor.u32 %v5561_v39, %v4553_v32 }
 0x34e   :  { %v1259_v43 = vpop.f32.mrf.mxu0 }
 0x34f   :  { %v1260_v18 = vadd.f32 %v7052_v38, %v1259_v43  ;;  %v1628_v40 = vpop.f32.mrf.mxu1  ;;  %v4555_v43 = vld [vmem:[%s7882_s0 + $0x348] sm:$0xf0] }
 0x351   :  { %v1629_v13 = vadd.f32 %v1628_v40, %v1260_v18  ;;  %1298 = vmatmul.bf16.gmra.mxu0 %v4546_v9  ;;  %v5560_v9 = vld [vmem:[%s7882_s0 + $0x344] sm:$0xf] }
 0x352   :  { %1667 = vmatmul.bf16.gmra.mxu1 %v4550_v26  ;;  %v7085_v12 = vpop.f32.mrf.mxu3  ;;  %v5636_v26 = vld [vmem:[%s7883_s3 + $0xa0] sm:$0xff]  ;;  %v4558_v40 = vor.u32 %v5560_v9, %v4555_v43  ;;  %v5562_v43 = vld [vmem:[%s7882_s0 + $0x354] sm:$0xf] }
 0x353   :  { %7914 = vst [vmem:[#allocation24_spill] sm:$0xff] %v7085_v12  ;;  %v1859_v61 = vmax.f32 %v1629_v13, 0.0  ;;  %2733 = vmatpush.bf16.msra.mxu2 %v5636_v26 }
 0x355   :  { %v2612_v57 = vpack.c.bf16 %v1859_v61, %v1858_v16 }
 0x356   :  { %v1261_v33 = vpop.f32.mrf.mxu0 }
 0x357   :  { %v1630_v47 = vpop.f32.mrf.mxu1  ;;  %4938 = vmatmul.msk.bf16.gmra.mxu3 %vm1948_vm0, %v2612_v57  ;;  %v1262_v17 = vadd.f32 %v7052_v38, %v1261_v33 }
 0x359   :  { %v1631_v13 = vadd.f32 %v1630_v47, %v1262_v17  ;;  %v4561_v47 = vld [vmem:[%s7882_s0 + $0x350] sm:$0xf]  ;;  %v5563_v17 = vld [vmem:[%s7882_s0 + $0x354] sm:$0xf0] }
 0x35a   :  { %v2513_v48 = vpop.f32.mrf.mxu3 }
 0x35b   :  { %v7099_v63 = vadd.f32 %v2513_v48, %v6997_v21  ;;  %v1860_v33 = vmax.f32 %v1631_v13, 0.0 }
 0x35e   :  { %v1264_v18 = vpop.f32.mrf.mxu0 }
 0x35f   :  { %v1265_v21 = vadd.f32 %v7052_v38, %v1264_v18  ;;  %v1633_v16 = vpop.f32.mrf.mxu1 }
 0x361   :  { %v1634_v61 = vadd.f32 %v1633_v16, %v1265_v21  ;;  %1303 = vmatmul.bf16.gmra.mxu0 %v4554_v11  ;;  %v4562_v11 = vor.u32 %v5563_v17, %v4561_v47  ;;  %v4569_v17 = vld [vmem:[%s7882_s0 + $0x360] sm:$0xf] }
 0x362   :  { %1672 = vmatmul.bf16.gmra.mxu1 %v4558_v40  ;;  %v7111_v57 = vpop.f32.mrf.mxu3 }
 0x363   :  { %7915 = vst [vmem:[#allocation25_spill] sm:$0xff] %v7111_v57  ;;  %v1861_v20 = vmax.f32 %v1634_v61, 0.0 }
 0x365   :  { %v2613_v48 = vpack.c.bf16 %v1861_v20, %v1860_v33 }
 0x366   :  { %v1266_v12 = vpop.f32.mrf.mxu0 }
 0x367   :  { %v1635_v41 = vpop.f32.mrf.mxu1  ;;  %4939 = vmatmul.msk.bf16.gmra.mxu3 %vm1948_vm0, %v2613_v48  ;;  %v1267_v32 = vadd.f32 %v7052_v38, %v1266_v12  ;;  %v4563_v12 = vld [vmem:[%s7882_s0 + $0x358] sm:$0xf0] }
 0x368   :  { %v4566_v40 = vor.u32 %v5562_v43, %v4563_v12 }
 0x369   :  { %v1636_v26 = vadd.f32 %v1635_v41, %v1267_v32 }
 0x36a   :  { %v2518_v39 = vpop.f32.mrf.mxu3 }
 0x36b   :  { %v7122_v9 = vadd.f32 %v2518_v39, %v7020_v19  ;;  %v1862_v21 = vmax.f32 %v1636_v26, 0.0  ;;  %v5564_v26 = vld [vmem:[%s7882_s0 + $0x364] sm:$0xf] }
 0x36d   :  { %v2614_v20 = vpack.c.bf16 %v1862_v21, %v1862_v21 }
 0x36e   :  { %v1269_v18 = vpop.f32.mrf.mxu0 }
 0x36f   :  { %v1638_v13 = vpop.f32.mrf.mxu1  ;;  %v1270_v19 = vadd.f32 %v7052_v38, %v1269_v18 }
 0x371   :  { %1308 = vmatmul.bf16.gmra.mxu0 %v4562_v11  ;;  %v1639_v39 = vadd.f32 %v1638_v13, %v1270_v19 }
 0x372   :  { %1677 = vmatmul.bf16.gmra.mxu1 %v4566_v40  ;;  %v2520_v16 = vpop.f32.mrf.mxu3  ;;  %v2577_v61 = vpop.f32.mrf.mxu2 }
 0x373   :  { %v7132_v33 = vadd.f32 %v2577_v61, %v7030_v50  ;;  %v5565_v50 = vld [vmem:[%s7882_s0 + $0x364] sm:$0xf0]  ;;  %v1863_v43 = vmax.f32 %v1639_v39, 0.0 }
 0x374   :  { %v4570_v18 = vor.u32 %v5565_v50, %v4569_v17  ;;  %v4577_v50 = vld [vmem:[%s7882_s0 + $0x370] sm:$0xf] }
 0x376   :  { %v1271_v48 = vpop.f32.mrf.mxu0 }
 0x377   :  { %v1272_v57 = vadd.f32 %v7052_v38, %v1271_v48  ;;  %v1640_v41 = vpop.f32.mrf.mxu1  ;;  %4940 = vmatmul.msk.bf16.gmra.mxu3 %vm1948_vm0, %v2614_v20 }
 0x379   :  { %v1641_v32 = vadd.f32 %v1640_v41, %v1272_v57  ;;  %v4571_v57 = vld [vmem:[%s7882_s0 + $0x368] sm:$0xf0] }
 0x37a   :  { %v7136_v47 = vpop.f32.mrf.mxu2  ;;  %v4574_v13 = vor.u32 %v5564_v26, %v4571_v57  ;;  %v4579_v57 = vld [vmem:[%s7882_s0 + $0x378] sm:$0xf0] }
 0x37b   :  { %v1864_v12 = vmax.f32 %v1641_v32, 0.0 }
 0x37d   :  { %v2689_v11 = vpack.c.bf16 %v1864_v12, %v1863_v43  ;;  %v5567_v43 = vld [vmem:[%s7882_s0 + $0x374] sm:$0xf0] }
 0x37e   :  { %v1274_v40 = vpop.f32.mrf.mxu0 }
 0x37f   :  { %v1643_v21 = vpop.f32.mrf.mxu1  ;;  %4953 = vmatmul.msk.bf16.vlgmr.msra.gmra.mxu2 %vm1948_vm0, %v2689_v11  ;;  %v1275_v61 = vadd.f32 %v7052_v38, %v1274_v40 }
 0x381   :  { %1313 = vmatmul.bf16.gmra.mxu0 %v4570_v18  ;;  %v1644_v48 = vadd.f32 %v1643_v21, %v1275_v61  ;;  %v4578_v18 = vor.u32 %v5567_v43, %v4577_v50  ;;  %v4585_v43 = vld [vmem:[%s7882_s0 + $0x380] sm:$0xf] }
 0x382   :  { %1682 = vmatmul.bf16.gmra.mxu1 %v4574_v13  ;;  %v2582_v16 = vpop.f32.mrf.mxu2 }
 0x383   :  { %v7153_v19 = vadd.f32 %v2582_v16, %v7056_v29  ;;  %v1865_v12 = vmax.f32 %v1644_v48, 0.0  ;;  %v5566_v29 = vld [vmem:[%s7882_s0 + $0x374] sm:$0xf] }
 0x384   :  { %v4582_v13 = vor.u32 %v5566_v29, %v4579_v57 }
 0x386   :  { %v1276_v20 = vpop.f32.mrf.mxu0 }
 0x387   :  { %v1277_v39 = vadd.f32 %v7052_v38, %v1276_v20  ;;  %v1645_v41 = vpop.f32.mrf.mxu1 }
 0x389   :  { %v1646_v32 = vadd.f32 %v1645_v41, %v1277_v39 }
 0x38a   :  { %v7156_v17 = vpop.f32.mrf.mxu2 }
 0x38b   :  { %7916 = vst [vmem:[#allocation26_spill] sm:$0xff] %v7156_v17  ;;  %v1866_v26 = vmax.f32 %v1646_v32, 0.0 }
 0x38d   :  { %v2690_v11 = vpack.c.bf16 %v1866_v26, %v1865_v12  ;;  %v5569_v26 = vld [vmem:[%s7882_s0 + $0x384] sm:$0xf0] }
 0x38e   :  { %v1279_v40 = vpop.f32.mrf.mxu0 }
 0x38f   :  { %v1648_v21 = vpop.f32.mrf.mxu1  ;;  %4954 = vmatmul.msk.bf16.gmra.mxu2 %vm1948_vm0, %v2690_v11  ;;  %v1280_v61 = vadd.f32 %v7052_v38, %v1279_v40  ;;  %v4587_v11 = vld [vmem:[%s7882_s0 + $0x388] sm:$0xf0] }
 0x391   :  { %1318 = vmatmul.bf16.gmra.mxu0 %v4578_v18  ;;  %v1649_v39 = vadd.f32 %v1648_v21, %v1280_v61  ;;  %v5639_v18 = vld [vmem:[%s7883_s3 + $0xb8] sm:$0xff] }
 0x392   :  { %1687 = vmatmul.bf16.gmra.mxu1 %v4582_v13  ;;  %v2587_v16 = vpop.f32.mrf.mxu2  ;;  %v4586_v13 = vor.u32 %v5569_v26, %v4585_v43  ;;  %2811 = vmatpush.bf16.msra.mxu3 %v5639_v18 }
 0x393   :  { %v7173_v20 = vadd.f32 %v2587_v16, %v7076_v31  ;;  %v5568_v31 = vld [vmem:[%s7882_s0 + $0x384] sm:$0xf]  ;;  %v1867_v29 = vmax.f32 %v1649_v39, 0.0 }
 0x394   :  { %v4590_v16 = vor.u32 %v5568_v31, %v4587_v11  ;;  %v4593_v11 = vld [vmem:[%s7882_s0 + $0x390] sm:$0xf] }
 0x396   :  { %v1281_v48 = vpop.f32.mrf.mxu0 }
 0x397   :  { %v1282_v41 = vadd.f32 %v7052_v38, %v1281_v48  ;;  %v1650_v32 = vpop.f32.mrf.mxu1 }
 0x399   :  { %v1651_v12 = vadd.f32 %v1650_v32, %v1282_v41  ;;  %v5638_v32 = vld [vmem:[%s7883_s3 + $0xb0] sm:$0xff] }
 0x39a   :  { %v7176_v50 = vpop.f32.mrf.mxu2  ;;  %2812 = vmatpush.bf16.msra.mxu3 %v5638_v32 }
 0x39b   :  { %7917 = vst [vmem:[#allocation27_spill] sm:$0xff] %v7176_v50  ;;  %v1868_v57 = vmax.f32 %v1651_v12, 0.0 }
 0x39d   :  { %v2691_v40 = vpack.c.bf16 %v1868_v57, %v1867_v29 }
 0x39e   :  { %v1284_v21 = vpop.f32.mrf.mxu0 }
 0x39f   :  { %v1653_v61 = vpop.f32.mrf.mxu1  ;;  %4955 = vmatmul.msk.bf16.gmra.mxu2 %vm1948_vm0, %v2691_v40  ;;  %v1285_v39 = vadd.f32 %v7052_v38, %v1284_v21  ;;  %v4595_v21 = vld [vmem:[%s7882_s0 + $0x398] sm:$0xf0] }
 0x3a1   :  { %1323 = vmatmul.bf16.gmra.mxu0 %v4586_v13  ;;  %v1654_v43 = vadd.f32 %v1653_v61, %v1285_v39  ;;  %v5570_v13 = vld [vmem:[%s7882_s0 + $0x394] sm:$0xf] }
 0x3a2   :  { %1692 = vmatmul.bf16.gmra.mxu1 %v4590_v16  ;;  %v2592_v48 = vpop.f32.mrf.mxu2  ;;  %v4598_v39 = vor.u32 %v5570_v13, %v4595_v21 }
 0x3a3   :  { %v7196_v41 = vadd.f32 %v2592_v48, %v7099_v63  ;;  %v5571_v63 = vld [vmem:[%s7882_s0 + $0x394] sm:$0xf0]  ;;  %v1869_v18 = vmax.f32 %v1654_v43, 0.0 }
 0x3a4   :  { %v4594_v61 = vor.u32 %v5571_v63, %v4593_v11  ;;  %v4601_v11 = vld [vmem:[%s7882_s0 + $0x3a0] sm:$0xf]  ;;  %v5573_v63 = vld [vmem:[%s7882_s0 + $0x3a4] sm:$0xf0] }
 0x3a6   :  { %v1286_v12 = vpop.f32.mrf.mxu0 }
 0x3a7   :  { %v1287_v26 = vadd.f32 %v7052_v38, %v1286_v12  ;;  %v1655_v31 = vpop.f32.mrf.mxu1 }
 0x3a9   :  { %v1656_v29 = vadd.f32 %v1655_v31, %v1287_v26 }
 0x3aa   :  { %v7202_v57 = vpop.f32.mrf.mxu2 }
 0x3ab   :  { %7918 = vst [vmem:[#allocation28_spill] sm:$0xff] %v7202_v57  ;;  %v1870_v40 = vmax.f32 %v1656_v29, 0.0 }
 0x3ad   :  { %v2692_v16 = vpack.c.bf16 %v1870_v40, %v1869_v18 }
 0x3ae   :  { %v1289_v48 = vpop.f32.mrf.mxu0 }
 0x3af   :  { %v1658_v32 = vpop.f32.mrf.mxu1  ;;  %4956 = vmatmul.msk.bf16.gmra.mxu2 %vm1948_vm0, %v2692_v16  ;;  %v1290_v12 = vadd.f32 %v7052_v38, %v1289_v48  ;;  %v4602_v16 = vor.u32 %v5573_v63, %v4601_v11  ;;  %v5575_v11 = vld [vmem:[%s7882_s0 + $0x3b4] sm:$0xf0] }
 0x3b1   :  { %1328 = vmatmul.bf16.gmra.mxu0 %v4594_v61  ;;  %v1659_v31 = vadd.f32 %v1658_v32, %v1290_v12 }
 0x3b2   :  { %1697 = vmatmul.bf16.gmra.mxu1 %v4598_v39  ;;  %v2597_v43 = vpop.f32.mrf.mxu2 }
 0x3b3   :  { %v7219_v26 = vadd.f32 %v2597_v43, %v7122_v9  ;;  %v1871_v50 = vmax.f32 %v1659_v31, 0.0  ;;  %v5572_v9 = vld [vmem:[%s7882_s0 + $0x3a4] sm:$0xf] }
 0x3b5   :  { %v2693_v21 = vpack.c.bf16 %v1871_v50, %v1871_v50 }
 0x3b6   :  { %v1291_v29 = vpop.f32.mrf.mxu0 }
 0x3b7   :  { %v1660_v57 = vpop.f32.mrf.mxu1  ;;  %v1292_v40 = vadd.f32 %v7052_v38, %v1291_v29 }
 0x3b9   :  { %v1661_v39 = vadd.f32 %v1660_v57, %v1292_v40  ;;  %v4609_v57 = vld [vmem:[%s7882_s0 + $0x3b0] sm:$0xf] }
 0x3ba   :  { %v2599_v17 = vpop.f32.mrf.mxu2  ;;  %v2656_v18 = vpop.f32.mrf.mxu3 }
 0x3bb   :  { %v7229_v13 = vadd.f32 %v2656_v18, %v7132_v33  ;;  %v4603_v17 = vld [vmem:[%s7882_s0 + $0x3a8] sm:$0xf0]  ;;  %v1872_v31 = vmax.f32 %v1661_v39, 0.0 }
 0x3bc   :  { %v4606_v48 = vor.u32 %v5572_v9, %v4603_v17  ;;  %v5574_v9 = vld [vmem:[%s7882_s0 + $0x3b4] sm:$0xf]  ;;  %v4611_v17 = vld [vmem:[%s7882_s0 + $0x3b8] sm:$0xf0] }
 0x3be   :  { %v1294_v61 = vpop.f32.mrf.mxu0 }
 0x3bf   :  { %v1295_v32 = vadd.f32 %v7052_v38, %v1294_v61  ;;  %v1663_v12 = vpop.f32.mrf.mxu1  ;;  %4957 = vmatmul.msk.bf16.gmra.mxu2 %vm1948_vm0, %v2693_v21  ;;  %v4610_v21 = vor.u32 %v5575_v11, %v4609_v57  ;;  %v4614_v61 = vor.u32 %v5574_v9, %v4611_v17  ;;  %v5577_v57 = vld [vmem:[%s7882_s0 + $0x3c4] sm:$0xf0]  ;;  %v5576_v9 = vld [vmem:[%s7882_s0 + $0x3c4] sm:$0xf]  ;;  %v4619_v17 = vld [vmem:[%s7882_s0 + $0x3c8] sm:$0xf0] }
 0x3c1   :  { %v1664_v33 = vadd.f32 %v1663_v12, %v1295_v32  ;;  %1333 = vmatmul.bf16.gmra.mxu0 %v4602_v16 }
 0x3c2   :  { %1702 = vmatmul.bf16.gmra.mxu1 %v4606_v48  ;;  %v7239_v43 = vpop.f32.mrf.mxu3 }
 0x3c3   :  { %v1873_v29 = vmax.f32 %v1664_v33, 0.0 }
 0x3c5   :  { %v2768_v18 = vpack.c.bf16 %v1873_v29, %v1872_v31 }
 0x3c6   :  { %v1296_v4 = vpop.f32.mrf.mxu0 }
 0x3c7   :  { %v1665_v51 = vpop.f32.mrf.mxu1  ;;  %4970 = vmatmul.msk.bf16.vlgmr.msra.gmra.mxu3 %vm1948_vm0, %v2768_v18  ;;  %v1297_v63 = vadd.f32 %v7052_v38, %v1296_v4 }
 0x3c9   :  { %v1666_v48 = vadd.f32 %v1665_v51, %v1297_v63  ;;  %v4617_v51 = vld [vmem:[%s7882_s0 + $0x3c0] sm:$0xf] }
 0x3ca   :  { %v2661_v50 = vpop.f32.mrf.mxu3 }
 0x3cb   :  { %v7250_v40 = vadd.f32 %v2661_v50, %v7153_v19  ;;  %v1874_v19 = vmax.f32 %v1666_v48, 0.0 }
 0x3ce   :  { %v1299_v16 = vpop.f32.mrf.mxu0 }
 0x3cf   :  { %v1300_v39 = vadd.f32 %v7052_v38, %v1299_v16  ;;  %v1668_v32 = vpop.f32.mrf.mxu1 }
 0x3d1   :  { %v1669_v12 = vadd.f32 %v1668_v32, %v1300_v39  ;;  %1338 = vmatmul.bf16.gmra.mxu0 %v4610_v21  ;;  %v4618_v21 = vor.u32 %v5577_v57, %v4617_v51 }
 0x3d2   :  { %1707 = vmatmul.bf16.gmra.mxu1 %v4614_v61  ;;  %v7259_v4 = vpop.f32.mrf.mxu3  ;;  %v4622_v61 = vor.u32 %v5576_v9, %v4619_v17  ;;  %v5578_v9 = vld [vmem:[%s7882_s0 + $0x3d4] sm:$0xf]  ;;  %v4627_v17 = vld [vmem:[%s7882_s0 + $0x3d8] sm:$0xf0] }
 0x3d3   :  { %v1875_v33 = vmax.f32 %v1669_v12, 0.0 }
 0x3d5   :  { %v2769_v31 = vpack.c.bf16 %v1875_v33, %v1874_v19 }
 0x3d6   :  { %v1301_v29 = vpop.f32.mrf.mxu0 }
 0x3d7   :  { %v1670_v18 = vpop.f32.mrf.mxu1  ;;  %4971 = vmatmul.msk.bf16.gmra.mxu3 %vm1948_vm0, %v2769_v31  ;;  %v1302_v11 = vadd.f32 %v7052_v38, %v1301_v29  ;;  %v5641_v31 = vld [vmem:[%s7883_s3 + $0xc8] sm:$0xff] }
 0x3d8   :  { %2890 = vmatpush.bf16.msrb.mxu2 %v5641_v31 }
 0x3d9   :  { %v1671_v48 = vadd.f32 %v1670_v18, %v1302_v11 }
 0x3da   :  { %v2666_v50 = vpop.f32.mrf.mxu3 }
 0x3db   :  { %v7270_v63 = vadd.f32 %v2666_v50, %v7173_v20  ;;  %v1876_v19 = vmax.f32 %v1671_v48, 0.0 }
 0x3de   :  { %v1304_v16 = vpop.f32.mrf.mxu0 }
 0x3df   :  { %v1305_v39 = vadd.f32 %v7052_v38, %v1304_v16  ;;  %v1673_v32 = vpop.f32.mrf.mxu1  ;;  %v5643_v16 = vld [vmem:[%s7883_s3 + $0xd8] sm:$0xff] }
 0x3e0   :  { %2969 = vmatpush.bf16.msrb.mxu3 %v5643_v16 }
 0x3e1   :  { %v1674_v12 = vadd.f32 %v1673_v32, %v1305_v39  ;;  %1343 = vmatmul.bf16.gmra.mxu0 %v4618_v21  ;;  %v5640_v21 = vld [vmem:[%s7883_s3 + $0xc0] sm:$0xff] }
 0x3e2   :  { %1712 = vmatmul.bf16.gmra.mxu1 %v4622_v61  ;;  %v7279_v20 = vpop.f32.mrf.mxu3  ;;  %2891 = vmatpush.bf16.msrb.mxu2 %v5640_v21 }
 0x3e3   :  { %7919 = vst [vmem:[#allocation29_spill] sm:$0xff] %v7279_v20  ;;  %v1877_v33 = vmax.f32 %v1674_v12, 0.0 }
 0x3e5   :  { %v2770_v29 = vpack.c.bf16 %v1877_v33, %v1876_v19 }
 0x3e6   :  { %v1306_v50 = vpop.f32.mrf.mxu0 }
 0x3e7   :  { %v1675_v51 = vpop.f32.mrf.mxu1  ;;  %4972 = vmatmul.msk.bf16.gmra.mxu3 %vm1948_vm0, %v2770_v29  ;;  %v1307_v57 = vadd.f32 %v7052_v38, %v1306_v50 }
 0x3e9   :  { %v1676_v48 = vadd.f32 %v1675_v51, %v1307_v57 }
 0x3ea   :  { %v2671_v18 = vpop.f32.mrf.mxu3 }
 0x3eb   :  { %v7287_v11 = vadd.f32 %v2671_v18, %v7196_v41  ;;  %v4630_v41 = vor.u32 %v5578_v9, %v4627_v17  ;;  %v1878_v33 = vmax.f32 %v1676_v48, 0.0 }
 0x3ee   :  { %v1309_v61 = vpop.f32.mrf.mxu0 }
 0x3ef   :  { %v1310_v39 = vadd.f32 %v7052_v38, %v1309_v61  ;;  %v1678_v32 = vpop.f32.mrf.mxu1 }
 0x3f1   :  { %v1679_v12 = vadd.f32 %v1678_v32, %v1310_v39 }
 0x3f2   :  { %1717 = vmatmul.bf16.gmra.mxu1 %v4630_v41  ;;  %v7302_v19 = vpop.f32.mrf.mxu3 }
 0x3f3   :  { %7920 = vst [vmem:[#allocation30_spill] sm:$0xff] %v7302_v19  ;;  %v1879_v31 = vmax.f32 %v1679_v12, 0.0 }
 0x3f5   :  { %v2771_v29 = vpack.c.bf16 %v1879_v31, %v1878_v33 }
 0x3f6   :  { %v1311_v50 = vpop.f32.mrf.mxu0 }
 0x3f7   :  { %v1680_v18 = vpop.f32.mrf.mxu1  ;;  %4973 = vmatmul.msk.bf16.gmra.mxu3 %vm1948_vm0, %v2771_v29  ;;  %v1312_v21 = vadd.f32 %v7052_v38, %v1311_v50 }
 0x3f9   :  { %v1681_v57 = vadd.f32 %v1680_v18, %v1312_v21 }
 0x3fa   :  { %v2676_v20 = vpop.f32.mrf.mxu3 }
 0x3fb   :  { %v7307_v51 = vadd.f32 %v2676_v20, %v7219_v26  ;;  %v1880_v16 = vmax.f32 %v1681_v57, 0.0 }
 0x3fd   :  { %v2772_v32 = vpack.c.bf16 %v1880_v16, %v1880_v16  ;;  %v5642_v16 = vld [vmem:[%s7883_s3 + $0xd0] sm:$0xff] }
 0x3fe   :  { %v1314_v9 = vpop.f32.mrf.mxu0  ;;  %2970 = vmatpush.bf16.msrb.mxu3 %v5642_v16 }
 0x3ff   :  { %v1683_v17 = vpop.f32.mrf.mxu1  ;;  %v1315_v48 = vadd.f32 %v7052_v38, %v1314_v9 }
 0x401   :  { %v1684_v33 = vadd.f32 %v1683_v17, %v1315_v48 }
 0x402   :  { %v2678_v61 = vpop.f32.mrf.mxu3  ;;  %v2735_v41 = vpop.f32.mrf.mxu2 }
 0x403   :  { %v7311_v39 = vadd.f32 %v2735_v41, %v7229_v13  ;;  %v1881_v50 = vmax.f32 %v1684_v33, 0.0 }
 0x406   :  { %v1316_v12 = vpop.f32.mrf.mxu0 }
 0x407   :  { %v1317_v31 = vadd.f32 %v7052_v38, %v1316_v12  ;;  %v1685_v29 = vpop.f32.mrf.mxu1  ;;  %4974 = vmatmul.msk.bf16.gmra.mxu3 %vm1948_vm0, %v2772_v32 }
 0x409   :  { %v1686_v26 = vadd.f32 %v1685_v29, %v1317_v31 }
 0x40a   :  { %v7315_v20 = vpop.f32.mrf.mxu2 }
 0x40b   :  { %v1882_v18 = vmax.f32 %v1686_v26, 0.0 }
 0x40d   :  { %v2847_v21 = vpack.c.bf16 %v1882_v18, %v1881_v50 }
 0x40e   :  { %v1319_v57 = vpop.f32.mrf.mxu0 }
 0x40f   :  { %v1688_v61 = vpop.f32.mrf.mxu1  ;;  %4987 = vmatmul.msk.bf16.vlgmr.msrb.gmra.mxu2 %vm1948_vm0, %v2847_v21  ;;  %v1320_v9 = vadd.f32 %v7052_v38, %v1319_v57 }
 0x411   :  { %v1689_v48 = vadd.f32 %v1688_v61, %v1320_v9 }
 0x412   :  { %v2740_v13 = vpop.f32.mrf.mxu2 }
 0x413   :  { %v7320_v17 = vadd.f32 %v2740_v13, %v7250_v40  ;;  %v1883_v29 = vmax.f32 %v1689_v48, 0.0 }
 0x416   :  { %v1321_v41 = vpop.f32.mrf.mxu0 }
 0x417   :  { %v1322_v32 = vadd.f32 %v7052_v38, %v1321_v41  ;;  %v1690_v12 = vpop.f32.mrf.mxu1 }
 0x419   :  { %v1691_v33 = vadd.f32 %v1690_v12, %v1322_v32 }
 0x41a   :  { %v7326_v31 = vpop.f32.mrf.mxu2 }
 0x41b   :  { %7921 = vst [vmem:[#allocation31_spill] sm:$0xff] %v7326_v31  ;;  %v1884_v26 = vmax.f32 %v1691_v33, 0.0 }
 0x41d   :  { %v2848_v50 = vpack.c.bf16 %v1884_v26, %v1883_v29 }
 0x41e   :  { %v1324_v18 = vpop.f32.mrf.mxu0 }
 0x41f   :  { %v1693_v21 = vpop.f32.mrf.mxu1  ;;  %4988 = vmatmul.msk.bf16.gmra.mxu2 %vm1948_vm0, %v2848_v50  ;;  %v1325_v57 = vadd.f32 %v7052_v38, %v1324_v18 }
 0x421   :  { %v1694_v9 = vadd.f32 %v1693_v21, %v1325_v57  ;;  %v5645_v21 = vld [vmem:[%s7883_s3 + $0xe8] sm:$0xff] }
 0x422   :  { %v2745_v40 = vpop.f32.mrf.mxu2  ;;  %3048 = vmatpush.bf16.msra.mxu2 %v5645_v21 }
 0x423   :  { %v7331_v13 = vadd.f32 %v2745_v40, %v7270_v63  ;;  %v1885_v48 = vmax.f32 %v1694_v9, 0.0 }
 0x426   :  { %v1326_v61 = vpop.f32.mrf.mxu0 }
 0x427   :  { %v1327_v16 = vadd.f32 %v7052_v38, %v1326_v61  ;;  %v1695_v41 = vpop.f32.mrf.mxu1 }
 0x429   :  { %v1696_v32 = vadd.f32 %v1695_v41, %v1327_v16 }
 0x42a   :  { %v7334_v12 = vpop.f32.mrf.mxu2 }
 0x42b   :  { %7922 = vst [vmem:[#allocation32_spill] sm:$0xff] %v7334_v12  ;;  %v1886_v33 = vmax.f32 %v1696_v32, 0.0 }
 0x42d   :  { %v2849_v29 = vpack.c.bf16 %v1886_v33, %v1885_v48  ;;  %v5644_v33 = vld [vmem:[%s7883_s3 + $0xe0] sm:$0xff] }
 0x42e   :  { %v1329_v26 = vpop.f32.mrf.mxu0  ;;  %3049 = vmatpush.bf16.msra.mxu2 %v5644_v33 }
 0x42f   :  { %v1698_v19 = vpop.f32.mrf.mxu1  ;;  %4989 = vmatmul.msk.bf16.gmra.mxu2 %vm1948_vm0, %v2849_v29  ;;  %v1330_v18 = vadd.f32 %v7052_v38, %v1329_v26 }
 0x431   :  { %v1699_v57 = vadd.f32 %v1698_v19, %v1330_v18 }
 0x432   :  { %v2750_v50 = vpop.f32.mrf.mxu2 }
 0x433   :  { %v7339_v63 = vadd.f32 %v2750_v50, %v7287_v11  ;;  %v1887_v32 = vmax.f32 %v1699_v57, 0.0  ;;  %v5647_v11 = vld [vmem:[%s7883_s3 + $0xf8] sm:$0xff] }
 0x434   :  { %3127 = vmatpush.bf16.msra.mxu3 %v5647_v11 }
 0x436   :  { %v1331_v40 = vpop.f32.mrf.mxu0 }
 0x437   :  { %v1332_v61 = vadd.f32 %v7052_v38, %v1331_v40  ;;  %v1700_v9 = vpop.f32.mrf.mxu1 }
 0x439   :  { %v1701_v16 = vadd.f32 %v1700_v9, %v1332_v61 }
 0x43a   :  { %v7345_v41 = vpop.f32.mrf.mxu2 }
 0x43b   :  { %7923 = vst [vmem:[#allocation33_spill] sm:$0xff] %v7345_v41  ;;  %v1888_v48 = vmax.f32 %v1701_v16, 0.0 }
 0x43d   :  { %v2850_v29 = vpack.c.bf16 %v1888_v48, %v1887_v32 }
 0x43e   :  { %v1334_v19 = vpop.f32.mrf.mxu0 }
 0x43f   :  { %v1703_v26 = vpop.f32.mrf.mxu1  ;;  %4990 = vmatmul.msk.bf16.gmra.mxu2 %vm1948_vm0, %v2850_v29  ;;  %v1335_v50 = vadd.f32 %v7052_v38, %v1334_v19 }
 0x441   :  { %v1704_v40 = vadd.f32 %v1703_v26, %v1335_v50 }
 0x442   :  { %v2755_v18 = vpop.f32.mrf.mxu2 }
 0x443   :  { %v7356_v21 = vadd.f32 %v2755_v18, %v7307_v51  ;;  %v1889_v9 = vmax.f32 %v1704_v40, 0.0 }
 0x445   :  { %v2851_v11 = vpack.c.bf16 %v1889_v9, %v1889_v9 }
 0x446   :  { %v1336_v57 = vpop.f32.mrf.mxu0 }
 0x447   :  { %v1705_v61 = vpop.f32.mrf.mxu1  ;;  %v1337_v32 = vadd.f32 %v7052_v38, %v1336_v57 }
 0x449   :  { %v1706_v29 = vadd.f32 %v1705_v61, %v1337_v32 }
 0x44a   :  { %v2757_v16 = vpop.f32.mrf.mxu2  ;;  %v2814_v41 = vpop.f32.mrf.mxu3 }
 0x44b   :  { %v7360_v48 = vadd.f32 %v2814_v41, %v7311_v39  ;;  %v1890_v50 = vmax.f32 %v1706_v29, 0.0 }
 0x44e   :  { %v1339_v33 = vpop.f32.mrf.mxu0 }
 0x44f   :  { %v1340_v19 = vadd.f32 %v7052_v38, %v1339_v33  ;;  %v1708_v12 = vpop.f32.mrf.mxu1  ;;  %4991 = vmatmul.msk.bf16.gmra.mxu2 %vm1948_vm0, %v2851_v11  ;;  %v5646_v11 = vld [vmem:[%s7883_s3 + $0xf0] sm:$0xff] }
 0x450   :  { %3128 = vmatpush.bf16.msra.mxu3 %v5646_v11 }
 0x451   :  { %v1709_v51 = vadd.f32 %v1708_v12, %v1340_v19 }
 0x452   :  { %v7364_v26 = vpop.f32.mrf.mxu3 }
 0x453   :  { %v1891_v18 = vmax.f32 %v1709_v51, 0.0 }
 0x455   :  { %v2926_v40 = vpack.c.bf16 %v1891_v18, %v1890_v50 }
 0x456   :  { %v1341_v16 = vpop.f32.mrf.mxu0 }
 0x457   :  { %v1710_v31 = vpop.f32.mrf.mxu1  ;;  %5004 = vmatmul.msk.bf16.vlgmr.msrb.gmra.mxu3 %vm1948_vm0, %v2926_v40  ;;  %v1342_v41 = vadd.f32 %v7052_v38, %v1341_v16  ;;  %v1350_v16 = vadd.f32 %v7052_v38, %v6068_v56 }
 0x459   :  { %v1711_v9 = vadd.f32 %v1710_v31, %v1342_v41 }
 0x45a   :  { %v2819_v39 = vpop.f32.mrf.mxu3 }
 0x45b   :  { %v7369_v57 = vadd.f32 %v2819_v39, %v7320_v17  ;;  %v1892_v19 = vmax.f32 %v1711_v9, 0.0  ;;  %v1372_v9 = vadd.f32 %v7052_v38, %v6233_v53 }
 0x45e   :  { %v1344_v61 = vpop.f32.mrf.mxu0 }
 0x45f   :  { %v1345_v32 = vadd.f32 %v7052_v38, %v1344_v61  ;;  %v1713_v12 = vpop.f32.mrf.mxu1  ;;  %5021 = vmatmul.msk.bf16.vlgmr.msra.gmra.mxu2 %vm1948_vm0, %v6192_v15 }
 0x461   :  { %v1714_v33 = vadd.f32 %v1713_v12, %v1345_v32 }
 0x462   :  { %v7377_v29 = vpop.f32.mrf.mxu3 }
 0x463   :  { %v1893_v51 = vmax.f32 %v1714_v33, 0.0  ;;  %v1741_v33 = vadd.f32 %v6240_v8, %v1372_v9 }
 0x465   :  { %v2927_v17 = vpack.c.bf16 %v1893_v51, %v1892_v19 }
 0x466   :  { %v1346_v31 = vpop.f32.mrf.mxu0 }
 0x467   :  { %v1715_v50 = vpop.f32.mrf.mxu1  ;;  %5005 = vmatmul.msk.bf16.gmra.mxu3 %vm1948_vm0, %v2927_v17  ;;  %v1347_v40 = vadd.f32 %v7052_v38, %v1346_v31  ;;  %v1904_v17 = vmax.f32 %v1741_v33, 0.0 }
 0x469   :  { %v1716_v39 = vadd.f32 %v1715_v50, %v1347_v40  ;;  %v1897_v50 = vmax.f32 %v6140_v30, 0.0  ;;  %v1357_v30 = vadd.f32 %v7052_v38, %v6138_v27  ;;  %v1382_v27 = vadd.f32 %v7052_v38, %v6287_v59 }
 0x46a   :  { %v2824_v18 = vpop.f32.mrf.mxu3  ;;  %v1387_v59 = vadd.f32 %v7052_v38, %v6310_v60 }
 0x46b   :  { %v2842_v15 = vadd.f32 %v2824_v18, %v7331_v13  ;;  %v1894_v11 = vmax.f32 %v1716_v39, 0.0  ;;  %v1352_v13 = vadd.f32 %v7052_v38, %v6097_v5  ;;  %v1377_v5 = vadd.f32 %v7052_v38, %v6261_v23 }
 0x46c   :  { %v1726_v9 = vadd.f32 %v6147_v35, %v1357_v30  ;;  %v1751_v35 = vadd.f32 %v6293_v14, %v1382_v27  ;;  %v1911_v14 = vmax.f32 %v6340_v0, 0.0  ;;  %v1397_v0 = vadd.f32 %v7052_v38, %v6360_v22 }
 0x46d   :  { %v1746_v39 = vadd.f32 %v6269_v46, %v1377_v5  ;;  %v1402_v22 = vadd.f32 %v7052_v38, %v6382_v55 }
 0x46e   :  { %v1898_v23 = vmax.f32 %v1726_v9, 0.0  ;;  %v5651_v9 = vld [vmem:[%s7885_s5 + $0x18] sm:$0xff] }
 0x46f   :  { %v1718_v41 = vpop.f32.mrf.mxu1  ;;  %5022 = vmatmul.msk.bf16.gmra.mxu2 %vm1948_vm0, %v6218_v49  ;;  %v1903_v49 = vmax.f32 %v6235_v54, 0.0  ;;  %v1905_v54 = vmax.f32 %v6263_v24, 0.0  ;;  %v1907_v24 = vmax.f32 %v6289_v62, 0.0  ;;  %3276 = vmatpush.bf16.msrb.mxu3 %v5651_v9  ;;  %v5663_v9 = vld [vmem:[%s7885_s5 + $0x78] sm:$0xff] }
 0x470   :  { %v1719_v61 = vadd.f32 %v1718_v41, %v1350_v16  ;;  %v1906_v41 = vmax.f32 %v1746_v39, 0.0  ;;  %v1913_v39 = vmax.f32 %v6362_v34, 0.0  ;;  %v1915_v34 = vmax.f32 %v6384_v2, 0.0  ;;  %v5654_v2 = vld [vmem:[%s7885_s5 + $0x30] sm:$0xff] }
 0x471   :  { %v3007_v16 = vpack.c.bf16 %v1904_v17, %v1903_v49 }
 0x472   :  { %v1895_v32 = vmax.f32 %v1719_v61, 0.0  ;;  %v7388_v12 = vpop.f32.mrf.mxu3 }
 0x474   :  { %v2928_v19 = vpack.c.bf16 %v1895_v32, %v1894_v11  ;;  %v3008_v32 = vpack.c.bf16 %v1906_v41, %v1905_v54  ;;  %v1766_v41 = vadd.f32 %v6364_v44, %v1397_v0  ;;  %v2036_v0 = vadd.f32 %v6401_v36, %v6452_v1  ;;  %v5658_v1 = vld [vmem:[%s7885_s5 + $0x50] sm:$0xff] }
 0x477   :  { %v1720_v56 = vpop.f32.mrf.mxu1  ;;  %5006 = vmatmul.msk.bf16.gmra.mxu3 %vm1948_vm0, %v2928_v19  ;;  %v2930_v19 = vpack.c.bf16 %v1898_v23, %v1898_v23 }
 0x478   :  { %v1721_v51 = vadd.f32 %v1720_v56, %v1352_v13  ;;  %v1908_v56 = vmax.f32 %v1751_v35, 0.0  ;;  %v5650_v35 = vld [vmem:[%s7885_s5 + $0x10] sm:$0xff] }
 0x479   :  { %3277 = vmatpush.bf16.msrb.mxu3 %v5650_v35 }
 0x47a   :  { %v1896_v53 = vmax.f32 %v1721_v51, 0.0  ;;  %v2829_v31 = vpop.f32.mrf.mxu3  ;;  %v1909_v51 = vmax.f32 %v6312_v28, 0.0  ;;  %v1392_v28 = vadd.f32 %v7052_v38, %v6338_v58  ;;  %v5655_v58 = vld [vmem:[%s7885_s5 + $0x38] sm:$0xff] }
 0x47b   :  { %v2844_v18 = vadd.f32 %v2829_v31, %v7339_v63  ;;  %3236 = vmatpush.bf16.msrb.mxu2 %v5655_v58  ;;  %v2128_v58 = vadd.f32 %v6557_v10, %v2036_v0  ;;  %v5662_v10 = vld [vmem:[%s7885_s5 + $0x70] sm:$0xff]  ;;  %v5671_v0 = vld [vmem:[%s7885_s5 + $0xb8] sm:$0xff] }
 0x47c   :  { %v2929_v40 = vpack.c.bf16 %v1897_v50, %v1896_v53  ;;  %v3084_v17 = vpack.c.bf16 %v1909_v51, %v1908_v56  ;;  %v1756_v50 = vadd.f32 %v6318_v45, %v1387_v59  ;;  %v1761_v5 = vadd.f32 %v6342_v6, %v1392_v28 }
 0x47d   :  { %v1914_v6 = vmax.f32 %v1766_v41, 0.0 }
 0x47e   :  { %v1910_v53 = vmax.f32 %v1756_v50, 0.0  ;;  %v1912_v60 = vmax.f32 %v1761_v5, 0.0 }
 0x47f   :  { %5023 = vmatmul.msk.bf16.gmra.mxu2 %vm1948_vm0, %v3007_v16 }
 0x480   :  { %v3085_v16 = vpack.c.bf16 %v1911_v14, %v1910_v53  ;;  %v3086_v54 = vpack.c.bf16 %v1913_v39, %v1912_v60  ;;  %3237 = vmatpush.bf16.msrb.mxu2 %v5654_v2  ;;  %v7925_v2 = vld [vmem:[#allocation2_spill] sm:$0xff] }
 0x482   :  { %v7400_v8 = vpop.f32.mrf.mxu3 }
 0x487   :  { %5007 = vmatmul.msk.bf16.gmra.mxu3 %vm1948_vm0, %v2929_v40 }
 0x48a   :  { %v2834_v63 = vpop.f32.mrf.mxu3 }
 0x48b   :  { %v2846_v61 = vadd.f32 %v2834_v63, %v7356_v21  ;;  %v3009_v21 = vpack.c.bf16 %v1907_v24, %v1907_v24 }
 0x48f   :  { %5024 = vmatmul.msk.bf16.gmra.mxu2 %vm1948_vm0, %v3008_v32  ;;  %v3087_v32 = vpack.c.bf16 %v1915_v34, %v1914_v6 }
 0x492   :  { %v2836_v11 = vpop.f32.mrf.mxu3  ;;  %v2893_v33 = vpop.f32.mrf.mxu2 }
 0x493   :  { %v2917_v46 = vadd.f32 %v2893_v33, %v7360_v48 }
 0x497   :  { %5008 = vmatmul.msk.bf16.gmra.mxu3 %vm1948_vm0, %v2930_v19 }
 0x49a   :  { %v7415_v13 = vpop.f32.mrf.mxu2 }
 0x49f   :  { %5025 = vmatmul.msk.bf16.gmra.mxu2 %vm1948_vm0, %v3009_v21 }
 0x4a2   :  { %v2898_v49 = vpop.f32.mrf.mxu2 }
 0x4a3   :  { %v2919_v48 = vadd.f32 %v2898_v49, %v7369_v57  ;;  %v5653_v49 = vld [vmem:[%s7885_s5 + $0x28] sm:$0xff] }
 0x4a4   :  { %3238 = vmatpush.bf16.msrb.mxu2 %v5653_v49 }
 0x4a7   :  { %5038 = vmatmul.msk.bf16.vlgmr.msra.gmra.mxu3 %vm1948_vm0, %v3084_v17 }
 0x4aa   :  { %v7424_v62 = vpop.f32.mrf.mxu2 }
 0x4b2   :  { %v2903_v31 = vpop.f32.mrf.mxu2 }
 0x4b3   :  { %v2921_v40 = vadd.f32 %v2903_v31, %v2842_v15 }
 0x4b7   :  { %5039 = vmatmul.msk.bf16.gmra.mxu3 %vm1948_vm0, %v3085_v16  ;;  %v5652_v16 = vld [vmem:[%s7885_s5 + $0x20] sm:$0xff] }
 0x4b8   :  { %3239 = vmatpush.bf16.msrb.mxu2 %v5652_v16 }
 0x4ba   :  { %v7431_v57 = vpop.f32.mrf.mxu2 }
 0x4c2   :  { %v2908_v30 = vpop.f32.mrf.mxu2 }
 0x4c3   :  { %v2923_v45 = vadd.f32 %v2908_v30, %v2844_v18 }
 0x4c7   :  { %5040 = vmatmul.msk.bf16.gmra.mxu3 %vm1948_vm0, %v3086_v54 }
 0x4ca   :  { %v7438_v15 = vpop.f32.mrf.mxu2 }
 0x4d2   :  { %v2913_v63 = vpop.f32.mrf.mxu2 }
 0x4d3   :  { %v2925_v18 = vadd.f32 %v2913_v63, %v2846_v61  ;;  %v1771_v61 = vadd.f32 %v6428_v7, %v1402_v22  ;;  %v5659_v63 = vld [vmem:[%s7885_s5 + $0x58] sm:$0xff] }
 0x4d4   :  { %3326 = vmatpush.bf16.msra.mxu2 %v5659_v63 }
 0x4d5   :  { %v1916_v33 = vmax.f32 %v1771_v61, 0.0 }
 0x4d7   :  { %5041 = vmatmul.msk.bf16.gmra.mxu3 %vm1948_vm0, %v3087_v32  ;;  %v3088_v21 = vpack.c.bf16 %v1916_v33, %v1916_v33 }
 0x4d8   :  { %3327 = vmatpush.bf16.msra.mxu2 %v5658_v1  ;;  %v7933_v1 = vld [vmem:[#allocation6_spill] sm:$0xff] }
 0x4da   :  { %v2915_v23 = vpop.f32.mrf.mxu2  ;;  %v2972_v11 = vpop.f32.mrf.mxu3 }
 0x4db   :  { %v2996_v44 = vadd.f32 %v2972_v11, %v2917_v46  ;;  %v5661_v11 = vld [vmem:[%s7885_s5 + $0x68] sm:$0xff] }
 0x4e2   :  { %v7455_v19 = vpop.f32.mrf.mxu3  ;;  %v3051_v27 = vpop.f32.mrf.mxu2 }
 0x4e3   :  { %v7457_v24 = vadd.f32 %v3051_v27, %v2996_v44  ;;  %v5660_v27 = vld [vmem:[%s7885_s5 + $0x60] sm:$0xff] }
 0x4e7   :  { %5042 = vmatmul.msk.bf16.gmra.mxu3 %vm1948_vm0, %v3088_v21  ;;  %v7926_v21 = vld [vmem:[#allocation8_spill] sm:$0xff] }
 0x4ea   :  { %v2977_v55 = vpop.f32.mrf.mxu3  ;;  %v7460_v38 = vpop.f32.mrf.mxu2 }
 0x4eb   :  { %v2998_v46 = vadd.f32 %v2977_v55, %v2919_v48  ;;  %v5649_v48 = vld [vmem:[%s7885_s5 + $0x8] sm:$0xff] }
 0x4ec   :  { %3278 = vmatpush.bf16.msrb.mxu3 %v5649_v48  ;;  %v7928_v48 = vld [vmem:[#allocation14_spill] sm:$0xff] }
 0x4f2   :  { %v7465_v7 = vpop.f32.mrf.mxu3  ;;  %v3056_v56 = vpop.f32.mrf.mxu2 }
 0x4f3   :  { %v7467_v51 = vadd.f32 %v3056_v56, %v2998_v46  ;;  %v7927_v56 = vld [vmem:[#allocation11_spill] sm:$0xff] }
 0x4fa   :  { %v2982_v17 = vpop.f32.mrf.mxu3  ;;  %v7472_v59 = vpop.f32.mrf.mxu2 }
 0x4fb   :  { %v3000_v50 = vadd.f32 %v2982_v17, %v2921_v40  ;;  %v5648_v40 = vld [vmem:[%s7885_s5] sm:$0xff] }
 0x4fc   :  { %3279 = vmatpush.bf16.msrb.mxu3 %v5648_v40 }
 0x500   :  { %3377 = vmatpush.bf16.msra.mxu3 %v5663_v9  ;;  %v7932_v9 = vld [vmem:[#allocation26_spill] sm:$0xff] }
 0x502   :  { %v7477_v53 = vpop.f32.mrf.mxu3  ;;  %v3061_v14 = vpop.f32.mrf.mxu2 }
 0x503   :  { %v7479_v31 = vadd.f32 %v3061_v14, %v3000_v50 }
 0x504   :  { %3378 = vmatpush.bf16.msra.mxu3 %v5662_v10  ;;  %v7934_v10 = vld [vmem:[#allocation3_spill] sm:$0xff] }
 0x508   :  { %3379 = vmatpush.bf16.msra.mxu3 %v5661_v11 }
 0x50a   :  { %v2987_v28 = vpop.f32.mrf.mxu3  ;;  %v7484_v5 = vpop.f32.mrf.mxu2 }
 0x50b   :  { %v3002_v60 = vadd.f32 %v2987_v28, %v2923_v45  ;;  %v2207_v45 = vadd.f32 %v6652_v37, %v2128_v58  ;;  %v7929_v28 = vld [vmem:[#allocation17_spill] sm:$0xff]  ;;  %v7930_v58 = vld [vmem:[#allocation20_spill] sm:$0xff] }
 0x50c   :  { %3380 = vmatpush.bf16.msra.mxu3 %v5660_v27  ;;  %v5666_v27 = vld [vmem:[%s7885_s5 + $0x90] sm:$0xff] }
 0x50d   :  { %v2286_v32 = vadd.f32 %v6743_v42, %v2207_v45 }
 0x50f   :  { %v2365_v36 = vadd.f32 %v6846_v3, %v2286_v32  ;;  %v5657_v3 = vld [vmem:[%s7885_s5 + $0x48] sm:$0xff] }
 0x510   :  { %3328 = vmatpush.bf16.msra.mxu2 %v5657_v3  ;;  %v7935_v3 = vld [vmem:[#allocation9_spill] sm:$0xff] }
 0x511   :  { %v2444_v37 = vadd.f32 %v6937_v52, %v2365_v36  ;;  %v7924_v52 = vld [vmem:[#allocation5_spill] sm:$0xff] }
 0x512   :  { %v7489_v39 = vpop.f32.mrf.mxu3  ;;  %v3066_v30 = vpop.f32.mrf.mxu2  ;;  %v2041_v61 = vadd.f32 %v7925_v2, %v7924_v52 }
 0x513   :  { %v7491_v54 = vadd.f32 %v3066_v30, %v3002_v60  ;;  %v2523_v42 = vadd.f32 %v7040_v25, %v2444_v37  ;;  %v5656_v25 = vld [vmem:[%s7885_s5 + $0x40] sm:$0xff]  ;;  %v2046_v37 = vadd.f32 %v7934_v10, %v7933_v1 }
 0x514   :  { %v2130_v55 = vadd.f32 %v7926_v21, %v2041_v61  ;;  %3329 = vmatpush.bf16.msra.mxu2 %v5656_v25  ;;  %v5668_v21 = vld [vmem:[%s7885_s5 + $0xa0] sm:$0xff] }
 0x515   :  { %v2602_v44 = vadd.f32 %v7136_v47, %v2523_v42  ;;  %v7538_v47 = vld [vmem:[%s7884_s4] ss:$0 sm:$0xff]  ;;  %v5669_v42 = vld [vmem:[%s7885_s5 + $0xa8] sm:$0xff]  ;;  %v2132_v11 = vadd.f32 %v7935_v3, %v2046_v37  ;;  %v7948_v37 = vld [vmem:[#allocation13_spill] sm:$0xff] }
 0x516   :  { %v2209_v49 = vadd.f32 %v7927_v56, %v2130_v55  ;;  %v7938_v55 = vld [vmem:[#allocation15_spill] sm:$0xff]  ;;  %v7939_v56 = vld [vmem:[#allocation18_spill] sm:$0xff]  ;;  %v7949_v3 = vld [vmem:[#allocation16_spill] sm:$0xff] }
 0x517   :  { %v2681_v33 = vadd.f32 %v7239_v43, %v2602_v44  ;;  %v7936_v44 = vld [vmem:[#allocation31_spill] sm:$0xff] }
 0x518   :  { %v2288_v14 = vadd.f32 %v7928_v48, %v2209_v49 }
 0x519   :  { %v2760_v46 = vadd.f32 %v7315_v20, %v2681_v33  ;;  %v7937_v33 = vld [vmem:[#allocation12_spill] sm:$0xff] }
 0x51a   :  { %v2992_v41 = vpop.f32.mrf.mxu3  ;;  %v7496_v6 = vpop.f32.mrf.mxu2  ;;  %v2367_v60 = vadd.f32 %v7929_v28, %v2288_v14  ;;  %v2211_v25 = vadd.f32 %v7937_v33, %v2132_v11  ;;  %v5673_v33 = vld [vmem:[%s7885_s5 + $0xc8] sm:$0xff] }
 0x51b   :  { %v3004_v34 = vadd.f32 %v2992_v41, %v2925_v18  ;;  %v2839_v17 = vadd.f32 %v7364_v26, %v2760_v46 }
 0x51c   :  { %v2446_v26 = vadd.f32 %v7930_v58, %v2367_v60  ;;  %v2290_v46 = vadd.f32 %v7938_v55, %v2211_v25  ;;  %v7942_v60 = vld [vmem:[#allocation27_spill] sm:$0xff]  ;;  %v7952_v55 = vld [vmem:[#allocation25_spill] sm:$0xff] }
 0x51d   :  { %v2918_v16 = vadd.f32 %v7415_v13, %v2839_v17  ;;  %v5665_v17 = vld [vmem:[%s7885_s5 + $0x88] sm:$0xff] }
 0x51e   :  { %v7943_v58 = vld [vmem:[#allocation7_spill] sm:$0xff] }
 0x51f   :  { %v2997_v40 = vadd.f32 %v7455_v19, %v2918_v16  ;;  %v5670_v19 = vld [vmem:[%s7885_s5 + $0xb0] sm:$0xff]  ;;  %v5677_v25 = vld [vmem:[%s7885_s5 + $0xe8] sm:$0xff] }
 0x522   :  { %v2994_v18 = vpop.f32.mrf.mxu3  ;;  %v3071_v22 = vpop.f32.mrf.mxu2 }
 0x523   :  { %v7515_v23 = vadd.f32 %v3071_v22, %v3004_v34  ;;  %v7931_v34 = vld [vmem:[#allocation23_spill] sm:$0xff]  ;;  %v5667_v22 = vld [vmem:[%s7885_s5 + $0x98] sm:$0xff] }
 0x524   :  { %v2525_v13 = vadd.f32 %v7931_v34, %v2446_v26  ;;  %v7944_v26 = vld [vmem:[#allocation4_spill] sm:$0xff]  ;;  %v5675_v34 = vld [vmem:[%s7885_s5 + $0xd8] sm:$0xff] }
 0x526   :  { %v2604_v32 = vadd.f32 %v7932_v9, %v2525_v13  ;;  %v5679_v13 = vld [vmem:[%s7885_s5 + $0xf8] sm:$0xff]  ;;  %v7947_v9 = vld [vmem:[#allocation32_spill] sm:$0xff] }
 0x52a   :  { %v3073_v43 = vpop.f32.mrf.mxu2  ;;  %v3130_v35 = vpop.f32.mrf.mxu3 }
 0x52b   :  { %v3154_v50 = vadd.f32 %v3130_v35, %v7457_v24  ;;  %v3076_v24 = vadd.f32 %v7460_v38, %v2997_v40  ;;  %v2683_v38 = vadd.f32 %v7259_v4, %v2604_v32 }
 0x52d   :  { %v3167_v20 = vadd.f32 %v7538_v47, %v3154_v50  ;;  %v2762_v52 = vadd.f32 %v7936_v44, %v2683_v38  ;;  %v7940_v50 = vld [vmem:[#allocation21_spill] sm:$0xff] }
 0x52f   :  { %v3176_v30 = vmax.f32 %v3167_v20, 0.0  ;;  %v2841_v4 = vadd.f32 %v7377_v29, %v2762_v52  ;;  %v2369_v29 = vadd.f32 %v7939_v56, %v2290_v46  ;;  %v7950_v52 = vld [vmem:[#allocation19_spill] sm:$0xff]  ;;  %v7953_v56 = vld [vmem:[#allocation28_spill] sm:$0xff] }
 0x531   :  { %v3185_v41 = vpack.c.bf16 %v3176_v30, %v3176_v30  ;;  %v2920_v43 = vadd.f32 %v7424_v62, %v2841_v4  ;;  %v2448_v48 = vadd.f32 %v7940_v50, %v2369_v29  ;;  %v7941_v62 = vld [vmem:[#allocation24_spill] sm:$0xff]  ;;  %v7951_v4 = vld [vmem:[#allocation22_spill] sm:$0xff] }
 0x532   :  { %v3132_v45 = vpop.f32.mrf.mxu3 }
 0x533   :  { %v3155_v63 = vadd.f32 %v3132_v45, %v3076_v24  ;;  %5084 = vmatmul.msk.bf16.vlgmr.msrb.gmra.mxu3 %vm3228_vm1, %v3185_v41  ;;  %v2999_v49 = vadd.f32 %v7465_v7, %v2920_v43  ;;  %v2527_v28 = vadd.f32 %v7941_v62, %v2448_v48  ;;  %v5664_v7 = vld [vmem:[%s7885_s5 + $0x80] sm:$0xff]  ;;  %v2051_v24 = vadd.f32 %v7944_v26, %v7943_v58 }
 0x534   :  { %3479 = vmatpush.bf16.msrb.mxu3 %v5671_v0  ;;  %v5672_v43 = vld [vmem:[%s7885_s5 + $0xc0] sm:$0xff] }
 0x535   :  { %v3168_v36 = vadd.f32 %v7538_v47, %v3155_v63  ;;  %v3078_v14 = vadd.f32 %v7472_v59, %v2999_v49  ;;  %v2606_v40 = vadd.f32 %v7942_v60, %v2527_v28  ;;  %v7945_v59 = vld [vmem:[#allocation29_spill] sm:$0xff]  ;;  %v7946_v63 = vld [vmem:[#allocation10_spill] sm:$0xff]  ;;  %v5682_v60 = vld [vmem:[%s7885_s5 + $0x110] sm:$0xff] }
 0x537   :  { %v3177_v18 = vmax.f32 %v3168_v36, 0.0  ;;  %v2685_v41 = vadd.f32 %v7945_v59, %v2606_v40 }
 0x538   :  { %3480 = vmatpush.bf16.msrb.mxu3 %v5670_v19  ;;  %v2134_v19 = vadd.f32 %v7946_v63, %v2051_v24 }
 0x539   :  { %v3194_v2 = vpack.c.bf16 %v3177_v18, %v3177_v18  ;;  %v2764_v32 = vadd.f32 %v7947_v9, %v2685_v41 }
 0x53a   :  { %v3135_v61 = vpop.f32.mrf.mxu3  ;;  %v2213_v38 = vadd.f32 %v7948_v37, %v2134_v19 }
 0x53b   :  { %5067 = vmatmul.msk.bf16.vlgmr.msrb.gmra.mxu2 %vm3228_vm1, %v3194_v2  ;;  %v3156_v35 = vadd.f32 %v3135_v61, %v7467_v51  ;;  %v2843_v18 = vadd.f32 %v7388_v12, %v2764_v32 }
 0x53c   :  { %3428 = vmatpush.bf16.msrb.mxu2 %v5667_v22  ;;  %3481 = vmatpush.bf16.msrb.mxu3 %v5669_v42  ;;  %v5674_v22 = vld [vmem:[%s7885_s5 + $0xd0] sm:$0xff]  ;;  %v2292_v11 = vadd.f32 %v7949_v3, %v2213_v38  ;;  %v5696_v3 = vld [vmem:[%s7887_s7 + $0x64] sm:$0xf] }
 0x53d   :  { %v3169_v16 = vadd.f32 %v7538_v47, %v3156_v35  ;;  %v5678_v42 = vld [vmem:[%s7885_s5 + $0xf0] sm:$0xff]  ;;  %v2922_v44 = vadd.f32 %v7431_v57, %v2843_v18  ;;  %v5676_v35 = vld [vmem:[%s7885_s5 + $0xe0] sm:$0xff] }
 0x53e   :  { %v2371_v2 = vadd.f32 %v7950_v52, %v2292_v11  ;;  %v5694_v52 = vld [vmem:[%s7887_s7 + $0x4c] sm:$0xf0] }
 0x53f   :  { %v3178_v30 = vmax.f32 %v3169_v16, 0.0  ;;  %v3001_v61 = vadd.f32 %v7477_v53, %v2922_v44  ;;  %v7955_v16 = vld [vmem:[#allocation33_spill] sm:$0xff]  ;;  %v5312_v44 = vld [vmem:[%s7887_s7 + $0x70] sm:$0xf0] }
 0x540   :  { %3429 = vmatpush.bf16.msrb.mxu2 %v5666_v27  ;;  %3482 = vmatpush.bf16.msrb.mxu3 %v5668_v21  ;;  %v2450_v27 = vadd.f32 %v7951_v4, %v2371_v2  ;;  %v5315_v2 = vor.u32 %v5696_v3, %v5312_v44  ;;  %v5707_v44 = vld [vmem:[%s7888_s9 + $0x38] sm:$0xff] }
 0x541   :  { %v3285_v36 = vpack.c.bf16 %v3178_v30, %v3178_v30  ;;  %v3080_v57 = vadd.f32 %v7484_v5, %v3001_v61  ;;  %v5692_v61 = vld [vmem:[%s7887_s7 + $0x44] sm:$0xf] }
 0x542   :  { %v3137_v20 = vpop.f32.mrf.mxu3  ;;  %v2529_v46 = vadd.f32 %v7952_v55, %v2450_v27  ;;  %v5688_v55 = vld [vmem:[%s7887_s7 + $0x24] sm:$0xf] }
 0x543   :  { %v3157_v51 = vadd.f32 %v3137_v20, %v3078_v14  ;;  %v5683_v14 = vld [vmem:[%s7885_s5 + $0x118] sm:$0xff] }
 0x544   :  { %3430 = vmatpush.bf16.msrb.mxu2 %v5665_v17  ;;  %v2608_v29 = vadd.f32 %v7953_v56, %v2529_v46  ;;  %v7954_v17 = vld [vmem:[#allocation30_spill] sm:$0xff]  ;;  %v5686_v56 = vld [vmem:[%s7887_s7 + $0xc] sm:$0xf0] }
 0x545   :  { %v3170_v0 = vadd.f32 %v7538_v47, %v3157_v51 }
 0x546   :  { %v2687_v50 = vadd.f32 %v7954_v17, %v2608_v29  ;;  %v5684_v29 = vld [vmem:[%s7887_s7 + $0x4] sm:$0xf] }
 0x547   :  { %v3179_v45 = vmax.f32 %v3170_v0, 0.0 }
 0x548   :  { %3431 = vmatpush.bf16.msrb.mxu2 %v5664_v7  ;;  %v2766_v20 = vadd.f32 %v7955_v16, %v2687_v50  ;;  %v5699_v16 = vld [vmem:[%s7887_s7 + $0x74] sm:$0xf0] }
 0x549   :  { %v3336_v1 = vpack.c.bf16 %v3179_v45, %v3179_v45 }
 0x54a   :  { %v3140_v10 = vpop.f32.mrf.mxu3  ;;  %v2845_v7 = vadd.f32 %v7400_v8, %v2766_v20  ;;  %v5681_v8 = vld [vmem:[%s7885_s5 + $0x108] sm:$0xff] }
 0x54b   :  { %5109 = vmatmul.msk.bf16.vlgmr.msra.gmra.mxu2 %vm3228_vm1, %v3285_v36  ;;  %5134 = vmatmul.msk.bf16.vlgmr.msra.gmra.mxu3 %vm3228_vm1, %v3336_v1  ;;  %v3158_v12 = vadd.f32 %v3140_v10, %v7479_v31  ;;  %v5697_v20 = vld [vmem:[%s7887_s7 + $0x6c] sm:$0xf] }
 0x54c   :  { %3530 = vmatpush.bf16.msra.mxu2 %v5675_v34  ;;  %3581 = vmatpush.bf16.msra.mxu3 %v5679_v13  ;;  %v2924_v40 = vadd.f32 %v7438_v15, %v2845_v7  ;;  %v5680_v15 = vld [vmem:[%s7885_s5 + $0x100] sm:$0xff]  ;;  %v5695_v7 = vld [vmem:[%s7887_s7 + $0x54] sm:$0xf0] }
 0x54d   :  { %v3171_v31 = vadd.f32 %v7538_v47, %v3158_v12  ;;  %v5294_v12 = vld [vmem:[%s7887_s7 + $0x40] sm:$0xf] }
 0x54e   :  { %v3003_v0 = vadd.f32 %v7489_v39, %v2924_v40  ;;  %v5693_v40 = vld [vmem:[%s7887_s7 + $0x4c] sm:$0xf] }
 0x54f   :  { %v3180_v49 = vmax.f32 %v3171_v31, 0.0  ;;  %v5278_v31 = vld [vmem:[%s7887_s7 + $0x20] sm:$0xf] }
 0x550   :  { %3531 = vmatpush.bf16.msra.mxu2 %v5674_v22  ;;  %3582 = vmatpush.bf16.msra.mxu3 %v5678_v42  ;;  %v3082_v58 = vadd.f32 %v7496_v6, %v3003_v0  ;;  %v5310_v42 = vld [vmem:[%s7887_s7 + $0x60] sm:$0xf] }
 0x551   :  { %v3387_v62 = vpack.c.bf16 %v3180_v49, %v3180_v49 }
 0x552   :  { %v3142_v21 = vpop.f32.mrf.mxu3 }
 0x553   :  { %v3159_v53 = vadd.f32 %v3142_v21, %v3080_v57  ;;  %v5690_v21 = vld [vmem:[%s7887_s7 + $0x2c] sm:$0xf0] }
 0x554   :  { %3532 = vmatpush.bf16.msra.mxu2 %v5673_v33  ;;  %3583 = vmatpush.bf16.msra.mxu3 %v5677_v25  ;;  %v5296_v33 = vld [vmem:[%s7887_s7 + $0x50] sm:$0xf0]  ;;  %v5295_v25 = vor.u32 %v5694_v52, %v5294_v12  ;;  %v5279_v46 = vor.u32 %v5690_v21, %v5278_v31  ;;  %v5715_v12 = vld [vmem:[%s7888_s9 + $0x78] sm:$0xff] }
 0x555   :  { %v3172_v5 = vadd.f32 %v7538_v47, %v3159_v53  ;;  %v5299_v4 = vor.u32 %v5692_v61, %v5296_v33  ;;  %v5280_v53 = vld [vmem:[%s7887_s7 + $0x30] sm:$0xf0]  ;;  %v5703_v31 = vld [vmem:[%s7888_s9 + $0x18] sm:$0xff] }
 0x556   :  { %v5706_v61 = vld [vmem:[%s7888_s9 + $0x30] sm:$0xff]  ;;  %v5711_v21 = vld [vmem:[%s7888_s9 + $0x58] sm:$0xff] }
 0x557   :  { %v3181_v48 = vmax.f32 %v3172_v5, 0.0  ;;  %v5264_v5 = vld [vmem:[%s7887_s7 + $0x10] sm:$0xf0] }
 0x558   :  { %3533 = vmatpush.bf16.msra.mxu2 %v5672_v43  ;;  %3584 = vmatpush.bf16.msra.mxu3 %v5676_v35  ;;  %v5283_v43 = vor.u32 %v5688_v55, %v5280_v53  ;;  %v5262_v35 = vld [vmem:[%s7887_s7] sm:$0xf]  ;;  %v5267_v17 = vor.u32 %v5684_v29, %v5264_v5  ;;  %v5714_v33 = vld [vmem:[%s7888_s9 + $0x70] sm:$0xff]  ;;  %v5701_v53 = vld [vmem:[%s7888_s9 + $0x8] sm:$0xff] }
 0x559   :  { %v3438_v28 = vpack.c.bf16 %v3181_v48, %v3181_v48  ;;  %v5263_v49 = vor.u32 %v5686_v56, %v5262_v35  ;;  %v5702_v55 = vld [vmem:[%s7888_s9 + $0x10] sm:$0xff]  ;;  %v5700_v35 = vld [vmem:[%s7888_s9] sm:$0xff]  ;;  %v5723_v29 = vld [vmem:[%s7888_s9 + $0xb8] sm:$0xff] }
 0x55a   :  { %v3145_v51 = vpop.f32.mrf.mxu3  ;;  %v5708_v56 = vld [vmem:[%s7888_s9 + $0x40] sm:$0xff]  ;;  %v5722_v5 = vld [vmem:[%s7888_s9 + $0xb0] sm:$0xff] }
 0x55b   :  { %5159 = vmatmul.msk.bf16.vlgmr.msrb.gmra.mxu2 %vm3228_vm1, %v3387_v62  ;;  %5184 = vmatmul.msk.bf16.vlgmr.msrb.gmra.mxu3 %vm3228_vm1, %v3438_v28  ;;  %v3160_v30 = vadd.f32 %v3145_v51, %v7491_v54  ;;  %v5320_v28 = vld [vmem:[%s7887_s7 + $0x78] sm:$0xf0]  ;;  %v5302_v51 = vld [vmem:[%s7887_s7 + $0x48] sm:$0xf] }
 0x55c   :  { %3632 = vmatpush.bf16.msrb.mxu2 %v5683_v14  ;;  %v5318_v14 = vld [vmem:[%s7887_s7 + $0x68] sm:$0xf]  ;;  %v5303_v0 = vor.u32 %v5695_v7, %v5302_v51  ;;  %v5726_v51 = vld [vmem:[%s7888_s9 + $0xd0] sm:$0xff] }
 0x55d   :  { %v3173_v26 = vadd.f32 %v7538_v47, %v3160_v30  ;;  %v5319_v62 = vor.u32 %v5699_v16, %v5318_v14  ;;  %v5304_v30 = vld [vmem:[%s7887_s7 + $0x58] sm:$0xf0]  ;;  %v5720_v14 = vld [vmem:[%s7888_s9 + $0xa0] sm:$0xff]  ;;  %v5717_v7 = vld [vmem:[%s7888_s9 + $0x88] sm:$0xff] }
 0x55e   :  { %v5728_v16 = vld [vmem:[%s7888_s9 + $0xe0] sm:$0xff] }
 0x55f   :  { %v3182_v41 = vmax.f32 %v3173_v26, 0.0  ;;  %v5691_v26 = vld [vmem:[%s7887_s7 + $0x34] sm:$0xf0] }
 0x560   :  { %3633 = vmatpush.bf16.msrb.mxu2 %v5682_v60  ;;  %v5323_v60 = vor.u32 %v5697_v20, %v5320_v28  ;;  %v5719_v20 = vld [vmem:[%s7888_s9 + $0x98] sm:$0xff]  ;;  %v5718_v28 = vld [vmem:[%s7888_s9 + $0x90] sm:$0xff] }
 0x561   :  { %v3489_v45 = vpack.c.bf16 %v3182_v41, %v3182_v41 }
 0x562   :  { %v3147_v24 = vpop.f32.mrf.mxu3 }
 0x563   :  { %v3161_v59 = vadd.f32 %v3147_v24, %v3082_v58  ;;  %v5286_v58 = vld [vmem:[%s7887_s7 + $0x28] sm:$0xf] }
 0x564   :  { %3634 = vmatpush.bf16.msrb.mxu2 %v5681_v8  ;;  %v5307_v8 = vor.u32 %v5693_v40, %v5304_v30  ;;  %v5716_v40 = vld [vmem:[%s7888_s9 + $0x80] sm:$0xff] }
 0x565   :  { %v3174_v54 = vadd.f32 %v7538_v47, %v3161_v59  ;;  %v5689_v59 = vld [vmem:[%s7887_s7 + $0x2c] sm:$0xf]  ;;  %v5724_v30 = vld [vmem:[%s7888_s9 + $0xc0] sm:$0xff] }
 0x567   :  { %v3183_v39 = vmax.f32 %v3174_v54, 0.0  ;;  %v5287_v54 = vor.u32 %v5691_v26, %v5286_v58 }
 0x568   :  { %3635 = vmatpush.bf16.msrb.mxu2 %v5680_v15  ;;  %v5288_v15 = vld [vmem:[%s7887_s7 + $0x38] sm:$0xf0] }
 0x569   :  { %v3540_v34 = vpack.c.bf16 %v3183_v39, %v3183_v39 }
 0x56a   :  { %v3150_v13 = vpop.f32.mrf.mxu3 }
 0x56b   :  { %v3162_v63 = vadd.f32 %v3150_v13, %v7515_v23  ;;  %5209 = vmatmul.msk.bf16.vlgmr.msra.gmra.mxu2 %vm3228_vm1, %v3489_v45  ;;  %5234 = vmatmul.msk.bf16.vlgmr.msra.gmra.mxu3 %vm3228_vm1, %v3540_v34  ;;  %v5291_v34 = vor.u32 %v5689_v59, %v5288_v15  ;;  %v5270_v13 = vld [vmem:[%s7887_s7 + $0x8] sm:$0xf] }
 0x56c   :  { %3775 = vmatpush.bf16.msra.mxu2 %v5315_v2 }
 0x56d   :  { %v3175_v6 = vadd.f32 %v7538_v47, %v3162_v63  ;;  %v5698_v47 = vld [vmem:[%s7887_s7 + $0x6c] sm:$0xf0]  ;;  %v5687_v63 = vld [vmem:[%s7887_s7 + $0x14] sm:$0xf0] }
 0x56e   :  { %v5311_v11 = vor.u32 %v5698_v47, %v5310_v42  ;;  %v5750_v42 = vld [vmem:[%s7886_s6] ss:$0 sm:$0xff] }
 0x56f   :  { %v3184_v9 = vmax.f32 %v3175_v6, 0.0  ;;  %v5685_v6 = vld [vmem:[%s7887_s7 + $0xc] sm:$0xf] }
 0x570   :  { %3762 = vmatpush.bf16.msrb.mxu3 %v5311_v11  ;;  %3776 = vmatpush.bf16.msra.mxu2 %v5299_v4  ;;  %v5713_v4 = vld [vmem:[%s7888_s9 + $0x68] sm:$0xff] }
 0x571   :  { %v3591_v32 = vpack.c.bf16 %v3184_v9, %v3184_v9 }
 0x572   :  { %v3152_v19 = vpop.f32.mrf.mxu3 }
 0x573   :  { %v5272_v19 = vld [vmem:[%s7887_s7 + $0x18] sm:$0xf0] }
 0x574   :  { %3763 = vmatpush.bf16.msrb.mxu3 %v5295_v25  ;;  %3777 = vmatpush.bf16.msra.mxu2 %v5283_v43  ;;  %v5705_v25 = vld [vmem:[%s7888_s9 + $0x28] sm:$0xff] }
 0x575   :  { %v5709_v43 = vld [vmem:[%s7888_s9 + $0x48] sm:$0xff] }
 0x578   :  { %3764 = vmatpush.bf16.msrb.mxu3 %v5279_v46  ;;  %3778 = vmatpush.bf16.msra.mxu2 %v5267_v17  ;;  %v5710_v46 = vld [vmem:[%s7888_s9 + $0x50] sm:$0xff] }
 0x579   :  { %v5730_v17 = vld [vmem:[%s7888_s9 + $0xf0] sm:$0xff] }
 0x57b   :  { %5259 = vmatmul.msk.bf16.vlgmr.msrb.gmra.mxu2 %vm3228_vm1, %v3591_v32  ;;  %v5271_v32 = vor.u32 %v5687_v63, %v5270_v13 }
 0x57c   :  { %3765 = vmatpush.bf16.msrb.mxu3 %v5263_v49  ;;  %3801 = vmatpush.bf16.msrb.mxu2 %v5323_v60  ;;  %v5731_v49 = vld [vmem:[%s7888_s9 + $0xf8] sm:$0xff]  ;;  %v5725_v60 = vld [vmem:[%s7888_s9 + $0xc8] sm:$0xff] }
 0x580   :  { %3788 = vmatpush.bf16.msra.mxu3 %v5319_v62  ;;  %3802 = vmatpush.bf16.msrb.mxu2 %v5307_v8  ;;  %v5727_v62 = vld [vmem:[%s7888_s9 + $0xd8] sm:$0xff] }
 0x584   :  { %3789 = vmatpush.bf16.msra.mxu3 %v5303_v0  ;;  %3803 = vmatpush.bf16.msrb.mxu2 %v5291_v34  ;;  %v3665_v0 = vld [vmem:[%s7890_s8] sm:$0xf] }
 0x585   :  { %v3667_v8 = vperm.slane %v3665_v0, 0  ;;  %v3668_v58 = vperm.slane %v3665_v0, 1  ;;  %v3669_v63 = vperm.slane %v3665_v0, 2 }
 0x588   :  { %3790 = vmatpush.bf16.msra.mxu3 %v5287_v54 }
 0x58c   :  { %3791 = vmatpush.bf16.msra.mxu3 %v5271_v32 }
 0x5b6   :  { %v3281_v36 = vpop.f32.mrf.mxu3 }
 0x5be   :  { %v3241_v1 = vpop.f32.mrf.mxu2  ;;  %v3283_v10 = vpop.f32.mrf.mxu3 }
 0x5bf   :  { %v3282_v24 = vadd.f32 %v3281_v36, %v3241_v1  ;;  %v5275_v36 = vor.u32 %v5685_v6, %v5272_v19  ;;  %v3670_v6 = vperm.slane %v3665_v0, 3 }
 0x5c1   :  { %3804 = vmatpush.bf16.msrb.mxu2 %v5275_v36 }
 0x5c6   :  { %v3243_v37 = vpop.f32.mrf.mxu2 }
 0x5ce   :  { %v3331_v38 = vpop.f32.mrf.mxu2  ;;  %v7669_v18 = vpop.f32.mrf.mxu3 }
 0x5cf   :  { %v3335_v41 = vadd.f32 %v3331_v38, %v3282_v24 }
 0x5d1   :  { %v3386_v9 = vadd.f32 %v7669_v18, %v3335_v41 }
 0x5d6   :  { %v3333_v22 = vpop.f32.mrf.mxu2  ;;  %v3384_v23 = vpop.f32.mrf.mxu3 }
 0x5de   :  { %v3433_v27 = vpop.f32.mrf.mxu2  ;;  %v3484_v57 = vpop.f32.mrf.mxu3 }
 0x5df   :  { %v3437_v1 = vadd.f32 %v3433_v27, %v3386_v9  ;;  %v5704_v27 = vld [vmem:[%s7888_s9 + $0x20] sm:$0xff] }
 0x5e1   :  { %v3488_v38 = vadd.f32 %v3484_v57, %v3437_v1  ;;  %v5712_v57 = vld [vmem:[%s7888_s9 + $0x60] sm:$0xff] }
 0x5e6   :  { %v3435_v50 = vpop.f32.mrf.mxu2  ;;  %v3486_v48 = vpop.f32.mrf.mxu3 }
 0x5e7   :  { %v5721_v50 = vld [vmem:[%s7888_s9 + $0xa8] sm:$0xff] }
 0x5e8   :  { %v5729_v48 = vld [vmem:[%s7888_s9 + $0xe8] sm:$0xff] }
 0x5ee   :  { %v3535_v39 = vpop.f32.mrf.mxu2  ;;  %v3586_v45 = vpop.f32.mrf.mxu3 }
 0x5ef   :  { %v3539_v22 = vadd.f32 %v3535_v39, %v3488_v38 }
 0x5f1   :  { %v3590_v23 = vadd.f32 %v3586_v45, %v3539_v22 }
 0x5f6   :  { %v3537_v10 = vpop.f32.mrf.mxu2  ;;  %v3588_v37 = vpop.f32.mrf.mxu3 }
 0x5fe   :  { %v3637_v47 = vpop.f32.mrf.mxu2 }
 0x5ff   :  { %v3641_v3 = vadd.f32 %v3637_v47, %v3590_v23 }
 0x601   :  { %v3646_v11 = vadd.f32 %v5750_v42, %v3641_v3  ;;  %v5751_v3 = vld [vmem:[%s7889_s10] ss:$0 sm:$0xff] }
 0x603   :  { %v3647_v18 = vmax.f32 %v3646_v11, 0.0 }
 0x605   :  { %v3648_v52 = vpack.c.bf16 %v3647_v18, %v3647_v18 }
 0x606   :  { %v3639_v2 = vpop.f32.mrf.mxu2 }
 0x607   :  { %5324 = vmatmul.msk.bf16.vlgmr.msrb.gmra.mxu3 %vm3228_vm1, %v3648_v52  ;;  %5325 = vmatmul.msk.bf16.vlgmr.msra.gmra.mxu2 %vm3228_vm1, %v3648_v52 }
 0x608   :  { %4078 = vmatpush.bf16.msrb.mxu3 %v5707_v44  ;;  %4091 = vmatpush.bf16.msra.mxu2 %v5715_v12 }
 0x60c   :  { %4079 = vmatpush.bf16.msrb.mxu3 %v5706_v61  ;;  %4092 = vmatpush.bf16.msra.mxu2 %v5714_v33 }
 0x610   :  { %4080 = vmatpush.bf16.msrb.mxu3 %v5705_v25  ;;  %4093 = vmatpush.bf16.msra.mxu2 %v5713_v4 }
 0x614   :  { %4081 = vmatpush.bf16.msrb.mxu3 %v5704_v27  ;;  %4094 = vmatpush.bf16.msra.mxu2 %v5712_v57 }
 0x617   :  { %5326 = vmatmul.msk.bf16.vlgmr.msra.gmra.mxu3 %vm3228_vm1, %v3648_v52  ;;  %5327 = vmatmul.msk.bf16.vlgmr.msrb.gmra.mxu2 %vm3228_vm1, %v3648_v52 }
 0x618   :  { %4082 = vmatpush.bf16.msrb.mxu3 %v5703_v31  ;;  %4095 = vmatpush.bf16.msra.mxu2 %v5711_v21 }
 0x61c   :  { %4083 = vmatpush.bf16.msrb.mxu3 %v5702_v55  ;;  %4096 = vmatpush.bf16.msra.mxu2 %v5710_v46 }
 0x620   :  { %4084 = vmatpush.bf16.msrb.mxu3 %v5701_v53  ;;  %4097 = vmatpush.bf16.msra.mxu2 %v5709_v43 }
 0x624   :  { %4085 = vmatpush.bf16.msrb.mxu3 %v5700_v35  ;;  %4098 = vmatpush.bf16.msra.mxu2 %v5708_v56 }
 0x628   :  { %4104 = vmatpush.bf16.msra.mxu3 %v5723_v29  ;;  %4117 = vmatpush.bf16.msrb.mxu2 %v5731_v49 }
 0x62c   :  { %4105 = vmatpush.bf16.msra.mxu3 %v5722_v5  ;;  %4118 = vmatpush.bf16.msrb.mxu2 %v5730_v17 }
 0x630   :  { %4106 = vmatpush.bf16.msra.mxu3 %v5721_v50  ;;  %4119 = vmatpush.bf16.msrb.mxu2 %v5729_v48 }
 0x634   :  { %4107 = vmatpush.bf16.msra.mxu3 %v5720_v14  ;;  %4120 = vmatpush.bf16.msrb.mxu2 %v5728_v16 }
 0x638   :  { %4108 = vmatpush.bf16.msra.mxu3 %v5719_v20  ;;  %4121 = vmatpush.bf16.msrb.mxu2 %v5727_v62 }
 0x63c   :  { %4109 = vmatpush.bf16.msra.mxu3 %v5718_v28  ;;  %4122 = vmatpush.bf16.msrb.mxu2 %v5726_v51 }
 0x640   :  { %4110 = vmatpush.bf16.msra.mxu3 %v5717_v7  ;;  %4123 = vmatpush.bf16.msrb.mxu2 %v5725_v60 }
 0x644   :  { %4111 = vmatpush.bf16.msra.mxu3 %v5716_v40  ;;  %4124 = vmatpush.bf16.msrb.mxu2 %v5724_v30 }
 0x68a   :  { %v3767_v26 = vpop.f32.mrf.mxu3  ;;  %v3780_v24 = vpop.f32.mrf.mxu2 }
 0x68b   :  { %v3768_v59 = vadd.f32 %v3767_v26, %v3667_v8  ;;  %v3781_v15 = vadd.f32 %v3780_v24, %v3668_v58 }
 0x68d   :  { %v3810_v41 = vmax.f32 %v3768_v59, 0.0  ;;  %v3811_v54 = vmax.f32 %v3781_v15, 0.0 }
 0x68f   :  { %v3814_v39 = vpack.c.bf16 %v3810_v41, %v3810_v41  ;;  %v3815_v45 = vpack.c.bf16 %v3811_v54, %v3811_v54 }
 0x691   :  { %4086 = vmatmul.bf16.vlgmr.msrb.gmra.mxu3 %v3814_v39  ;;  %4099 = vmatmul.bf16.vlgmr.msra.gmra.mxu2 %v3815_v45 }
 0x692   :  { %v3769_v34 = vpop.f32.mrf.mxu3  ;;  %v3782_v13 = vpop.f32.mrf.mxu2 }
 0x69a   :  { %v3793_v19 = vpop.f32.mrf.mxu3  ;;  %v3806_v9 = vpop.f32.mrf.mxu2 }
 0x69b   :  { %v3794_v32 = vadd.f32 %v3793_v19, %v3669_v63  ;;  %v3807_v36 = vadd.f32 %v3806_v9, %v3670_v6 }
 0x69d   :  { %v3812_v1 = vmax.f32 %v3794_v32, 0.0  ;;  %v3813_v10 = vmax.f32 %v3807_v36, 0.0 }
 0x69f   :  { %v3816_v37 = vpack.c.bf16 %v3812_v1, %v3812_v1  ;;  %v3817_v38 = vpack.c.bf16 %v3813_v10, %v3813_v10 }
 0x6a1   :  { %4112 = vmatmul.bf16.vlgmr.msra.gmra.mxu3 %v3816_v37  ;;  %4125 = vmatmul.bf16.vlgmr.msrb.gmra.mxu2 %v3817_v38 }
 0x6a2   :  { %v3795_v22 = vpop.f32.mrf.mxu3  ;;  %v3808_v23 = vpop.f32.mrf.mxu2 }
 0x714   :  { %v4087_v42 = vpop.f32.mrf.mxu3  ;;  %v4100_v47 = vpop.f32.mrf.mxu2 }
 0x715   :  { %v4088_v44 = vadd.f32 %v5751_v3, %v4087_v42 }
 0x717   :  { %v4101_v12 = vadd.f32 %v4100_v47, %v4088_v44 }
 0x71c   :  { %v4089_v11 = vpop.f32.mrf.mxu3  ;;  %v4102_v18 = vpop.f32.mrf.mxu2 }
 0x724   :  { %v4113_v52 = vpop.f32.mrf.mxu3  ;;  %v4126_v2 = vpop.f32.mrf.mxu2 }
 0x725   :  { %v4114_v61 = vadd.f32 %v4113_v52, %v4101_v12 }
 0x727   :  { %v4127_v33 = vadd.f32 %v4126_v2, %v4114_v61 }
 0x729   :  { %4130 = vst [vmem:[%s7891_s11] sm:$0xff] %v4127_v33 }
 0x72c   :  { %v4115_v25 = vpop.f32.mrf.mxu3  ;;  %v4128_v4 = vpop.f32.mrf.mxu2 }

</bundles_post_ra>
